<compile_context>
chip_gen: v6e
topology: v6e:2x2x1
jax: 0.10.0
libtpu: 0.0.40
codegen_flags: <defaults>
</compile_context>

<pallas_src>
import functools

import jax
import jax.numpy as jnp
from jax import lax
from jax.experimental import pallas as pl
from jax.experimental.pallas import tpu as pltpu


_VMEM = pl.BlockSpec(memory_space=pltpu.MemorySpace.VMEM)
_POOL_OFFSETS = ((0, 0), (0, 1), (1, 0), (1, 1))


# ---------------------------------------------------------------------------
# Pallas kernels
# ---------------------------------------------------------------------------
def conv_pool_t_kernel(p_ref, w_ref, b_ref, o_ref):
    """maxpool(relu(conv1)) as a transposed (lane-dense) GEMM.

    p_ref: (4, K, M)   im2col patches, one slab per 2x2-pool offset
    w_ref: (Cout, K)   b_ref: (Cout, 1)   o_ref: (Cout, M)
    """
    w = w_ref[...]
    b = b_ref[...]

    def branch(i):
        y = jnp.dot(w, p_ref[i], preferred_element_type=jnp.float32) + b
        return jnp.maximum(y, 0.0)

    o_ref[...] = jnp.maximum(
        jnp.maximum(branch(0), branch(1)),
        jnp.maximum(branch(2), branch(3)),
    ).astype(o_ref.dtype)


def conv_pool_fc_kernel(p_ref, wc_ref, bc_ref, w1_ref, b1_ref,
                        w2_ref, b2_ref, w3_ref, b3_ref, o_ref,
                        *, n_pos, npad):
    """conv2 + relu + 2x2 maxpool + fc1 + relu + fc2 + relu + fc3 + softmax.

    p_ref:  (4, n_pos*npad, Kc)  per-pool-offset patches, rows = (pos, sample),
                                 samples zero-padded to npad (multiple of 8)
    wc_ref: (Kc, Cc)             bc_ref: (1, Cc)
    w1_ref: (n_pos, Cc, F1)      fc1 weight permuted into per-position blocks
                                 (equivalent to torch.flatten's NCHW order)
    b1_ref: (1, F1)   w2_ref: (F1, F2)   b2_ref: (1, F2)
    w3_ref: (F2, F3)  b3_ref: (1, F3)    o_ref:  (npad, F3)
    """
    wc = wc_ref[...]
    bc = bc_ref[...]

    def branch(i):
        y = jnp.dot(p_ref[i], wc, preferred_element_type=jnp.float32) + bc
        return jnp.maximum(y, 0.0)

    # relu(conv2) + 2x2 max-pool; rows = (spatial position, padded sample)
    a = jnp.maximum(
        jnp.maximum(branch(0), branch(1)),
        jnp.maximum(branch(2), branch(3)),
    )                                                    # (n_pos*npad, Cc)

    # fc1: 25 INDEPENDENT per-position GEMM blocks combined with a log-depth
    # pairwise add tree (no serial accumulation chain).  Row slices are
    # sublane-aligned since npad is a multiple of 8.
    parts = [jnp.dot(a[p * npad:(p + 1) * npad, :], w1_ref[p],
                     preferred_element_type=jnp.float32)
             for p in range(n_pos)]
    while len(parts) > 1:
        nxt = [parts[i] + parts[i + 1] for i in range(0, len(parts) - 1, 2)]
        if len(parts) % 2:
            nxt.append(parts[-1])
        parts = nxt
    h = jnp.maximum(parts[0] + b1_ref[...], 0.0)                         # fc1+relu

    h = jnp.maximum(
        jnp.dot(h, w2_ref[...], preferred_element_type=jnp.float32) + b2_ref[...],
        0.0)                                                             # fc2+relu
    # Dropout(p=0.2) is the identity in eval mode.
    # TODO(synk): training-mode dropout RNG mask not implemented.
    logits = (jnp.dot(h, w3_ref[...], preferred_element_type=jnp.float32)
              + b3_ref[...])                                             # fc3

    # row softmax: multiply by reciprocal (exact) instead of dividing
    m = jnp.max(logits, axis=1, keepdims=True)
    e = jnp.exp(logits - m)
    inv = pl.reciprocal(jnp.sum(e, axis=1, keepdims=True), approx=False)
    o_ref[...] = (e * inv).astype(o_ref.dtype)


# ---------------------------------------------------------------------------
# Wrappers (jit-fused XLA glue + pallas_call plumbing)
# ---------------------------------------------------------------------------
def _patches(x, lhs_spec, out_spec, k):
    """Full-resolution im2col in one XLA op.  Feature order = (cin, kh, kw)."""
    return lax.conv_general_dilated_patches(
        x, (k, k), (1, 1), "VALID",
        dimension_numbers=(lhs_spec, "OIHW", out_spec),
        precision=lax.Precision.HIGHEST)


def conv1_pool_block(x_nchw, w, b, k=5):
    """relu(conv1) + 2x2 maxpool fused in one kernel; returns (C1, N, PH, PW)."""
    N = x_nchw.shape[0]
    cout = w.shape[0]
    pats = _patches(x_nchw, "NCHW", "CNHW", k)           # (K, N, Hc, Wc)
    K, _, hc, wc_ = pats.shape
    ph, pw = hc // 2, wc_ // 2
    m = N * ph * pw
    stacked = jnp.stack(
        [pats[:, :, dh::2, dw::2].reshape(K, m) for dh, dw in _POOL_OFFSETS],
        axis=0)                                          # (4, K, M), M lane-dense
    out = pl.pallas_call(
        conv_pool_t_kernel,
        out_shape=jax.ShapeDtypeStruct((cout, m), jnp.float32),
        in_specs=[_VMEM] * 3,
        out_specs=_VMEM,
    )(stacked, w, b)
    # already in the "CNHW" layout conv2's patch extraction consumes
    return out.reshape(cout, N, ph, pw)


def conv2_fc_block(a1_cnhw, params, k=5):
    """conv2+relu+pool and the entire FC head in a single fused kernel."""
    _, N, _, _ = a1_cnhw.shape
    pats = _patches(a1_cnhw, "CNHW", "HWNC", k)          # (Hc, Wc, N, Kc)
    hc, wc_, _, Kc = pats.shape
    ph, pw = hc // 2, wc_ // 2
    n_pos = ph * pw
    npad = ((N + 7) // 8) * 8          # sublane-aligned per-position row blocks
    assert n_pos == params["fc1_w"].shape[0]

    def off(dh, dw):
        q = pats[dh::2, dw::2].reshape(n_pos, N, Kc)     # rows (pos, n), no transpose
        q = jnp.pad(q, ((0, 0), (0, npad - N), (0, 0)))
        return q.reshape(n_pos * npad, Kc)

    stacked = jnp.stack([off(dh, dw) for dh, dw in _POOL_OFFSETS], axis=0)

    kern = functools.partial(conv_pool_fc_kernel, n_pos=n_pos, npad=npad)
    out = pl.pallas_call(
        kern,
        out_shape=jax.ShapeDtypeStruct((npad, params["fc3_w"].shape[1]),
                                       jnp.float32),
        in_specs=[_VMEM] * 9,
        out_specs=_VMEM,
    )(stacked, params["conv2_w"], params["conv2_b"],
      params["fc1_w"], params["fc1_b"],
      params["fc2_w"], params["fc2_b"],
      params["fc3_w"], params["fc3_b"])
    return out[:N]


def cnn_forward(params, x_nchw):
    """Forward pass matching the PyTorch CNN module (eval mode)."""
    a1 = conv1_pool_block(x_nchw, params["conv1_w"], params["conv1_b"])
    return conv2_fc_block(a1, params)


# ---------------------------------------------------------------------------
# Parameters: PyTorch-layout init + one-time kernel-layout preparation
# ---------------------------------------------------------------------------
def init_torch_params(key, fc1_in):
    """PyTorch-layout parameters, default U(-1/sqrt(fan_in), +1/sqrt(fan_in))."""
    def u(k, shape, fan_in):
        bound = 1.0 / (fan_in ** 0.5)
        return jax.random.uniform(k, shape, jnp.float32, -bound, bound)

    ks = jax.random.split(key, 10)
    return {
        "conv1_w": u(ks[0], (6, 3, 5, 5), 3 * 25), "conv1_b": u(ks[1], (6,), 3 * 25),
        "conv2_w": u(ks[2], (16, 6, 5, 5), 6 * 25), "conv2_b": u(ks[3], (16,), 6 * 25),
        "fc1_w": u(ks[4], (300, fc1_in), fc1_in), "fc1_b": u(ks[5], (300,), fc1_in),
        "fc2_w": u(ks[6], (84, 300), 300), "fc2_b": u(ks[7], (84,), 300),
        "fc3_w": u(ks[8], (2, 84), 84), "fc3_b": u(ks[9], (2,), 84),
    }


def prepare_params(tp, pooled_hw=(5, 5)):
    """One-time permutation of torch-layout weights into kernel-friendly layouts."""
    ph, pw = pooled_hw
    c1, cin, kh, kw = tp["conv1_w"].shape
    c2 = tp["conv2_w"].shape[0]
    f1, fc1_in = tp["fc1_w"].shape
    assert fc1_in == c2 * ph * pw
    return {
        # conv_general_dilated_patches feature order is (cin, kh, kw): conv1 as
        # (Cout, Cin*KH*KW) is a pure reshape, conv2 as (Cin*KH*KW, Cout).
        "conv1_w": tp["conv1_w"].reshape(c1, cin * kh * kw),
        "conv1_b": tp["conv1_b"].reshape(c1, 1),
        "conv2_w": tp["conv2_w"].transpose(1, 2, 3, 0).reshape(-1, c2),
        "conv2_b": tp["conv2_b"].reshape(1, c2),
        # fc1 permuted into per-spatial-position (Cout, F1) blocks; equivalent
        # to torch.flatten's NCHW column index c*ph*pw + pos.
        "fc1_w": tp["fc1_w"].T.reshape(c2, ph * pw, f1).transpose(1, 0, 2),
        "fc1_b": tp["fc1_b"].reshape(1, f1),
        "fc2_w": tp["fc2_w"].T, "fc2_b": tp["fc2_b"].reshape(1, -1),
        "fc3_w": tp["fc3_w"].T, "fc3_b": tp["fc3_b"].reshape(1, -1),
    }


# ---------------------------------------------------------------------------
# Pure-XLA reference of the same module (for in-script validation)
# ---------------------------------------------------------------------------
def cnn_reference(tp, x_nchw):
    def conv(x, w, b):
        y = lax.conv_general_dilated(x, w, (1, 1), "VALID",
                                     dimension_numbers=("NCHW", "OIHW", "NCHW"))
        return y + b.reshape(1, -1, 1, 1)

    def pool(x):
        return lax.reduce_window(x, -jnp.inf, lax.max,
                                 (1, 1, 2, 2), (1, 1, 2, 2), "VALID")

    x = pool(jax.nn.relu(conv(x_nchw, tp["conv1_w"], tp["conv1_b"])))
    x = pool(jax.nn.relu(conv(x, tp["conv2_w"], tp["conv2_b"])))
    x = x.reshape(x.shape[0], -1)
    x = jax.nn.relu(x @ tp["fc1_w"].T + tp["fc1_b"])
    x = jax.nn.relu(x @ tp["fc2_w"].T + tp["fc2_b"])
    x = x @ tp["fc3_w"].T + tp["fc3_b"]
    return jax.nn.softmax(x, axis=1)


# ---------------------------------------------------------------------------
if __name__ == "__main__":
    key = jax.random.PRNGKey(0)
    k_param, k_x = jax.random.split(key)

    # Small input consistent with the conv stack: 32x32 -> conv5 -> 28 -> pool
    # -> 14 -> conv5 -> 10 -> pool -> 5  => flatten 16*5*5 = 400 features.
    N, C, H, W = 2, 3, 32, 32
    fc1_in = 16 * 5 * 5

    torch_params = init_torch_params(k_param, fc1_in)
    params = prepare_params(torch_params)
    x = jax.random.normal(k_x, (N, C, H, W), jnp.float32)

    fwd = jax.jit(cnn_forward)
    out = jax.block_until_ready(fwd(params, x))

    assert out.shape == (N, 2), out.shape
    row_sums = jnp.sum(out, axis=1)
    assert bool(jnp.all(jnp.abs(row_sums - 1.0) < 1e-5)), row_sums

    # cross-check the fused Pallas pipeline against a pure-XLA reference
    ref = jax.jit(cnn_reference)(torch_params, x)
    max_err = float(jnp.max(jnp.abs(out - ref)))
    assert max_err < 1e-3, max_err

    print("KERNEL_OK")
</pallas_src>

<mosaic_0001>
module attributes {stable_mosaic.version = 11 : i64} {
  func.func @conv_pool_t_kernel(%arg0: memref<4x75x392xf32, #tpu.memory_space<vmem>>, %arg1: memref<6x75xf32, #tpu.memory_space<vmem>>, %arg2: memref<6x1xf32, #tpu.memory_space<vmem>>, %arg3: memref<6x392xf32, #tpu.memory_space<vmem>>) attributes {dimension_semantics = [], scalar_prefetch = 0 : i64, scratch_operands = 0 : i64, tpu.core_type = #tpu.core_type<tc>} {
    %c0 = arith.constant 0 : index
    %c0_0 = arith.constant 0 : index
    %0 = vector.load %arg1[%c0, %c0_0] : memref<6x75xf32, #tpu.memory_space<vmem>>, vector<6x75xf32>
    %c0_1 = arith.constant 0 : index
    %c0_2 = arith.constant 0 : index
    %1 = vector.load %arg2[%c0_1, %c0_2] : memref<6x1xf32, #tpu.memory_space<vmem>>, vector<6x1xf32>
    %c0_3 = arith.constant 0 : index
    %c0_4 = arith.constant 0 : index
    %c0_5 = arith.constant 0 : index
    %2 = vector.load %arg0[%c0_3, %c0_4, %c0_5] : memref<4x75x392xf32, #tpu.memory_space<vmem>>, vector<1x75x392xf32>
    %3 = vector.shape_cast %2 : vector<1x75x392xf32> to vector<75x392xf32>
    %cst = arith.constant dense<0.000000e+00> : vector<6x392xf32>
    %4 = tpu.matmul %0, %3, %cst {dimension_numbers = #tpu.dot_dimension_numbers<[1], [0], [0], [1], [0, 0, 1, 1], [], []>} : vector<6x75xf32>, vector<75x392xf32>, vector<6x392xf32> -> vector<6x392xf32>
    %5 = vector.broadcast %1 : vector<6x1xf32> to vector<6x392xf32>
    %6 = arith.addf %4, %5 : vector<6x392xf32>
    %cst_6 = arith.constant 0.000000e+00 : f32
    %7 = vector.broadcast %cst_6 : f32 to vector<6x392xf32>
    %8 = arith.maximumf %6, %7 : vector<6x392xf32>
    %c1 = arith.constant 1 : index
    %c0_7 = arith.constant 0 : index
    %c0_8 = arith.constant 0 : index
    %9 = vector.load %arg0[%c1, %c0_7, %c0_8] : memref<4x75x392xf32, #tpu.memory_space<vmem>>, vector<1x75x392xf32>
    %10 = vector.shape_cast %9 : vector<1x75x392xf32> to vector<75x392xf32>
    %cst_9 = arith.constant dense<0.000000e+00> : vector<6x392xf32>
    %11 = tpu.matmul %0, %10, %cst_9 {dimension_numbers = #tpu.dot_dimension_numbers<[1], [0], [0], [1], [0, 0, 1, 1], [], []>} : vector<6x75xf32>, vector<75x392xf32>, vector<6x392xf32> -> vector<6x392xf32>
    %12 = vector.broadcast %1 : vector<6x1xf32> to vector<6x392xf32>
    %13 = arith.addf %11, %12 : vector<6x392xf32>
    %cst_10 = arith.constant 0.000000e+00 : f32
    %14 = vector.broadcast %cst_10 : f32 to vector<6x392xf32>
    %15 = arith.maximumf %13, %14 : vector<6x392xf32>
    %16 = arith.maximumf %8, %15 : vector<6x392xf32>
    %c2 = arith.constant 2 : index
    %c0_11 = arith.constant 0 : index
    %c0_12 = arith.constant 0 : index
    %17 = vector.load %arg0[%c2, %c0_11, %c0_12] : memref<4x75x392xf32, #tpu.memory_space<vmem>>, vector<1x75x392xf32>
    %18 = vector.shape_cast %17 : vector<1x75x392xf32> to vector<75x392xf32>
    %cst_13 = arith.constant dense<0.000000e+00> : vector<6x392xf32>
    %19 = tpu.matmul %0, %18, %cst_13 {dimension_numbers = #tpu.dot_dimension_numbers<[1], [0], [0], [1], [0, 0, 1, 1], [], []>} : vector<6x75xf32>, vector<75x392xf32>, vector<6x392xf32> -> vector<6x392xf32>
    %20 = vector.broadcast %1 : vector<6x1xf32> to vector<6x392xf32>
    %21 = arith.addf %19, %20 : vector<6x392xf32>
    %cst_14 = arith.constant 0.000000e+00 : f32
    %22 = vector.broadcast %cst_14 : f32 to vector<6x392xf32>
    %23 = arith.maximumf %21, %22 : vector<6x392xf32>
    %c3 = arith.constant 3 : index
    %c0_15 = arith.constant 0 : index
    %c0_16 = arith.constant 0 : index
    %24 = vector.load %arg0[%c3, %c0_15, %c0_16] : memref<4x75x392xf32, #tpu.memory_space<vmem>>, vector<1x75x392xf32>
    %25 = vector.shape_cast %24 : vector<1x75x392xf32> to vector<75x392xf32>
    %cst_17 = arith.constant dense<0.000000e+00> : vector<6x392xf32>
    %26 = tpu.matmul %0, %25, %cst_17 {dimension_numbers = #tpu.dot_dimension_numbers<[1], [0], [0], [1], [0, 0, 1, 1], [], []>} : vector<6x75xf32>, vector<75x392xf32>, vector<6x392xf32> -> vector<6x392xf32>
    %27 = vector.broadcast %1 : vector<6x1xf32> to vector<6x392xf32>
    %28 = arith.addf %26, %27 : vector<6x392xf32>
    %cst_18 = arith.constant 0.000000e+00 : f32
    %29 = vector.broadcast %cst_18 : f32 to vector<6x392xf32>
    %30 = arith.maximumf %28, %29 : vector<6x392xf32>
    %31 = arith.maximumf %23, %30 : vector<6x392xf32>
    %32 = arith.maximumf %16, %31 : vector<6x392xf32>
    %c0_19 = arith.constant 0 : index
    %c0_20 = arith.constant 0 : index
    %33 = vector.load %arg3[%c0_19, %c0_20] : memref<6x392xf32, #tpu.memory_space<vmem>>, vector<6x392xf32>
    tpu.vector_store %arg3[%c0_19, %c0_20], %32 {strides = array<i32>} : memref<6x392xf32, #tpu.memory_space<vmem>>, vector<6x392xf32>,
    return
  }
}

module attributes {stable_mosaic.version = 11 : i64} {
  func.func @conv_pool_fc_kernel(%arg0: memref<4x200x150xf32, #tpu.memory_space<vmem>>, %arg1: memref<150x16xf32, #tpu.memory_space<vmem>>, %arg2: memref<1x16xf32, #tpu.memory_space<vmem>>, %arg3: memref<25x16x300xf32, #tpu.memory_space<vmem>>, %arg4: memref<1x300xf32, #tpu.memory_space<vmem>>, %arg5: memref<300x84xf32, #tpu.memory_space<vmem>>, %arg6: memref<1x84xf32, #tpu.memory_space<vmem>>, %arg7: memref<84x2xf32, #tpu.memory_space<vmem>>, %arg8: memref<1x2xf32, #tpu.memory_space<vmem>>, %arg9: memref<8x2xf32, #tpu.memory_space<vmem>>) attributes {dimension_semantics = [], scalar_prefetch = 0 : i64, scratch_operands = 0 : i64, tpu.core_type = #tpu.core_type<tc>} {
    %c0 = arith.constant 0 : index
    %c0_0 = arith.constant 0 : index
    %0 = vector.load %arg1[%c0, %c0_0] : memref<150x16xf32, #tpu.memory_space<vmem>>, vector<150x16xf32>
    %c0_1 = arith.constant 0 : index
    %c0_2 = arith.constant 0 : index
    %1 = vector.load %arg2[%c0_1, %c0_2] : memref<1x16xf32, #tpu.memory_space<vmem>>, vector<1x16xf32>
    %c0_3 = arith.constant 0 : index
    %c0_4 = arith.constant 0 : index
    %c0_5 = arith.constant 0 : index
    %2 = vector.load %arg0[%c0_3, %c0_4, %c0_5] : memref<4x200x150xf32, #tpu.memory_space<vmem>>, vector<1x200x150xf32>
    %3 = vector.shape_cast %2 : vector<1x200x150xf32> to vector<200x150xf32>
    %cst = arith.constant dense<0.000000e+00> : vector<200x16xf32>
    %4 = tpu.matmul %3, %0, %cst {dimension_numbers = #tpu.dot_dimension_numbers<[1], [0], [0], [1], [0, 0, 1, 1], [], []>} : vector<200x150xf32>, vector<150x16xf32>, vector<200x16xf32> -> vector<200x16xf32>
    %5 = vector.broadcast %1 : vector<1x16xf32> to vector<200x16xf32>
    %6 = arith.addf %4, %5 : vector<200x16xf32>
    %cst_6 = arith.constant 0.000000e+00 : f32
    %7 = vector.broadcast %cst_6 : f32 to vector<200x16xf32>
    %8 = arith.maximumf %6, %7 : vector<200x16xf32>
    %c1 = arith.constant 1 : index
    %c0_7 = arith.constant 0 : index
    %c0_8 = arith.constant 0 : index
    %9 = vector.load %arg0[%c1, %c0_7, %c0_8] : memref<4x200x150xf32, #tpu.memory_space<vmem>>, vector<1x200x150xf32>
    %10 = vector.shape_cast %9 : vector<1x200x150xf32> to vector<200x150xf32>
    %cst_9 = arith.constant dense<0.000000e+00> : vector<200x16xf32>
    %11 = tpu.matmul %10, %0, %cst_9 {dimension_numbers = #tpu.dot_dimension_numbers<[1], [0], [0], [1], [0, 0, 1, 1], [], []>} : vector<200x150xf32>, vector<150x16xf32>, vector<200x16xf32> -> vector<200x16xf32>
    %12 = vector.broadcast %1 : vector<1x16xf32> to vector<200x16xf32>
    %13 = arith.addf %11, %12 : vector<200x16xf32>
    %cst_10 = arith.constant 0.000000e+00 : f32
    %14 = vector.broadcast %cst_10 : f32 to vector<200x16xf32>
    %15 = arith.maximumf %13, %14 : vector<200x16xf32>
    %16 = arith.maximumf %8, %15 : vector<200x16xf32>
    %c2 = arith.constant 2 : index
    %c0_11 = arith.constant 0 : index
    %c0_12 = arith.constant 0 : index
    %17 = vector.load %arg0[%c2, %c0_11, %c0_12] : memref<4x200x150xf32, #tpu.memory_space<vmem>>, vector<1x200x150xf32>
    %18 = vector.shape_cast %17 : vector<1x200x150xf32> to vector<200x150xf32>
    %cst_13 = arith.constant dense<0.000000e+00> : vector<200x16xf32>
    %19 = tpu.matmul %18, %0, %cst_13 {dimension_numbers = #tpu.dot_dimension_numbers<[1], [0], [0], [1], [0, 0, 1, 1], [], []>} : vector<200x150xf32>, vector<150x16xf32>, vector<200x16xf32> -> vector<200x16xf32>
    %20 = vector.broadcast %1 : vector<1x16xf32> to vector<200x16xf32>
    %21 = arith.addf %19, %20 : vector<200x16xf32>
    %cst_14 = arith.constant 0.000000e+00 : f32
    %22 = vector.broadcast %cst_14 : f32 to vector<200x16xf32>
    %23 = arith.maximumf %21, %22 : vector<200x16xf32>
    %c3 = arith.constant 3 : index
    %c0_15 = arith.constant 0 : index
    %c0_16 = arith.constant 0 : index
    %24 = vector.load %arg0[%c3, %c0_15, %c0_16] : memref<4x200x150xf32, #tpu.memory_space<vmem>>, vector<1x200x150xf32>
    %25 = vector.shape_cast %24 : vector<1x200x150xf32> to vector<200x150xf32>
    %cst_17 = arith.constant dense<0.000000e+00> : vector<200x16xf32>
    %26 = tpu.matmul %25, %0, %cst_17 {dimension_numbers = #tpu.dot_dimension_numbers<[1], [0], [0], [1], [0, 0, 1, 1], [], []>} : vector<200x150xf32>, vector<150x16xf32>, vector<200x16xf32> -> vector<200x16xf32>
    %27 = vector.broadcast %1 : vector<1x16xf32> to vector<200x16xf32>
    %28 = arith.addf %26, %27 : vector<200x16xf32>
    %cst_18 = arith.constant 0.000000e+00 : f32
    %29 = vector.broadcast %cst_18 : f32 to vector<200x16xf32>
    %30 = arith.maximumf %28, %29 : vector<200x16xf32>
    %31 = arith.maximumf %23, %30 : vector<200x16xf32>
    %32 = arith.maximumf %16, %31 : vector<200x16xf32>
    %33 = vector.extract_strided_slice %32 {offsets = [0, 0], sizes = [8, 16], strides = [1, 1]} : vector<200x16xf32> to vector<8x16xf32>
    %c0_19 = arith.constant 0 : index
    %c0_20 = arith.constant 0 : index
    %c0_21 = arith.constant 0 : index
    %34 = vector.load %arg3[%c0_19, %c0_20, %c0_21] : memref<25x16x300xf32, #tpu.memory_space<vmem>>, vector<1x16x300xf32>
    %35 = vector.shape_cast %34 : vector<1x16x300xf32> to vector<16x300xf32>
    %cst_22 = arith.constant dense<0.000000e+00> : vector<8x300xf32>
    %36 = tpu.matmul %33, %35, %cst_22 {dimension_numbers = #tpu.dot_dimension_numbers<[1], [0], [0], [1], [0, 0, 1, 1], [], []>} : vector<8x16xf32>, vector<16x300xf32>, vector<8x300xf32> -> vector<8x300xf32>
    %37 = vector.extract_strided_slice %32 {offsets = [8, 0], sizes = [8, 16], strides = [1, 1]} : vector<200x16xf32> to vector<8x16xf32>
    %c1_23 = arith.constant 1 : index
    %c0_24 = arith.constant 0 : index
    %c0_25 = arith.constant 0 : index
    %38 = vector.load %arg3[%c1_23, %c0_24, %c0_25] : memref<25x16x300xf32, #tpu.memory_space<vmem>>, vector<1x16x300xf32>
    %39 = vector.shape_cast %38 : vector<1x16x300xf32> to vector<16x300xf32>
    %cst_26 = arith.constant dense<0.000000e+00> : vector<8x300xf32>
    %40 = tpu.matmul %37, %39, %cst_26 {dimension_numbers = #tpu.dot_dimension_numbers<[1], [0], [0], [1], [0, 0, 1, 1], [], []>} : vector<8x16xf32>, vector<16x300xf32>, vector<8x300xf32> -> vector<8x300xf32>
    %41 = vector.extract_strided_slice %32 {offsets = [16, 0], sizes = [8, 16], strides = [1, 1]} : vector<200x16xf32> to vector<8x16xf32>
    %c2_27 = arith.constant 2 : index
    %c0_28 = arith.constant 0 : index
    %c0_29 = arith.constant 0 : index
    %42 = vector.load %arg3[%c2_27, %c0_28, %c0_29] : memref<25x16x300xf32, #tpu.memory_space<vmem>>, vector<1x16x300xf32>
    %43 = vector.shape_cast %42 : vector<1x16x300xf32> to vector<16x300xf32>
    %cst_30 = arith.constant dense<0.000000e+00> : vector<8x300xf32>
    %44 = tpu.matmul %41, %43, %cst_30 {dimension_numbers = #tpu.dot_dimension_numbers<[1], [0], [0], [1], [0, 0, 1, 1], [], []>} : vector<8x16xf32>, vector<16x300xf32>, vector<8x300xf32> -> vector<8x300xf32>
    %45 = vector.extract_strided_slice %32 {offsets = [24, 0], sizes = [8, 16], strides = [1, 1]} : vector<200x16xf32> to vector<8x16xf32>
    %c3_31 = arith.constant 3 : index
    %c0_32 = arith.constant 0 : index
    %c0_33 = arith.constant 0 : index
    %46 = vector.load %arg3[%c3_31, %c0_32, %c0_33] : memref<25x16x300xf32, #tpu.memory_space<vmem>>, vector<1x16x300xf32>
    %47 = vector.shape_cast %46 : vector<1x16x300xf32> to vector<16x300xf32>
    %cst_34 = arith.constant dense<0.000000e+00> : vector<8x300xf32>
    %48 = tpu.matmul %45, %47, %cst_34 {dimension_numbers = #tpu.dot_dimension_numbers<[1], [0], [0], [1], [0, 0, 1, 1], [], []>} : vector<8x16xf32>, vector<16x300xf32>, vector<8x300xf32> -> vector<8x300xf32>
    %49 = vector.extract_strided_slice %32 {offsets = [32, 0], sizes = [8, 16], strides = [1, 1]} : vector<200x16xf32> to vector<8x16xf32>
    %c4 = arith.constant 4 : index
    %c0_35 = arith.constant 0 : index
    %c0_36 = arith.constant 0 : index
    %50 = vector.load %arg3[%c4, %c0_35, %c0_36] : memref<25x16x300xf32, #tpu.memory_space<vmem>>, vector<1x16x300xf32>
    %51 = vector.shape_cast %50 : vector<1x16x300xf32> to vector<16x300xf32>
    %cst_37 = arith.constant dense<0.000000e+00> : vector<8x300xf32>
    %52 = tpu.matmul %49, %51, %cst_37 {dimension_numbers = #tpu.dot_dimension_numbers<[1], [0], [0], [1], [0, 0, 1, 1], [], []>} : vector<8x16xf32>, vector<16x300xf32>, vector<8x300xf32> -> vector<8x300xf32>
    %53 = vector.extract_strided_slice %32 {offsets = [40, 0], sizes = [8, 16], strides = [1, 1]} : vector<200x16xf32> to vector<8x16xf32>
    %c5 = arith.constant 5 : index
    %c0_38 = arith.constant 0 : index
    %c0_39 = arith.constant 0 : index
    %54 = vector.load %arg3[%c5, %c0_38, %c0_39] : memref<25x16x300xf32, #tpu.memory_space<vmem>>, vector<1x16x300xf32>
    %55 = vector.shape_cast %54 : vector<1x16x300xf32> to vector<16x300xf32>
    %cst_40 = arith.constant dense<0.000000e+00> : vector<8x300xf32>
    %56 = tpu.matmul %53, %55, %cst_40 {dimension_numbers = #tpu.dot_dimension_numbers<[1], [0], [0], [1], [0, 0, 1, 1], [], []>} : vector<8x16xf32>, vector<16x300xf32>, vector<8x300xf32> -> vector<8x300xf32>
    %57 = vector.extract_strided_slice %32 {offsets = [48, 0], sizes = [8, 16], strides = [1, 1]} : vector<200x16xf32> to vector<8x16xf32>
    %c6 = arith.constant 6 : index
    %c0_41 = arith.constant 0 : index
    %c0_42 = arith.constant 0 : index
    %58 = vector.load %arg3[%c6, %c0_41, %c0_42] : memref<25x16x300xf32, #tpu.memory_space<vmem>>, vector<1x16x300xf32>
    %59 = vector.shape_cast %58 : vector<1x16x300xf32> to vector<16x300xf32>
    %cst_43 = arith.constant dense<0.000000e+00> : vector<8x300xf32>
    %60 = tpu.matmul %57, %59, %cst_43 {dimension_numbers = #tpu.dot_dimension_numbers<[1], [0], [0], [1], [0, 0, 1, 1], [], []>} : vector<8x16xf32>, vector<16x300xf32>, vector<8x300xf32> -> vector<8x300xf32>
    %61 = vector.extract_strided_slice %32 {offsets = [56, 0], sizes = [8, 16], strides = [1, 1]} : vector<200x16xf32> to vector<8x16xf32>
    %c7 = arith.constant 7 : index
    %c0_44 = arith.constant 0 : index
    %c0_45 = arith.constant 0 : index
    %62 = vector.load %arg3[%c7, %c0_44, %c0_45] : memref<25x16x300xf32, #tpu.memory_space<vmem>>, vector<1x16x300xf32>
    %63 = vector.shape_cast %62 : vector<1x16x300xf32> to vector<16x300xf32>
    %cst_46 = arith.constant dense<0.000000e+00> : vector<8x300xf32>
    %64 = tpu.matmul %61, %63, %cst_46 {dimension_numbers = #tpu.dot_dimension_numbers<[1], [0], [0], [1], [0, 0, 1, 1], [], []>} : vector<8x16xf32>, vector<16x300xf32>, vector<8x300xf32> -> vector<8x300xf32>
    %65 = vector.extract_strided_slice %32 {offsets = [64, 0], sizes = [8, 16], strides = [1, 1]} : vector<200x16xf32> to vector<8x16xf32>
    %c8 = arith.constant 8 : index
    %c0_47 = arith.constant 0 : index
    %c0_48 = arith.constant 0 : index
    %66 = vector.load %arg3[%c8, %c0_47, %c0_48] : memref<25x16x300xf32, #tpu.memory_space<vmem>>, vector<1x16x300xf32>
    %67 = vector.shape_cast %66 : vector<1x16x300xf32> to vector<16x300xf32>
    %cst_49 = arith.constant dense<0.000000e+00> : vector<8x300xf32>
    %68 = tpu.matmul %65, %67, %cst_49 {dimension_numbers = #tpu.dot_dimension_numbers<[1], [0], [0], [1], [0, 0, 1, 1], [], []>} : vector<8x16xf32>, vector<16x300xf32>, vector<8x300xf32> -> vector<8x300xf32>
    %69 = vector.extract_strided_slice %32 {offsets = [72, 0], sizes = [8, 16], strides = [1, 1]} : vector<200x16xf32> to vector<8x16xf32>
    %c9 = arith.constant 9 : index
    %c0_50 = arith.constant 0 : index
    %c0_51 = arith.constant 0 : index
    %70 = vector.load %arg3[%c9, %c0_50, %c0_51] : memref<25x16x300xf32, #tpu.memory_space<vmem>>, vector<1x16x300xf32>
    %71 = vector.shape_cast %70 : vector<1x16x300xf32> to vector<16x300xf32>
    %cst_52 = arith.constant dense<0.000000e+00> : vector<8x300xf32>
    %72 = tpu.matmul %69, %71, %cst_52 {dimension_numbers = #tpu.dot_dimension_numbers<[1], [0], [0], [1], [0, 0, 1, 1], [], []>} : vector<8x16xf32>, vector<16x300xf32>, vector<8x300xf32> -> vector<8x300xf32>
    %73 = vector.extract_strided_slice %32 {offsets = [80, 0], sizes = [8, 16], strides = [1, 1]} : vector<200x16xf32> to vector<8x16xf32>
    %c10 = arith.constant 10 : index
    %c0_53 = arith.constant 0 : index
    %c0_54 = arith.constant 0 : index
    %74 = vector.load %arg3[%c10, %c0_53, %c0_54] : memref<25x16x300xf32, #tpu.memory_space<vmem>>, vector<1x16x300xf32>
    %75 = vector.shape_cast %74 : vector<1x16x300xf32> to vector<16x300xf32>
    %cst_55 = arith.constant dense<0.000000e+00> : vector<8x300xf32>
    %76 = tpu.matmul %73, %75, %cst_55 {dimension_numbers = #tpu.dot_dimension_numbers<[1], [0], [0], [1], [0, 0, 1, 1], [], []>} : vector<8x16xf32>, vector<16x300xf32>, vector<8x300xf32> -> vector<8x300xf32>
    %77 = vector.extract_strided_slice %32 {offsets = [88, 0], sizes = [8, 16], strides = [1, 1]} : vector<200x16xf32> to vector<8x16xf32>
    %c11 = arith.constant 11 : index
    %c0_56 = arith.constant 0 : index
    %c0_57 = arith.constant 0 : index
    %78 = vector.load %arg3[%c11, %c0_56, %c0_57] : memref<25x16x300xf32, #tpu.memory_space<vmem>>, vector<1x16x300xf32>
    %79 = vector.shape_cast %78 : vector<1x16x300xf32> to vector<16x300xf32>
    %cst_58 = arith.constant dense<0.000000e+00> : vector<8x300xf32>
    %80 = tpu.matmul %77, %79, %cst_58 {dimension_numbers = #tpu.dot_dimension_numbers<[1], [0], [0], [1], [0, 0, 1, 1], [], []>} : vector<8x16xf32>, vector<16x300xf32>, vector<8x300xf32> -> vector<8x300xf32>
    %81 = vector.extract_strided_slice %32 {offsets = [96, 0], sizes = [8, 16], strides = [1, 1]} : vector<200x16xf32> to vector<8x16xf32>
    %c12 = arith.constant 12 : index
    %c0_59 = arith.constant 0 : index
    %c0_60 = arith.constant 0 : index
    %82 = vector.load %arg3[%c12, %c0_59, %c0_60] : memref<25x16x300xf32, #tpu.memory_space<vmem>>, vector<1x16x300xf32>
    %83 = vector.shape_cast %82 : vector<1x16x300xf32> to vector<16x300xf32>
    %cst_61 = arith.constant dense<0.000000e+00> : vector<8x300xf32>
    %84 = tpu.matmul %81, %83, %cst_61 {dimension_numbers = #tpu.dot_dimension_numbers<[1], [0], [0], [1], [0, 0, 1, 1], [], []>} : vector<8x16xf32>, vector<16x300xf32>, vector<8x300xf32> -> vector<8x300xf32>
    %85 = vector.extract_strided_slice %32 {offsets = [104, 0], sizes = [8, 16], strides = [1, 1]} : vector<200x16xf32> to vector<8x16xf32>
    %c13 = arith.constant 13 : index
    %c0_62 = arith.constant 0 : index
    %c0_63 = arith.constant 0 : index
    %86 = vector.load %arg3[%c13, %c0_62, %c0_63] : memref<25x16x300xf32, #tpu.memory_space<vmem>>, vector<1x16x300xf32>
    %87 = vector.shape_cast %86 : vector<1x16x300xf32> to vector<16x300xf32>
    %cst_64 = arith.constant dense<0.000000e+00> : vector<8x300xf32>
    %88 = tpu.matmul %85, %87, %cst_64 {dimension_numbers = #tpu.dot_dimension_numbers<[1], [0], [0], [1], [0, 0, 1, 1], [], []>} : vector<8x16xf32>, vector<16x300xf32>, vector<8x300xf32> -> vector<8x300xf32>
    %89 = vector.extract_strided_slice %32 {offsets = [112, 0], sizes = [8, 16], strides = [1, 1]} : vector<200x16xf32> to vector<8x16xf32>
    %c14 = arith.constant 14 : index
    %c0_65 = arith.constant 0 : index
    %c0_66 = arith.constant 0 : index
    %90 = vector.load %arg3[%c14, %c0_65, %c0_66] : memref<25x16x300xf32, #tpu.memory_space<vmem>>, vector<1x16x300xf32>
    %91 = vector.shape_cast %90 : vector<1x16x300xf32> to vector<16x300xf32>
    %cst_67 = arith.constant dense<0.000000e+00> : vector<8x300xf32>
    %92 = tpu.matmul %89, %91, %cst_67 {dimension_numbers = #tpu.dot_dimension_numbers<[1], [0], [0], [1], [0, 0, 1, 1], [], []>} : vector<8x16xf32>, vector<16x300xf32>, vector<8x300xf32> -> vector<8x300xf32>
    %93 = vector.extract_strided_slice %32 {offsets = [120, 0], sizes = [8, 16], strides = [1, 1]} : vector<200x16xf32> to vector<8x16xf32>
    %c15 = arith.constant 15 : index
    %c0_68 = arith.constant 0 : index
    %c0_69 = arith.constant 0 : index
    %94 = vector.load %arg3[%c15, %c0_68, %c0_69] : memref<25x16x300xf32, #tpu.memory_space<vmem>>, vector<1x16x300xf32>
    %95 = vector.shape_cast %94 : vector<1x16x300xf32> to vector<16x300xf32>
    %cst_70 = arith.constant dense<0.000000e+00> : vector<8x300xf32>
    %96 = tpu.matmul %93, %95, %cst_70 {dimension_numbers = #tpu.dot_dimension_numbers<[1], [0], [0], [1], [0, 0, 1, 1], [], []>} : vector<8x16xf32>, vector<16x300xf32>, vector<8x300xf32> -> vector<8x300xf32>
    %97 = vector.extract_strided_slice %32 {offsets = [128, 0], sizes = [8, 16], strides = [1, 1]} : vector<200x16xf32> to vector<8x16xf32>
    %c16 = arith.constant 16 : index
    %c0_71 = arith.constant 0 : index
    %c0_72 = arith.constant 0 : index
    %98 = vector.load %arg3[%c16, %c0_71, %c0_72] : memref<25x16x300xf32, #tpu.memory_space<vmem>>, vector<1x16x300xf32>
    %99 = vector.shape_cast %98 : vector<1x16x300xf32> to vector<16x300xf32>
    %cst_73 = arith.constant dense<0.000000e+00> : vector<8x300xf32>
    %100 = tpu.matmul %97, %99, %cst_73 {dimension_numbers = #tpu.dot_dimension_numbers<[1], [0], [0], [1], [0, 0, 1, 1], [], []>} : vector<8x16xf32>, vector<16x300xf32>, vector<8x300xf32> -> vector<8x300xf32>
    %101 = vector.extract_strided_slice %32 {offsets = [136, 0], sizes = [8, 16], strides = [1, 1]} : vector<200x16xf32> to vector<8x16xf32>
    %c17 = arith.constant 17 : index
    %c0_74 = arith.constant 0 : index
    %c0_75 = arith.constant 0 : index
    %102 = vector.load %arg3[%c17, %c0_74, %c0_75] : memref<25x16x300xf32, #tpu.memory_space<vmem>>, vector<1x16x300xf32>
    %103 = vector.shape_cast %102 : vector<1x16x300xf32> to vector<16x300xf32>
    %cst_76 = arith.constant dense<0.000000e+00> : vector<8x300xf32>
    %104 = tpu.matmul %101, %103, %cst_76 {dimension_numbers = #tpu.dot_dimension_numbers<[1], [0], [0], [1], [0, 0, 1, 1], [], []>} : vector<8x16xf32>, vector<16x300xf32>, vector<8x300xf32> -> vector<8x300xf32>
    %105 = vector.extract_strided_slice %32 {offsets = [144, 0], sizes = [8, 16], strides = [1, 1]} : vector<200x16xf32> to vector<8x16xf32>
    %c18 = arith.constant 18 : index
    %c0_77 = arith.constant 0 : index
    %c0_78 = arith.constant 0 : index
    %106 = vector.load %arg3[%c18, %c0_77, %c0_78] : memref<25x16x300xf32, #tpu.memory_space<vmem>>, vector<1x16x300xf32>
    %107 = vector.shape_cast %106 : vector<1x16x300xf32> to vector<16x300xf32>
    %cst_79 = arith.constant dense<0.000000e+00> : vector<8x300xf32>
    %108 = tpu.matmul %105, %107, %cst_79 {dimension_numbers = #tpu.dot_dimension_numbers<[1], [0], [0], [1], [0, 0, 1, 1], [], []>} : vector<8x16xf32>, vector<16x300xf32>, vector<8x300xf32> -> vector<8x300xf32>
    %109 = vector.extract_strided_slice %32 {offsets = [152, 0], sizes = [8, 16], strides = [1, 1]} : vector<200x16xf32> to vector<8x16xf32>
    %c19 = arith.constant 19 : index
    %c0_80 = arith.constant 0 : index
    %c0_81 = arith.constant 0 : index
    %110 = vector.load %arg3[%c19, %c0_80, %c0_81] : memref<25x16x300xf32, #tpu.memory_space<vmem>>, vector<1x16x300xf32>
    %111 = vector.shape_cast %110 : vector<1x16x300xf32> to vector<16x300xf32>
    %cst_82 = arith.constant dense<0.000000e+00> : vector<8x300xf32>
    %112 = tpu.matmul %109, %111, %cst_82 {dimension_numbers = #tpu.dot_dimension_numbers<[1], [0], [0], [1], [0, 0, 1, 1], [], []>} : vector<8x16xf32>, vector<16x300xf32>, vector<8x300xf32> -> vector<8x300xf32>
    %113 = vector.extract_strided_slice %32 {offsets = [160, 0], sizes = [8, 16], strides = [1, 1]} : vector<200x16xf32> to vector<8x16xf32>
    %c20 = arith.constant 20 : index
    %c0_83 = arith.constant 0 : index
    %c0_84 = arith.constant 0 : index
    %114 = vector.load %arg3[%c20, %c0_83, %c0_84] : memref<25x16x300xf32, #tpu.memory_space<vmem>>, vector<1x16x300xf32>
    %115 = vector.shape_cast %114 : vector<1x16x300xf32> to vector<16x300xf32>
    %cst_85 = arith.constant dense<0.000000e+00> : vector<8x300xf32>
    %116 = tpu.matmul %113, %115, %cst_85 {dimension_numbers = #tpu.dot_dimension_numbers<[1], [0], [0], [1], [0, 0, 1, 1], [], []>} : vector<8x16xf32>, vector<16x300xf32>, vector<8x300xf32> -> vector<8x300xf32>
    %117 = vector.extract_strided_slice %32 {offsets = [168, 0], sizes = [8, 16], strides = [1, 1]} : vector<200x16xf32> to vector<8x16xf32>
    %c21 = arith.constant 21 : index
    %c0_86 = arith.constant 0 : index
    %c0_87 = arith.constant 0 : index
    %118 = vector.load %arg3[%c21, %c0_86, %c0_87] : memref<25x16x300xf32, #tpu.memory_space<vmem>>, vector<1x16x300xf32>
    %119 = vector.shape_cast %118 : vector<1x16x300xf32> to vector<16x300xf32>
    %cst_88 = arith.constant dense<0.000000e+00> : vector<8x300xf32>
    %120 = tpu.matmul %117, %119, %cst_88 {dimension_numbers = #tpu.dot_dimension_numbers<[1], [0], [0], [1], [0, 0, 1, 1], [], []>} : vector<8x16xf32>, vector<16x300xf32>, vector<8x300xf32> -> vector<8x300xf32>
    %121 = vector.extract_strided_slice %32 {offsets = [176, 0], sizes = [8, 16], strides = [1, 1]} : vector<200x16xf32> to vector<8x16xf32>
    %c22 = arith.constant 22 : index
    %c0_89 = arith.constant 0 : index
    %c0_90 = arith.constant 0 : index
    %122 = vector.load %arg3[%c22, %c0_89, %c0_90] : memref<25x16x300xf32, #tpu.memory_space<vmem>>, vector<1x16x300xf32>
    %123 = vector.shape_cast %122 : vector<1x16x300xf32> to vector<16x300xf32>
    %cst_91 = arith.constant dense<0.000000e+00> : vector<8x300xf32>
    %124 = tpu.matmul %121, %123, %cst_91 {dimension_numbers = #tpu.dot_dimension_numbers<[1], [0], [0], [1], [0, 0, 1, 1], [], []>} : vector<8x16xf32>, vector<16x300xf32>, vector<8x300xf32> -> vector<8x300xf32>
    %125 = vector.extract_strided_slice %32 {offsets = [184, 0], sizes = [8, 16], strides = [1, 1]} : vector<200x16xf32> to vector<8x16xf32>
    %c23 = arith.constant 23 : index
    %c0_92 = arith.constant 0 : index
    %c0_93 = arith.constant 0 : index
    %126 = vector.load %arg3[%c23, %c0_92, %c0_93] : memref<25x16x300xf32, #tpu.memory_space<vmem>>, vector<1x16x300xf32>
    %127 = vector.shape_cast %126 : vector<1x16x300xf32> to vector<16x300xf32>
    %cst_94 = arith.constant dense<0.000000e+00> : vector<8x300xf32>
    %128 = tpu.matmul %125, %127, %cst_94 {dimension_numbers = #tpu.dot_dimension_numbers<[1], [0], [0], [1], [0, 0, 1, 1], [], []>} : vector<8x16xf32>, vector<16x300xf32>, vector<8x300xf32> -> vector<8x300xf32>
    %129 = vector.extract_strided_slice %32 {offsets = [192, 0], sizes = [8, 16], strides = [1, 1]} : vector<200x16xf32> to vector<8x16xf32>
    %c24 = arith.constant 24 : index
    %c0_95 = arith.constant 0 : index
    %c0_96 = arith.constant 0 : index
    %130 = vector.load %arg3[%c24, %c0_95, %c0_96] : memref<25x16x300xf32, #tpu.memory_space<vmem>>, vector<1x16x300xf32>
    %131 = vector.shape_cast %130 : vector<1x16x300xf32> to vector<16x300xf32>
    %cst_97 = arith.constant dense<0.000000e+00> : vector<8x300xf32>
    %132 = tpu.matmul %129, %131, %cst_97 {dimension_numbers = #tpu.dot_dimension_numbers<[1], [0], [0], [1], [0, 0, 1, 1], [], []>} : vector<8x16xf32>, vector<16x300xf32>, vector<8x300xf32> -> vector<8x300xf32>
    %133 = arith.addf %36, %40 : vector<8x300xf32>
    %134 = arith.addf %44, %48 : vector<8x300xf32>
    %135 = arith.addf %52, %56 : vector<8x300xf32>
    %136 = arith.addf %60, %64 : vector<8x300xf32>
    %137 = arith.addf %68, %72 : vector<8x300xf32>
    %138 = arith.addf %76, %80 : vector<8x300xf32>
    %139 = arith.addf %84, %88 : vector<8x300xf32>
    %140 = arith.addf %92, %96 : vector<8x300xf32>
    %141 = arith.addf %100, %104 : vector<8x300xf32>
    %142 = arith.addf %108, %112 : vector<8x300xf32>
    %143 = arith.addf %116, %120 : vector<8x300xf32>
    %144 = arith.addf %124, %128 : vector<8x300xf32>
    %145 = arith.addf %133, %134 : vector<8x300xf32>
    %146 = arith.addf %135, %136 : vector<8x300xf32>
    %147 = arith.addf %137, %138 : vector<8x300xf32>
    %148 = arith.addf %139, %140 : vector<8x300xf32>
    %149 = arith.addf %141, %142 : vector<8x300xf32>
    %150 = arith.addf %143, %144 : vector<8x300xf32>
    %151 = arith.addf %145, %146 : vector<8x300xf32>
    %152 = arith.addf %147, %148 : vector<8x300xf32>
    %153 = arith.addf %149, %150 : vector<8x300xf32>
    %154 = arith.addf %151, %152 : vector<8x300xf32>
    %155 = arith.addf %153, %132 : vector<8x300xf32>
    %156 = arith.addf %154, %155 : vector<8x300xf32>
    %c0_98 = arith.constant 0 : index
    %c0_99 = arith.constant 0 : index
    %157 = vector.load %arg4[%c0_98, %c0_99] : memref<1x300xf32, #tpu.memory_space<vmem>>, vector<1x300xf32>
    %158 = vector.broadcast %157 : vector<1x300xf32> to vector<8x300xf32>
    %159 = arith.addf %156, %158 : vector<8x300xf32>
    %cst_100 = arith.constant 0.000000e+00 : f32
    %160 = vector.broadcast %cst_100 : f32 to vector<8x300xf32>
    %161 = arith.maximumf %159, %160 : vector<8x300xf32>
    %c0_101 = arith.constant 0 : index
    %c0_102 = arith.constant 0 : index
    %162 = vector.load %arg5[%c0_101, %c0_102] : memref<300x84xf32, #tpu.memory_space<vmem>>, vector<300x84xf32>
    %cst_103 = arith.constant dense<0.000000e+00> : vector<8x84xf32>
    %163 = tpu.matmul %161, %162, %cst_103 {dimension_numbers = #tpu.dot_dimension_numbers<[1], [0], [0], [1], [0, 0, 1, 1], [], []>} : vector<8x300xf32>, vector<300x84xf32>, vector<8x84xf32> -> vector<8x84xf32>
    %c0_104 = arith.constant 0 : index
    %c0_105 = arith.constant 0 : index
    %164 = vector.load %arg6[%c0_104, %c0_105] : memref<1x84xf32, #tpu.memory_space<vmem>>, vector<1x84xf32>
    %165 = vector.broadcast %164 : vector<1x84xf32> to vector<8x84xf32>
    %166 = arith.addf %163, %165 : vector<8x84xf32>
    %cst_106 = arith.constant 0.000000e+00 : f32
    %167 = vector.broadcast %cst_106 : f32 to vector<8x84xf32>
    %168 = arith.maximumf %166, %167 : vector<8x84xf32>
    %c0_107 = arith.constant 0 : index
    %c0_108 = arith.constant 0 : index
    %169 = vector.load %arg7[%c0_107, %c0_108] : memref<84x2xf32, #tpu.memory_space<vmem>>, vector<84x2xf32>
    %cst_109 = arith.constant dense<0.000000e+00> : vector<8x2xf32>
    %170 = tpu.matmul %168, %169, %cst_109 {dimension_numbers = #tpu.dot_dimension_numbers<[1], [0], [0], [1], [0, 0, 1, 1], [], []>} : vector<8x84xf32>, vector<84x2xf32>, vector<8x2xf32> -> vector<8x2xf32>
    %c0_110 = arith.constant 0 : index
    %c0_111 = arith.constant 0 : index
    %171 = vector.load %arg8[%c0_110, %c0_111] : memref<1x2xf32, #tpu.memory_space<vmem>>, vector<1x2xf32>
    %172 = vector.broadcast %171 : vector<1x2xf32> to vector<8x2xf32>
    %173 = arith.addf %170, %172 : vector<8x2xf32>
    %cst_112 = arith.constant dense<0xFF800000> : vector<8xf32>
    %174 = vector.multi_reduction <maximumf>, %173, %cst_112 [1] : vector<8x2xf32> to vector<8xf32>
    %175 = vector.shape_cast %174 : vector<8xf32> to vector<8x1xf32>
    %176 = vector.broadcast %175 : vector<8x1xf32> to vector<8x2xf32>
    %177 = arith.subf %173, %176 : vector<8x2xf32>
    %178 = math.exp %177 : vector<8x2xf32>
    %cst_113 = arith.constant dense<0.000000e+00> : vector<8xf32>
    %179 = vector.multi_reduction <add>, %178, %cst_113 [1] : vector<8x2xf32> to vector<8xf32>
    %180 = vector.shape_cast %179 : vector<8xf32> to vector<8x1xf32>
    %181 = tpu.reciprocal %180 : vector<8x1xf32> -> vector<8x1xf32>
    %182 = vector.broadcast %181 : vector<8x1xf32> to vector<8x2xf32>
    %183 = arith.mulf %178, %182 : vector<8x2xf32>
    %c0_114 = arith.constant 0 : index
    %c0_115 = arith.constant 0 : index
    %184 = vector.load %arg9[%c0_114, %c0_115] : memref<8x2xf32, #tpu.memory_space<vmem>>, vector<8x2xf32>
    tpu.vector_store %arg9[%c0_114, %c0_115], %183 {strides = array<i32>} : memref<8x2xf32, #tpu.memory_space<vmem>>, vector<8x2xf32>,
    return
  }
}

</mosaic_0001>

<bundles_post_ra>
// kernel: cnn_forward.2
= control target key start
LH: loop header
LB: loop body
LE: loop exit
PB: predicated region body
PF: predicated region fallthrough
CT: control target
= control target key end

     0   :  { %vm65_vm0 = vcmask 1042432   ;;  %v989_v3 = vmov 0.0   ;;  %vm61_vm1 = vcmask 613376   ;;  %vm836_vm2 = vcmask 62464   ;;  %s1551_s0 = inlined_call_operand.vmem [shape: f32[4,75,392], index: 0, kind: input, shape index: {}]   ;;  %s1552_s1 = inlined_call_operand.vmem [shape: f32[6,75], index: 1, kind: input, shape index: {}]   ;;  %s1553_s2 = inlined_call_operand.vmem [shape: f32[6,1], index: 2, kind: input, shape index: {}]   ;;  %s1554_s3 = inlined_call_operand.vmem [shape: f32[6,392], index: 3, kind: output, shape index: {}]  }
   0x1   :  { %v53_v0 = vld [vmem:[%s1551_s0 + $0x128] sm:$0x7]  ;;  %v55_v1 = vld [vmem:[%s1551_s0 + $0x138] sm:$0x7]  ;;  %v52_v2 = vld [vmem:[%s1551_s0 + $0x120] sm:$0x7]  ;;  %142 = vmatprep.mubr.f32.mxu0 %v989_v3  ;;  %213 = vmatprep.mubr.f32.mxu1 %v989_v3 }
   0x2   :  { %842 = vmatprep.subr.msk.mxu0 %vm65_vm0, %v53_v0  ;;  %845 = vmatprep.subr.msk.mxu1 %vm65_vm0, %v55_v1  ;;  %v54_v4 = vld [vmem:[%s1551_s0 + $0x130] sm:$0x7]  ;;  %v49_v5 = vld [vmem:[%s1551_s0 + $0x108] sm:$0xff]  ;;  %v51_v6 = vld [vmem:[%s1551_s0 + $0x118] sm:$0xff] }
   0x3   :  { %843 = vmatpush1.msk.msra.mxu0 %vm65_vm0, %v52_v2  ;;  %846 = vmatpush1.msk.msra.mxu1 %vm65_vm0, %v54_v4  ;;  %v48_v7 = vld [vmem:[%s1551_s0 + $0x100] sm:$0xff]  ;;  %v50_v8 = vld [vmem:[%s1551_s0 + $0x110] sm:$0xff]  ;;  %v45_v9 = vld [vmem:[%s1551_s0 + $0xe8] sm:$0xff] }
   0x4   :  { %92 = vmatprep.subr.mxu0 %v49_v5  ;;  %163 = vmatprep.subr.mxu1 %v51_v6  ;;  %v47_v10 = vld [vmem:[%s1551_s0 + $0xf8] sm:$0xff]  ;;  %v44_v11 = vld [vmem:[%s1551_s0 + $0xe0] sm:$0xff]  ;;  %v46_v12 = vld [vmem:[%s1551_s0 + $0xf0] sm:$0xff] }
   0x5   :  { %93 = vmatpush1.msra.mxu0 %v48_v7  ;;  %164 = vmatpush1.msra.mxu1 %v50_v8  ;;  %v41_v13 = vld [vmem:[%s1551_s0 + $0xc8] sm:$0xff]  ;;  %v43_v14 = vld [vmem:[%s1551_s0 + $0xd8] sm:$0xff]  ;;  %v40_v15 = vld [vmem:[%s1551_s0 + $0xc0] sm:$0xff] }
   0x6   :  { %94 = vmatprep.subr.mxu0 %v45_v9  ;;  %165 = vmatprep.subr.mxu1 %v47_v10  ;;  %v42_v16 = vld [vmem:[%s1551_s0 + $0xd0] sm:$0xff]  ;;  %v37_v17 = vld [vmem:[%s1551_s0 + $0xa8] sm:$0xff]  ;;  %v39_v18 = vld [vmem:[%s1551_s0 + $0xb8] sm:$0xff] }
   0x7   :  { %95 = vmatpush1.msra.mxu0 %v44_v11  ;;  %166 = vmatpush1.msra.mxu1 %v46_v12  ;;  %v36_v19 = vld [vmem:[%s1551_s0 + $0xa0] sm:$0xff]  ;;  %v38_v20 = vld [vmem:[%s1551_s0 + $0xb0] sm:$0xff]  ;;  %v33_v21 = vld [vmem:[%s1551_s0 + $0x88] sm:$0xff] }
   0x8   :  { %96 = vmatprep.subr.mxu0 %v41_v13  ;;  %167 = vmatprep.subr.mxu1 %v43_v14  ;;  %v35_v22 = vld [vmem:[%s1551_s0 + $0x98] sm:$0xff]  ;;  %v32_v23 = vld [vmem:[%s1551_s0 + $0x80] sm:$0xff]  ;;  %v34_v24 = vld [vmem:[%s1551_s0 + $0x90] sm:$0xff] }
   0x9   :  { %97 = vmatpush1.msra.mxu0 %v40_v15  ;;  %168 = vmatpush1.msra.mxu1 %v42_v16  ;;  %v29_v25 = vld [vmem:[%s1551_s0 + $0x68] sm:$0xff]  ;;  %v31_v26 = vld [vmem:[%s1551_s0 + $0x78] sm:$0xff]  ;;  %v28_v27 = vld [vmem:[%s1551_s0 + $0x60] sm:$0xff] }
   0xa   :  { %98 = vmatprep.subr.mxu0 %v37_v17  ;;  %169 = vmatprep.subr.mxu1 %v39_v18  ;;  %v30_v28 = vld [vmem:[%s1551_s0 + $0x70] sm:$0xff]  ;;  %v25_v29 = vld [vmem:[%s1551_s0 + $0x48] sm:$0xff]  ;;  %v27_v30 = vld [vmem:[%s1551_s0 + $0x58] sm:$0xff] }
   0xb   :  { %99 = vmatpush1.msra.mxu0 %v36_v19  ;;  %170 = vmatpush1.msra.mxu1 %v38_v20  ;;  %v24_v31 = vld [vmem:[%s1551_s0 + $0x40] sm:$0xff]  ;;  %v26_v32 = vld [vmem:[%s1551_s0 + $0x50] sm:$0xff]  ;;  %v21_v33 = vld [vmem:[%s1551_s0 + $0x28] sm:$0xff] }
   0xc   :  { %100 = vmatprep.subr.mxu0 %v33_v21  ;;  %171 = vmatprep.subr.mxu1 %v35_v22  ;;  %v23_v34 = vld [vmem:[%s1551_s0 + $0x38] sm:$0xff]  ;;  %v20_v35 = vld [vmem:[%s1551_s0 + $0x20] sm:$0xff]  ;;  %v22_v36 = vld [vmem:[%s1551_s0 + $0x30] sm:$0xff] }
   0xd   :  { %101 = vmatpush1.msra.mxu0 %v32_v23  ;;  %172 = vmatpush1.msra.mxu1 %v34_v24  ;;  %v17_v37 = vld [vmem:[%s1551_s0 + $0x8] sm:$0xff]  ;;  %v19_v38 = vld [vmem:[%s1551_s0 + $0x18] sm:$0xff]  ;;  %v16_v39 = vld [vmem:[%s1551_s0] sm:$0xff] }
   0xe   :  { %102 = vmatprep.subr.mxu0 %v29_v25  ;;  %173 = vmatprep.subr.mxu1 %v31_v26  ;;  %v18_v40 = vld [vmem:[%s1551_s0 + $0x10] sm:$0xff]  ;;  %v1140_v41 = vld [vmem:[%s1552_s1] sm:$0x3f]  ;;  %v885_v42 = vld [vmem:[%s1551_s0 + $0x268] sm:$0x7] }
   0xf   :  { %103 = vmatpush1.msra.mxu0 %v28_v27  ;;  %174 = vmatpush1.msra.mxu1 %v30_v28  ;;  %v887_v43 = vld [vmem:[%s1551_s0 + $0x278] sm:$0x7]  ;;  %v884_v44 = vld [vmem:[%s1551_s0 + $0x260] sm:$0x7]  ;;  %v886_v45 = vld [vmem:[%s1551_s0 + $0x270] sm:$0x7] }
  0x10   :  { %104 = vmatprep.subr.mxu0 %v25_v29  ;;  %175 = vmatprep.subr.mxu1 %v27_v30  ;;  %v881_v46 = vld [vmem:[%s1551_s0 + $0x248] sm:$0xff]  ;;  %v883_v47 = vld [vmem:[%s1551_s0 + $0x258] sm:$0xff]  ;;  %v880_v48 = vld [vmem:[%s1551_s0 + $0x240] sm:$0xff] }
  0x11   :  { %105 = vmatpush1.msra.mxu0 %v24_v31  ;;  %176 = vmatpush1.msra.mxu1 %v26_v32  ;;  %v882_v49 = vld [vmem:[%s1551_s0 + $0x250] sm:$0xff]  ;;  %v877_v50 = vld [vmem:[%s1551_s0 + $0x228] sm:$0xff]  ;;  %v879_v51 = vld [vmem:[%s1551_s0 + $0x238] sm:$0xff] }
  0x12   :  { %106 = vmatprep.subr.mxu0 %v21_v33  ;;  %177 = vmatprep.subr.mxu1 %v23_v34  ;;  %v876_v52 = vld [vmem:[%s1551_s0 + $0x220] sm:$0xff]  ;;  %v878_v53 = vld [vmem:[%s1551_s0 + $0x230] sm:$0xff]  ;;  %v873_v54 = vld [vmem:[%s1551_s0 + $0x208] sm:$0xff] }
  0x13   :  { %107 = vmatpush1.msra.mxu0 %v20_v35  ;;  %178 = vmatpush1.msra.mxu1 %v22_v36  ;;  %v875_v55 = vld [vmem:[%s1551_s0 + $0x218] sm:$0xff]  ;;  %v872_v56 = vld [vmem:[%s1551_s0 + $0x200] sm:$0xff]  ;;  %v874_v57 = vld [vmem:[%s1551_s0 + $0x210] sm:$0xff] }
  0x14   :  { %108 = vmatprep.subr.mxu0 %v17_v37  ;;  %179 = vmatprep.subr.mxu1 %v19_v38  ;;  %v869_v58 = vld [vmem:[%s1551_s0 + $0x1e8] sm:$0xff]  ;;  %v871_v59 = vld [vmem:[%s1551_s0 + $0x1f8] sm:$0xff]  ;;  %v868_v60 = vld [vmem:[%s1551_s0 + $0x1e0] sm:$0xff] }
  0x15   :  { %109 = vmatpush1.msra.mxu0 %v16_v39  ;;  %180 = vmatpush1.msra.mxu1 %v18_v40  ;;  %v870_v61 = vld [vmem:[%s1551_s0 + $0x1f0] sm:$0xff]  ;;  %v865_v62 = vld [vmem:[%s1551_s0 + $0x1c8] sm:$0xff]  ;;  %v867_v63 = vld [vmem:[%s1551_s0 + $0x1d8] sm:$0xff] }
  0x16   :  { %844 = vmatmul.mubr.msk.f32.vlgmr.msra.gmra.mxu0 %vm61_vm1, %v1140_v41  ;;  %847 = vmatmul.mubr.msk.f32.vlgmr.msra.gmra.mxu1 %vm61_vm1, %v1140_v41  ;;  %v864_v0 = vld [vmem:[%s1551_s0 + $0x1c0] sm:$0xff]  ;;  %v866_v1 = vld [vmem:[%s1551_s0 + $0x1d0] sm:$0xff]  ;;  %v861_v2 = vld [vmem:[%s1551_s0 + $0x1a8] sm:$0xff] }
  0x17   :  { %888 = vmatprep.subr.msk.mxu0 %vm65_vm0, %v885_v42  ;;  %891 = vmatprep.subr.msk.mxu1 %vm65_vm0, %v887_v43  ;;  %v863_v4 = vld [vmem:[%s1551_s0 + $0x1b8] sm:$0xff]  ;;  %v860_v5 = vld [vmem:[%s1551_s0 + $0x1a0] sm:$0xff]  ;;  %v862_v6 = vld [vmem:[%s1551_s0 + $0x1b0] sm:$0xff] }
  0x18   :  { %889 = vmatpush1.msk.msra.mxu0 %vm65_vm0, %v884_v44  ;;  %892 = vmatpush1.msk.msra.mxu1 %vm65_vm0, %v886_v45  ;;  %v857_v7 = vld [vmem:[%s1551_s0 + $0x188] sm:$0xff]  ;;  %v859_v8 = vld [vmem:[%s1551_s0 + $0x198] sm:$0xff]  ;;  %v856_v9 = vld [vmem:[%s1551_s0 + $0x180] sm:$0xff] }
  0x19   :  { %291 = vmatprep.subr.mxu0 %v881_v46  ;;  %362 = vmatprep.subr.mxu1 %v883_v47  ;;  %v858_v10 = vld [vmem:[%s1551_s0 + $0x190] sm:$0xff]  ;;  %v853_v11 = vld [vmem:[%s1551_s0 + $0x168] sm:$0xff]  ;;  %v855_v12 = vld [vmem:[%s1551_s0 + $0x178] sm:$0xff] }
  0x1a   :  { %292 = vmatpush1.msra.mxu0 %v880_v48  ;;  %363 = vmatpush1.msra.mxu1 %v882_v49  ;;  %v852_v13 = vld [vmem:[%s1551_s0 + $0x160] sm:$0xff]  ;;  %v854_v14 = vld [vmem:[%s1551_s0 + $0x170] sm:$0xff]  ;;  %v849_v15 = vld [vmem:[%s1551_s0 + $0x148] sm:$0xff] }
  0x1b   :  { %293 = vmatprep.subr.mxu0 %v877_v50  ;;  %364 = vmatprep.subr.mxu1 %v879_v51  ;;  %v851_v16 = vld [vmem:[%s1551_s0 + $0x158] sm:$0xff]  ;;  %v848_v17 = vld [vmem:[%s1551_s0 + $0x140] sm:$0xff]  ;;  %v850_v18 = vld [vmem:[%s1551_s0 + $0x150] sm:$0xff] }
  0x1c   :  { %294 = vmatpush1.msra.mxu0 %v876_v52  ;;  %365 = vmatpush1.msra.mxu1 %v878_v53  ;;  %v931_v19 = vld [vmem:[%s1551_s0 + $0x3a8] sm:$0x7]  ;;  %v933_v20 = vld [vmem:[%s1551_s0 + $0x3b8] sm:$0x7]  ;;  %v930_v21 = vld [vmem:[%s1551_s0 + $0x3a0] sm:$0x7] }
  0x1d   :  { %295 = vmatprep.subr.mxu0 %v873_v54  ;;  %366 = vmatprep.subr.mxu1 %v875_v55  ;;  %v932_v22 = vld [vmem:[%s1551_s0 + $0x3b0] sm:$0x7]  ;;  %v927_v23 = vld [vmem:[%s1551_s0 + $0x388] sm:$0xff]  ;;  %v929_v24 = vld [vmem:[%s1551_s0 + $0x398] sm:$0xff] }
  0x1e   :  { %296 = vmatpush1.msra.mxu0 %v872_v56  ;;  %367 = vmatpush1.msra.mxu1 %v874_v57  ;;  %v926_v25 = vld [vmem:[%s1551_s0 + $0x380] sm:$0xff]  ;;  %v928_v26 = vld [vmem:[%s1551_s0 + $0x390] sm:$0xff]  ;;  %v923_v27 = vld [vmem:[%s1551_s0 + $0x368] sm:$0xff] }
  0x1f   :  { %297 = vmatprep.subr.mxu0 %v869_v58  ;;  %368 = vmatprep.subr.mxu1 %v871_v59  ;;  %v925_v28 = vld [vmem:[%s1551_s0 + $0x378] sm:$0xff]  ;;  %v922_v29 = vld [vmem:[%s1551_s0 + $0x360] sm:$0xff]  ;;  %v924_v30 = vld [vmem:[%s1551_s0 + $0x370] sm:$0xff] }
  0x20   :  { %298 = vmatpush1.msra.mxu0 %v868_v60  ;;  %369 = vmatpush1.msra.mxu1 %v870_v61  ;;  %v919_v31 = vld [vmem:[%s1551_s0 + $0x348] sm:$0xff]  ;;  %v921_v32 = vld [vmem:[%s1551_s0 + $0x358] sm:$0xff]  ;;  %v918_v33 = vld [vmem:[%s1551_s0 + $0x340] sm:$0xff] }
  0x21   :  { %299 = vmatprep.subr.mxu0 %v865_v62  ;;  %370 = vmatprep.subr.mxu1 %v867_v63  ;;  %v920_v34 = vld [vmem:[%s1551_s0 + $0x350] sm:$0xff]  ;;  %v915_v35 = vld [vmem:[%s1551_s0 + $0x328] sm:$0xff]  ;;  %v917_v36 = vld [vmem:[%s1551_s0 + $0x338] sm:$0xff] }
  0x22   :  { %300 = vmatpush1.msra.mxu0 %v864_v0  ;;  %371 = vmatpush1.msra.mxu1 %v866_v1  ;;  %v914_v37 = vld [vmem:[%s1551_s0 + $0x320] sm:$0xff]  ;;  %v916_v38 = vld [vmem:[%s1551_s0 + $0x330] sm:$0xff]  ;;  %v911_v39 = vld [vmem:[%s1551_s0 + $0x308] sm:$0xff] }
  0x23   :  { %301 = vmatprep.subr.mxu0 %v861_v2  ;;  %372 = vmatprep.subr.mxu1 %v863_v4  ;;  %v913_v40 = vld [vmem:[%s1551_s0 + $0x318] sm:$0xff]  ;;  %v910_v42 = vld [vmem:[%s1551_s0 + $0x300] sm:$0xff]  ;;  %v912_v43 = vld [vmem:[%s1551_s0 + $0x310] sm:$0xff] }
  0x24   :  { %302 = vmatpush1.msra.mxu0 %v860_v5  ;;  %373 = vmatpush1.msra.mxu1 %v862_v6  ;;  %v907_v44 = vld [vmem:[%s1551_s0 + $0x2e8] sm:$0xff]  ;;  %v909_v45 = vld [vmem:[%s1551_s0 + $0x2f8] sm:$0xff]  ;;  %v906_v46 = vld [vmem:[%s1551_s0 + $0x2e0] sm:$0xff] }
  0x25   :  { %303 = vmatprep.subr.mxu0 %v857_v7  ;;  %374 = vmatprep.subr.mxu1 %v859_v8  ;;  %v908_v47 = vld [vmem:[%s1551_s0 + $0x2f0] sm:$0xff]  ;;  %v903_v48 = vld [vmem:[%s1551_s0 + $0x2c8] sm:$0xff]  ;;  %v905_v49 = vld [vmem:[%s1551_s0 + $0x2d8] sm:$0xff] }
  0x26   :  { %304 = vmatpush1.msra.mxu0 %v856_v9  ;;  %375 = vmatpush1.msra.mxu1 %v858_v10  ;;  %v902_v50 = vld [vmem:[%s1551_s0 + $0x2c0] sm:$0xff]  ;;  %v904_v51 = vld [vmem:[%s1551_s0 + $0x2d0] sm:$0xff]  ;;  %v899_v52 = vld [vmem:[%s1551_s0 + $0x2a8] sm:$0xff] }
  0x27   :  { %305 = vmatprep.subr.mxu0 %v853_v11  ;;  %376 = vmatprep.subr.mxu1 %v855_v12  ;;  %v901_v53 = vld [vmem:[%s1551_s0 + $0x2b8] sm:$0xff]  ;;  %v898_v54 = vld [vmem:[%s1551_s0 + $0x2a0] sm:$0xff]  ;;  %v900_v55 = vld [vmem:[%s1551_s0 + $0x2b0] sm:$0xff] }
  0x28   :  { %306 = vmatpush1.msra.mxu0 %v852_v13  ;;  %377 = vmatpush1.msra.mxu1 %v854_v14  ;;  %v895_v56 = vld [vmem:[%s1551_s0 + $0x288] sm:$0xff]  ;;  %v897_v57 = vld [vmem:[%s1551_s0 + $0x298] sm:$0xff]  ;;  %v894_v58 = vld [vmem:[%s1551_s0 + $0x280] sm:$0xff] }
  0x29   :  { %307 = vmatprep.subr.mxu0 %v849_v15  ;;  %378 = vmatprep.subr.mxu1 %v851_v16  ;;  %v896_v59 = vld [vmem:[%s1551_s0 + $0x290] sm:$0xff]  ;;  %v977_v60 = vld [vmem:[%s1551_s0 + $0x4e8] sm:$0x7]  ;;  %v979_v61 = vld [vmem:[%s1551_s0 + $0x4f8] sm:$0x7] }
  0x2a   :  { %308 = vmatpush1.msra.mxu0 %v848_v17  ;;  %341 = vmatprep.mubr.f32.mxu0 %v989_v3  ;;  %v976_v62 = vld [vmem:[%s1551_s0 + $0x4e0] sm:$0x7]  ;;  %v978_v63 = vld [vmem:[%s1551_s0 + $0x4f0] sm:$0x7]  ;;  %v973_v0 = vld [vmem:[%s1551_s0 + $0x4c8] sm:$0xff] }
  0x2b   :  { %379 = vmatpush1.msra.mxu1 %v850_v18  ;;  %412 = vmatprep.mubr.f32.mxu1 %v989_v3  ;;  %v975_v1 = vld [vmem:[%s1551_s0 + $0x4d8] sm:$0xff]  ;;  %v972_v2 = vld [vmem:[%s1551_s0 + $0x4c0] sm:$0xff]  ;;  %v974_v4 = vld [vmem:[%s1551_s0 + $0x4d0] sm:$0xff] }
  0x2c   :  { %890 = vmatmul.mubr.msk.f32.vlgmr.msra.gmra.mxu0 %vm61_vm1, %v1140_v41  ;;  %893 = vmatmul.mubr.msk.f32.vlgmr.msra.gmra.mxu1 %vm61_vm1, %v1140_v41  ;;  %v969_v5 = vld [vmem:[%s1551_s0 + $0x4a8] sm:$0xff]  ;;  %v971_v6 = vld [vmem:[%s1551_s0 + $0x4b8] sm:$0xff]  ;;  %v968_v7 = vld [vmem:[%s1551_s0 + $0x4a0] sm:$0xff] }
  0x2d   :  { %934 = vmatprep.subr.msk.mxu0 %vm65_vm0, %v931_v19  ;;  %937 = vmatprep.subr.msk.mxu1 %vm65_vm0, %v933_v20  ;;  %v970_v8 = vld [vmem:[%s1551_s0 + $0x4b0] sm:$0xff]  ;;  %v965_v9 = vld [vmem:[%s1551_s0 + $0x488] sm:$0xff]  ;;  %v967_v10 = vld [vmem:[%s1551_s0 + $0x498] sm:$0xff] }
  0x2e   :  { %935 = vmatpush1.msk.msra.mxu0 %vm65_vm0, %v930_v21  ;;  %938 = vmatpush1.msk.msra.mxu1 %vm65_vm0, %v932_v22  ;;  %v964_v11 = vld [vmem:[%s1551_s0 + $0x480] sm:$0xff]  ;;  %v966_v12 = vld [vmem:[%s1551_s0 + $0x490] sm:$0xff]  ;;  %v961_v13 = vld [vmem:[%s1551_s0 + $0x468] sm:$0xff] }
  0x2f   :  { %494 = vmatprep.subr.mxu0 %v927_v23  ;;  %565 = vmatprep.subr.mxu1 %v929_v24  ;;  %v963_v14 = vld [vmem:[%s1551_s0 + $0x478] sm:$0xff]  ;;  %v960_v15 = vld [vmem:[%s1551_s0 + $0x460] sm:$0xff]  ;;  %v962_v16 = vld [vmem:[%s1551_s0 + $0x470] sm:$0xff] }
  0x30   :  { %495 = vmatpush1.msra.mxu0 %v926_v25  ;;  %566 = vmatpush1.msra.mxu1 %v928_v26  ;;  %v957_v17 = vld [vmem:[%s1551_s0 + $0x448] sm:$0xff]  ;;  %v959_v18 = vld [vmem:[%s1551_s0 + $0x458] sm:$0xff]  ;;  %v956_v19 = vld [vmem:[%s1551_s0 + $0x440] sm:$0xff] }
  0x31   :  { %496 = vmatprep.subr.mxu0 %v923_v27  ;;  %567 = vmatprep.subr.mxu1 %v925_v28  ;;  %v958_v20 = vld [vmem:[%s1551_s0 + $0x450] sm:$0xff]  ;;  %v953_v21 = vld [vmem:[%s1551_s0 + $0x428] sm:$0xff]  ;;  %v955_v22 = vld [vmem:[%s1551_s0 + $0x438] sm:$0xff] }
  0x32   :  { %497 = vmatpush1.msra.mxu0 %v922_v29  ;;  %568 = vmatpush1.msra.mxu1 %v924_v30  ;;  %v952_v23 = vld [vmem:[%s1551_s0 + $0x420] sm:$0xff]  ;;  %v954_v24 = vld [vmem:[%s1551_s0 + $0x430] sm:$0xff]  ;;  %v949_v25 = vld [vmem:[%s1551_s0 + $0x408] sm:$0xff] }
  0x33   :  { %498 = vmatprep.subr.mxu0 %v919_v31  ;;  %569 = vmatprep.subr.mxu1 %v921_v32  ;;  %v951_v26 = vld [vmem:[%s1551_s0 + $0x418] sm:$0xff]  ;;  %v948_v27 = vld [vmem:[%s1551_s0 + $0x400] sm:$0xff]  ;;  %v950_v28 = vld [vmem:[%s1551_s0 + $0x410] sm:$0xff] }
  0x34   :  { %499 = vmatpush1.msra.mxu0 %v918_v33  ;;  %570 = vmatpush1.msra.mxu1 %v920_v34  ;;  %v945_v29 = vld [vmem:[%s1551_s0 + $0x3e8] sm:$0xff]  ;;  %v947_v30 = vld [vmem:[%s1551_s0 + $0x3f8] sm:$0xff]  ;;  %v944_v31 = vld [vmem:[%s1551_s0 + $0x3e0] sm:$0xff] }
  0x35   :  { %500 = vmatprep.subr.mxu0 %v915_v35  ;;  %571 = vmatprep.subr.mxu1 %v917_v36  ;;  %v946_v32 = vld [vmem:[%s1551_s0 + $0x3f0] sm:$0xff]  ;;  %v941_v33 = vld [vmem:[%s1551_s0 + $0x3c8] sm:$0xff]  ;;  %v943_v34 = vld [vmem:[%s1551_s0 + $0x3d8] sm:$0xff] }
  0x36   :  { %501 = vmatpush1.msra.mxu0 %v914_v37  ;;  %572 = vmatpush1.msra.mxu1 %v916_v38  ;;  %v940_v35 = vld [vmem:[%s1551_s0 + $0x3c0] sm:$0xff]  ;;  %v942_v36 = vld [vmem:[%s1551_s0 + $0x3d0] sm:$0xff]  ;;  %v990_v38 = vmov 0  }
  0x37   :  { %502 = vmatprep.subr.mxu0 %v911_v39  ;;  %573 = vmatprep.subr.mxu1 %v913_v40  ;;  %v15_v37 = vld [vmem:[%s1553_s2] sm:$0x3f] }
  0x38   :  { %503 = vmatpush1.msra.mxu0 %v910_v42  ;;  %574 = vmatpush1.msra.mxu1 %v912_v43 }
  0x39   :  { %504 = vmatprep.subr.mxu0 %v907_v44  ;;  %575 = vmatprep.subr.mxu1 %v909_v45 }
  0x3a   :  { %505 = vmatpush1.msra.mxu0 %v906_v46  ;;  %576 = vmatpush1.msra.mxu1 %v908_v47 }
  0x3b   :  { %506 = vmatprep.subr.mxu0 %v903_v48  ;;  %577 = vmatprep.subr.mxu1 %v905_v49 }
  0x3c   :  { %507 = vmatpush1.msra.mxu0 %v902_v50  ;;  %578 = vmatpush1.msra.mxu1 %v904_v51 }
  0x3d   :  { %508 = vmatprep.subr.mxu0 %v899_v52  ;;  %579 = vmatprep.subr.mxu1 %v901_v53 }
  0x3e   :  { %509 = vmatpush1.msra.mxu0 %v898_v54  ;;  %580 = vmatpush1.msra.mxu1 %v900_v55 }
  0x3f   :  { %510 = vmatprep.subr.mxu0 %v895_v56  ;;  %581 = vmatprep.subr.mxu1 %v897_v57 }
  0x40   :  { %511 = vmatpush1.msra.mxu0 %v894_v58  ;;  %544 = vmatprep.mubr.f32.mxu0 %v989_v3 }
  0x41   :  { %582 = vmatpush1.msra.mxu1 %v896_v59  ;;  %615 = vmatprep.mubr.f32.mxu1 %v989_v3 }
  0x42   :  { %936 = vmatmul.mubr.msk.f32.vlgmr.msra.gmra.mxu0 %vm61_vm1, %v1140_v41  ;;  %939 = vmatmul.mubr.msk.f32.vlgmr.msra.gmra.mxu1 %vm61_vm1, %v1140_v41 }
  0x43   :  { %980 = vmatprep.subr.msk.mxu0 %vm65_vm0, %v977_v60  ;;  %983 = vmatprep.subr.msk.mxu1 %vm65_vm0, %v979_v61 }
  0x44   :  { %981 = vmatpush1.msk.msra.mxu0 %vm65_vm0, %v976_v62  ;;  %984 = vmatpush1.msk.msra.mxu1 %vm65_vm0, %v978_v63 }
  0x45   :  { %693 = vmatprep.subr.mxu0 %v973_v0  ;;  %764 = vmatprep.subr.mxu1 %v975_v1 }
  0x46   :  { %694 = vmatpush1.msra.mxu0 %v972_v2  ;;  %765 = vmatpush1.msra.mxu1 %v974_v4 }
  0x47   :  { %695 = vmatprep.subr.mxu0 %v969_v5  ;;  %766 = vmatprep.subr.mxu1 %v971_v6 }
  0x48   :  { %696 = vmatpush1.msra.mxu0 %v968_v7  ;;  %767 = vmatpush1.msra.mxu1 %v970_v8 }
  0x49   :  { %697 = vmatprep.subr.mxu0 %v965_v9  ;;  %768 = vmatprep.subr.mxu1 %v967_v10 }
  0x4a   :  { %698 = vmatpush1.msra.mxu0 %v964_v11  ;;  %769 = vmatpush1.msra.mxu1 %v966_v12 }
  0x4b   :  { %699 = vmatprep.subr.mxu0 %v961_v13  ;;  %770 = vmatprep.subr.mxu1 %v963_v14 }
  0x4c   :  { %700 = vmatpush1.msra.mxu0 %v960_v15  ;;  %771 = vmatpush1.msra.mxu1 %v962_v16 }
  0x4d   :  { %701 = vmatprep.subr.mxu0 %v957_v17  ;;  %772 = vmatprep.subr.mxu1 %v959_v18 }
  0x4e   :  { %702 = vmatpush1.msra.mxu0 %v956_v19  ;;  %773 = vmatpush1.msra.mxu1 %v958_v20 }
  0x4f   :  { %703 = vmatprep.subr.mxu0 %v953_v21  ;;  %774 = vmatprep.subr.mxu1 %v955_v22 }
  0x50   :  { %704 = vmatpush1.msra.mxu0 %v952_v23  ;;  %775 = vmatpush1.msra.mxu1 %v954_v24 }
  0x51   :  { %705 = vmatprep.subr.mxu0 %v949_v25  ;;  %776 = vmatprep.subr.mxu1 %v951_v26 }
  0x52   :  { %706 = vmatpush1.msra.mxu0 %v948_v27  ;;  %777 = vmatpush1.msra.mxu1 %v950_v28 }
  0x53   :  { %707 = vmatprep.subr.mxu0 %v945_v29  ;;  %778 = vmatprep.subr.mxu1 %v947_v30 }
  0x54   :  { %708 = vmatpush1.msra.mxu0 %v944_v31  ;;  %779 = vmatpush1.msra.mxu1 %v946_v32 }
  0x55   :  { %709 = vmatprep.subr.mxu0 %v941_v33  ;;  %780 = vmatprep.subr.mxu1 %v943_v34 }
  0x56   :  { %710 = vmatpush1.msra.mxu0 %v940_v35  ;;  %743 = vmatprep.mubr.f32.mxu0 %v989_v3 }
  0x57   :  { %781 = vmatpush1.msra.mxu1 %v942_v36  ;;  %814 = vmatprep.mubr.f32.mxu1 %v989_v3 }
  0x58   :  { %982 = vmatmul.mubr.msk.f32.vlgmr.msra.gmra.mxu0 %vm61_vm1, %v1140_v41  ;;  %985 = vmatmul.mubr.msk.f32.vlgmr.msra.gmra.mxu1 %vm61_vm1, %v1140_v41 }
  0x59   :  { %988 = vset.pattern.permute.xlu0 %v990_v38 }
  0x5a   :  { %58 = vperm.xlu0 %988, %v15_v37  }
  0xd5   :  { %v59_v47 = vpop.permute.xlu0 %58 }
  0xd6   :  { %v144_v39 = vpop.f32.mrf.mxu0  ;;  %v215_v40 = vpop.f32.mrf.mxu1 }
  0xd7   :  { %v145_v50 = vadd.f32 %v144_v39, %v59_v47  ;;  %v216_v51 = vadd.f32 %v215_v40, %v59_v47 }
  0xd8   :  { %v146_v42 = vpop.f32.mrf.mxu0  ;;  %v217_v43 = vpop.f32.mrf.mxu1 }
  0xd9   :  { %v147_v54 = vadd.f32 %v146_v42, %v59_v47  ;;  %v218_v41 = vadd.f32 %v217_v43, %v59_v47  ;;  %v220_v61 = vmax.f32 %v145_v50, 0.0  ;;  %v222_v62 = vmax.f32 %v216_v51, 0.0 }
  0xdb   :  { %v221_v6 = vmax.f32 %v147_v54, 0.0  ;;  %v223_v7 = vmax.f32 %v218_v41, 0.0 }
  0xec   :  { %v343_v44 = vpop.f32.mrf.mxu0  ;;  %v414_v45 = vpop.f32.mrf.mxu1 }
  0xed   :  { %v344_v52 = vadd.f32 %v343_v44, %v59_v47  ;;  %v415_v53 = vadd.f32 %v414_v45, %v59_v47 }
  0xee   :  { %v345_v3 = vpop.f32.mrf.mxu0  ;;  %v416_v46 = vpop.f32.mrf.mxu1 }
  0xef   :  { %v346_v57 = vadd.f32 %v345_v3, %v59_v47  ;;  %v417_v58 = vadd.f32 %v416_v46, %v59_v47  ;;  %v419_v63 = vmax.f32 %v344_v52, 0.0  ;;  %v421_v0 = vmax.f32 %v415_v53, 0.0 }
  0xf1   :  { %v420_v10 = vmax.f32 %v346_v57, 0.0  ;;  %v422_v11 = vmax.f32 %v417_v58, 0.0  ;;  %v423_v20 = vmax.f32 %v220_v61, %v419_v63  ;;  %v425_v21 = vmax.f32 %v222_v62, %v421_v0 }
  0xf3   :  { %v424_v28 = vmax.f32 %v221_v6, %v420_v10  ;;  %v426_v29 = vmax.f32 %v223_v7, %v422_v11 }
 0x102   :  { %v546_v48 = vpop.f32.mrf.mxu0  ;;  %v617_v49 = vpop.f32.mrf.mxu1 }
 0x103   :  { %v547_v59 = vadd.f32 %v546_v48, %v59_v47  ;;  %v618_v60 = vadd.f32 %v617_v49, %v59_v47 }
 0x104   :  { %v548_v55 = vpop.f32.mrf.mxu0  ;;  %v619_v56 = vpop.f32.mrf.mxu1 }
 0x105   :  { %v549_v1 = vadd.f32 %v548_v55, %v59_v47  ;;  %v620_v2 = vadd.f32 %v619_v56, %v59_v47  ;;  %v622_v12 = vmax.f32 %v547_v59, 0.0  ;;  %v624_v13 = vmax.f32 %v618_v60, 0.0 }
 0x107   :  { %v623_v22 = vmax.f32 %v549_v1, 0.0  ;;  %v625_v23 = vmax.f32 %v620_v2, 0.0 }
 0x118   :  { %v745_v4 = vpop.f32.mrf.mxu0  ;;  %v816_v5 = vpop.f32.mrf.mxu1 }
 0x119   :  { %v746_v8 = vadd.f32 %v745_v4, %v59_v47  ;;  %v817_v9 = vadd.f32 %v816_v5, %v59_v47 }
 0x11a   :  { %v747_v14 = vpop.f32.mrf.mxu0  ;;  %v818_v15 = vpop.f32.mrf.mxu1 }
 0x11b   :  { %v821_v16 = vmax.f32 %v746_v8, 0.0  ;;  %v823_v17 = vmax.f32 %v817_v9, 0.0  ;;  %v748_v18 = vadd.f32 %v747_v14, %v59_v47  ;;  %v819_v19 = vadd.f32 %v818_v15, %v59_v47 }
 0x11d   :  { %v825_v24 = vmax.f32 %v622_v12, %v821_v16  ;;  %v827_v25 = vmax.f32 %v624_v13, %v823_v17  ;;  %v822_v26 = vmax.f32 %v748_v18, 0.0  ;;  %v824_v27 = vmax.f32 %v819_v19, 0.0 }
 0x11f   :  { %v829_v30 = vmax.f32 %v423_v20, %v825_v24  ;;  %v831_v31 = vmax.f32 %v425_v21, %v827_v25  ;;  %v826_v32 = vmax.f32 %v623_v22, %v822_v26  ;;  %v828_v33 = vmax.f32 %v625_v23, %v824_v27 }
 0x121   :  { %833 = vst [vmem:[%s1554_s3] sm:$0x3f] %v829_v30  ;;  %835 = vst [vmem:[%s1554_s3 + $0x10] sm:$0x3f] %v831_v31  ;;  %v830_v34 = vmax.f32 %v424_v28, %v826_v32  ;;  %v832_v35 = vmax.f32 %v426_v29, %v828_v33 }
 0x123   :  { %834 = vst [vmem:[%s1554_s3 + $0x8] sm:$0x3f] %v830_v34  ;;  %837 = vst.msk [vmem:[%s1554_s3 + $0x18] sm:$0x3f] %vm836_vm2, %v832_v35 }

// kernel: cnn_forward.3
= control target key start
LH: loop header
LB: loop body
LE: loop exit
PB: predicated region body
PF: predicated region fallthrough
CT: control target
= control target key end

     0   :  { %v8634_v0 = vmov 0.0   ;;  %vm184_vm0 = vcmask 1045504   ;;  %vm108_vm1 = vcmask 179200   ;;  %vm6448_vm2 = vmmov 0   ;;  %s8624_s1 = inlined_call_operand.vmem [shape: f32[150,16], index: 1, kind: input, shape index: {}]   ;;  %s8625_s0 = inlined_call_operand.vmem [shape: f32[4,200,150], index: 0, kind: input, shape index: {}]   ;;  %s8626_s3 = inlined_call_operand.vmem [shape: f32[25,16,300], index: 3, kind: input, shape index: {}]   ;;  %s8627_s2 = inlined_call_operand.vmem [shape: f32[1,16], index: 2, kind: input, shape index: {}]   ;;  %s8628_s5 = inlined_call_operand.vmem [shape: f32[300,84], index: 5, kind: input, shape index: {}]   ;;  %s8629_s4 = inlined_call_operand.vmem [shape: f32[1,300], index: 4, kind: input, shape index: {}]   ;;  %s8630_s7 = inlined_call_operand.vmem [shape: f32[84,2], index: 7, kind: input, shape index: {}]   ;;  %s8631_s6 = inlined_call_operand.vmem [shape: f32[1,84], index: 6, kind: input, shape index: {}]   ;;  %s8632_s8 = inlined_call_operand.vmem [shape: f32[1,2], index: 8, kind: input, shape index: {}]   ;;  %s8633_s9 = inlined_call_operand.vmem [shape: f32[8,2], index: 9, kind: output, shape index: {}]  }
   0x1   :  { %188 = vmatprep.subr.mxu0 %v8634_v0  ;;  %529 = vmatprep.subr.mxu1 %v8634_v0  ;;  %v6504_v1 = vld [vmem:[%s8624_s1 + $0x78] sm:$0xff]  ;;  %v6509_v2 = vld [vmem:[%s8624_s1 + $0x70] sm:$0xff]  ;;  %v6518_v3 = vld [vmem:[%s8624_s1 + $0x68] sm:$0xff]  ;;  %vm1514_vm3 = vcmask 130048   ;;  %vm5384_vm4 = vcmask 1043456   ;;  %vm5380_vm5 = vcmask 359424  }
   0x2   :  { %189 = vmatpush1.msra.mxu0 %v6504_v1  ;;  %530 = vmatpush1.msra.mxu1 %v6504_v1  ;;  %v6527_v4 = vld [vmem:[%s8624_s1 + $0x60] sm:$0xff]  ;;  %v6536_v5 = vld [vmem:[%s8624_s1 + $0x58] sm:$0xff]  ;;  %v6545_v6 = vld [vmem:[%s8624_s1 + $0x50] sm:$0xff]  ;;  %vm5547_vm6 = vcmask 687104   ;;  %vm5624_vm7 = vcmask 15360  }
   0x3   :  { %190 = vmatprep.subr.mxu0 %v8634_v0  ;;  %531 = vmatprep.subr.mxu1 %v8634_v0  ;;  %v6554_v7 = vld [vmem:[%s8624_s1 + $0x48] sm:$0xff]  ;;  %v6563_v8 = vld [vmem:[%s8624_s1 + $0x40] sm:$0xff]  ;;  %v6572_v9 = vld [vmem:[%s8624_s1 + $0x38] sm:$0xff] }
   0x4   :  { %191 = vmatpush1.msra.mxu0 %v6509_v2  ;;  %532 = vmatpush1.msra.mxu1 %v6509_v2  ;;  %v6581_v10 = vld [vmem:[%s8624_s1 + $0x30] sm:$0xff]  ;;  %v6590_v11 = vld [vmem:[%s8624_s1 + $0x28] sm:$0xff]  ;;  %v6599_v12 = vld [vmem:[%s8624_s1 + $0x20] sm:$0xff] }
   0x5   :  { %192 = vmatprep.subr.mxu0 %v8634_v0  ;;  %533 = vmatprep.subr.mxu1 %v8634_v0  ;;  %v6608_v13 = vld [vmem:[%s8624_s1 + $0x18] sm:$0xff]  ;;  %v6617_v14 = vld [vmem:[%s8624_s1 + $0x10] sm:$0xff]  ;;  %v6626_v15 = vld [vmem:[%s8624_s1 + $0x8] sm:$0xff] }
   0x6   :  { %193 = vmatpush1.msra.mxu0 %v6518_v3  ;;  %534 = vmatpush1.msra.mxu1 %v6518_v3  ;;  %v6635_v16 = vld [vmem:[%s8624_s1] sm:$0xff]  ;;  %v6644_v17 = vld [vmem:[%s8624_s1 + $0x90] sm:$0x3f]  ;;  %v6653_v18 = vld [vmem:[%s8624_s1 + $0x88] sm:$0xff] }
   0x7   :  { %194 = vmatprep.subr.mxu0 %v8634_v0  ;;  %535 = vmatprep.subr.mxu1 %v8634_v0  ;;  %v6664_v19 = vld [vmem:[%s8624_s1 + $0x80] sm:$0xff]  ;;  %v53_v20 = vld [vmem:[%s8625_s0 + $0x8] sm:$0xff]  ;;  %v5669_v21 = vld [vmem:[%s8625_s0 + $0x198] sm:$0xff] }
   0x8   :  { %195 = vmatpush1.msra.mxu0 %v6527_v4  ;;  %536 = vmatpush1.msra.mxu1 %v6527_v4  ;;  %v52_v22 = vld [vmem:[%s8625_s0] sm:$0xff]  ;;  %v5668_v23 = vld [vmem:[%s8625_s0 + $0x190] sm:$0xff]  ;;  %v55_v24 = vld [vmem:[%s8625_s0 + $0x18] sm:$0xff] }
   0x9   :  { %196 = vmatprep.subr.mxu0 %v8634_v0  ;;  %537 = vmatprep.subr.mxu1 %v8634_v0  ;;  %v5671_v25 = vld [vmem:[%s8625_s0 + $0x1a8] sm:$0xff]  ;;  %v54_v26 = vld [vmem:[%s8625_s0 + $0x10] sm:$0xff]  ;;  %v5670_v27 = vld [vmem:[%s8625_s0 + $0x1a0] sm:$0xff] }
   0xa   :  { %197 = vmatpush1.msra.mxu0 %v6536_v5  ;;  %538 = vmatpush1.msra.mxu1 %v6536_v5  ;;  %v57_v28 = vld [vmem:[%s8625_s0 + $0x28] sm:$0xff]  ;;  %v5673_v29 = vld [vmem:[%s8625_s0 + $0x1b8] sm:$0xff]  ;;  %v56_v30 = vld [vmem:[%s8625_s0 + $0x20] sm:$0xff] }
   0xb   :  { %198 = vmatprep.subr.mxu0 %v8634_v0  ;;  %539 = vmatprep.subr.mxu1 %v8634_v0  ;;  %v5672_v31 = vld [vmem:[%s8625_s0 + $0x1b0] sm:$0xff]  ;;  %v59_v32 = vld [vmem:[%s8625_s0 + $0x38] sm:$0xff]  ;;  %v5675_v33 = vld [vmem:[%s8625_s0 + $0x1c8] sm:$0xff] }
   0xc   :  { %199 = vmatpush1.msra.mxu0 %v6545_v6  ;;  %540 = vmatpush1.msra.mxu1 %v6545_v6  ;;  %v58_v34 = vld [vmem:[%s8625_s0 + $0x30] sm:$0xff]  ;;  %v5674_v35 = vld [vmem:[%s8625_s0 + $0x1c0] sm:$0xff]  ;;  %v61_v36 = vld [vmem:[%s8625_s0 + $0x48] sm:$0xff] }
   0xd   :  { %200 = vmatprep.subr.mxu0 %v8634_v0  ;;  %541 = vmatprep.subr.mxu1 %v8634_v0  ;;  %v5677_v37 = vld [vmem:[%s8625_s0 + $0x1d8] sm:$0xff]  ;;  %v60_v38 = vld [vmem:[%s8625_s0 + $0x40] sm:$0xff]  ;;  %v5676_v39 = vld [vmem:[%s8625_s0 + $0x1d0] sm:$0xff] }
   0xe   :  { %201 = vmatpush1.msra.mxu0 %v6554_v7  ;;  %542 = vmatpush1.msra.mxu1 %v6554_v7  ;;  %v63_v40 = vld [vmem:[%s8625_s0 + $0x58] sm:$0xff]  ;;  %v5679_v41 = vld [vmem:[%s8625_s0 + $0x1e8] sm:$0xff]  ;;  %v62_v42 = vld [vmem:[%s8625_s0 + $0x50] sm:$0xff] }
   0xf   :  { %202 = vmatprep.subr.mxu0 %v8634_v0  ;;  %543 = vmatprep.subr.mxu1 %v8634_v0  ;;  %v5678_v43 = vld [vmem:[%s8625_s0 + $0x1e0] sm:$0xff]  ;;  %v65_v44 = vld [vmem:[%s8625_s0 + $0x68] sm:$0xff]  ;;  %v5681_v45 = vld [vmem:[%s8625_s0 + $0x1f8] sm:$0xff] }
  0x10   :  { %203 = vmatpush1.msra.mxu0 %v6563_v8  ;;  %544 = vmatpush1.msra.mxu1 %v6563_v8  ;;  %v64_v46 = vld [vmem:[%s8625_s0 + $0x60] sm:$0xff]  ;;  %v5680_v47 = vld [vmem:[%s8625_s0 + $0x1f0] sm:$0xff]  ;;  %v67_v48 = vld [vmem:[%s8625_s0 + $0x78] sm:$0xff] }
  0x11   :  { %204 = vmatprep.subr.mxu0 %v8634_v0  ;;  %545 = vmatprep.subr.mxu1 %v8634_v0  ;;  %v5683_v49 = vld [vmem:[%s8625_s0 + $0x208] sm:$0xff]  ;;  %v66_v50 = vld [vmem:[%s8625_s0 + $0x70] sm:$0xff]  ;;  %v5682_v51 = vld [vmem:[%s8625_s0 + $0x200] sm:$0xff] }
  0x12   :  { %205 = vmatpush1.msra.mxu0 %v6572_v9  ;;  %546 = vmatpush1.msra.mxu1 %v6572_v9  ;;  %v69_v52 = vld [vmem:[%s8625_s0 + $0x88] sm:$0xff]  ;;  %v5685_v53 = vld [vmem:[%s8625_s0 + $0x218] sm:$0xff]  ;;  %v68_v54 = vld [vmem:[%s8625_s0 + $0x80] sm:$0xff] }
  0x13   :  { %206 = vmatprep.subr.mxu0 %v8634_v0  ;;  %547 = vmatprep.subr.mxu1 %v8634_v0  ;;  %v5684_v55 = vld [vmem:[%s8625_s0 + $0x210] sm:$0xff]  ;;  %v71_v56 = vld [vmem:[%s8625_s0 + $0x98] sm:$0xff]  ;;  %v5687_v57 = vld [vmem:[%s8625_s0 + $0x228] sm:$0xff] }
  0x14   :  { %207 = vmatpush1.msra.mxu0 %v6581_v10  ;;  %548 = vmatpush1.msra.mxu1 %v6581_v10  ;;  %v70_v58 = vld [vmem:[%s8625_s0 + $0x90] sm:$0xff]  ;;  %v5686_v59 = vld [vmem:[%s8625_s0 + $0x220] sm:$0xff]  ;;  %v73_v60 = vld [vmem:[%s8625_s0 + $0xa8] sm:$0xff] }
  0x15   :  { %208 = vmatprep.subr.mxu0 %v8634_v0  ;;  %549 = vmatprep.subr.mxu1 %v8634_v0  ;;  %v5689_v61 = vld [vmem:[%s8625_s0 + $0x238] sm:$0xff]  ;;  %v72_v62 = vld [vmem:[%s8625_s0 + $0xa0] sm:$0xff]  ;;  %v5688_v63 = vld [vmem:[%s8625_s0 + $0x230] sm:$0xff] }
  0x16   :  { %209 = vmatpush1.msra.mxu0 %v6590_v11  ;;  %550 = vmatpush1.msra.mxu1 %v6590_v11 }
  0x17   :  { %210 = vmatprep.subr.mxu0 %v8634_v0  ;;  %551 = vmatprep.subr.mxu1 %v8634_v0 }
  0x18   :  { %211 = vmatpush1.msra.mxu0 %v6599_v12  ;;  %552 = vmatpush1.msra.mxu1 %v6599_v12 }
  0x19   :  { %212 = vmatprep.subr.mxu0 %v8634_v0  ;;  %553 = vmatprep.subr.mxu1 %v8634_v0 }
  0x1a   :  { %213 = vmatpush1.msra.mxu0 %v6608_v13  ;;  %554 = vmatpush1.msra.mxu1 %v6608_v13 }
  0x1b   :  { %214 = vmatprep.subr.mxu0 %v8634_v0  ;;  %555 = vmatprep.subr.mxu1 %v8634_v0 }
  0x1c   :  { %215 = vmatpush1.msra.mxu0 %v6617_v14  ;;  %556 = vmatpush1.msra.mxu1 %v6617_v14 }
  0x1d   :  { %216 = vmatprep.subr.mxu0 %v8634_v0  ;;  %557 = vmatprep.subr.mxu1 %v8634_v0 }
  0x1e   :  { %217 = vmatpush1.msra.mxu0 %v6626_v15  ;;  %558 = vmatpush1.msra.mxu1 %v6626_v15 }
  0x1f   :  { %218 = vmatprep.subr.mxu0 %v8634_v0  ;;  %559 = vmatprep.subr.mxu1 %v8634_v0 }
  0x20   :  { %219 = vmatpush1.msra.mxu0 %v6635_v16  ;;  %560 = vmatpush1.msra.mxu1 %v6635_v16 }
  0x21   :  { %246 = vmatprep.subr.mxu0 %v8634_v0  ;;  %587 = vmatprep.subr.mxu1 %v8634_v0 }
  0x22   :  { %5642 = vmatpush2.msk.msra.mxu0 %vm184_vm0, %v6644_v17  ;;  %5718 = vmatpush2.msk.msra.mxu1 %vm184_vm0, %v6644_v17 }
  0x23   :  { %248 = vmatprep.subr.mxu0 %v8634_v0  ;;  %589 = vmatprep.subr.mxu1 %v8634_v0 }
  0x24   :  { %249 = vmatpush2.msra.mxu0 %v6653_v18  ;;  %590 = vmatpush2.msra.mxu1 %v6653_v18 }
  0x25   :  { %250 = vmatprep.subr.mxu0 %v8634_v0  ;;  %591 = vmatprep.subr.mxu1 %v8634_v0 }
  0x26   :  { %251 = vmatpush2.msra.mxu0 %v6664_v19  ;;  %5643 = vmatprep.mubr.msk.f32.mxu0 %vm108_vm1, %v53_v20  ;;  %v5694_v20 = vld [vmem:[%s8625_s0 + $0x260] sm:$0xff] }
  0x27   :  { %592 = vmatpush2.msra.mxu1 %v6664_v19  ;;  %5719 = vmatprep.mubr.msk.f32.mxu1 %vm108_vm1, %v5669_v21  ;;  %v81_v21 = vld [vmem:[%s8625_s0 + $0xe8] sm:$0xff] }
  0x28   :  { %253 = vmatmul.mubr.f32.vlgmr.msra.gmra.mxu0 %v52_v22  ;;  %594 = vmatmul.mubr.f32.vlgmr.msra.gmra.mxu1 %v5668_v23  ;;  %v80_v22 = vld [vmem:[%s8625_s0 + $0xe0] sm:$0xff]  ;;  %v5696_v23 = vld [vmem:[%s8625_s0 + $0x270] sm:$0xff] }
  0x29   :  { %895 = vmatprep.subr.mxu0 %v8634_v0  ;;  %1236 = vmatprep.subr.mxu1 %v8634_v0 }
  0x2a   :  { %896 = vmatpush1.msra.mxu0 %v6504_v1  ;;  %1237 = vmatpush1.msra.mxu1 %v6504_v1  ;;  %v75_v1 = vld [vmem:[%s8625_s0 + $0xb8] sm:$0xff] }
  0x2b   :  { %5644 = vmatprep.mubr.msk.f32.mxu0 %vm108_vm1, %v55_v24  ;;  %5720 = vmatprep.mubr.msk.f32.mxu1 %vm108_vm1, %v5671_v25  ;;  %v83_v24 = vld [vmem:[%s8625_s0 + $0xf8] sm:$0xff]  ;;  %v82_v25 = vld [vmem:[%s8625_s0 + $0xf0] sm:$0xff] }
  0x2c   :  { %258 = vmatmul.mubr.f32.gmra.mxu0 %v54_v26  ;;  %599 = vmatmul.mubr.f32.gmra.mxu1 %v5670_v27  ;;  %v5698_v26 = vld [vmem:[%s8625_s0 + $0x280] sm:$0xff]  ;;  %v85_v27 = vld [vmem:[%s8625_s0 + $0x108] sm:$0xff] }
  0x2d   :  { %897 = vmatprep.subr.mxu0 %v8634_v0  ;;  %1238 = vmatprep.subr.mxu1 %v8634_v0 }
  0x2e   :  { %5645 = vmatprep.mubr.msk.f32.mxu0 %vm108_vm1, %v57_v28  ;;  %5721 = vmatprep.mubr.msk.f32.mxu1 %vm108_vm1, %v5673_v29  ;;  %v84_v28 = vld [vmem:[%s8625_s0 + $0x100] sm:$0xff]  ;;  %v5700_v29 = vld [vmem:[%s8625_s0 + $0x290] sm:$0xff] }
  0x2f   :  { %898 = vmatpush1.msra.mxu0 %v6509_v2  ;;  %1239 = vmatpush1.msra.mxu1 %v6509_v2  ;;  %v5691_v2 = vld [vmem:[%s8625_s0 + $0x248] sm:$0xff] }
  0x30   :  { %263 = vmatmul.mubr.f32.gmra.mxu0 %v56_v30  ;;  %604 = vmatmul.mubr.f32.gmra.mxu1 %v5672_v31  ;;  %v87_v30 = vld [vmem:[%s8625_s0 + $0x118] sm:$0xff]  ;;  %v86_v31 = vld [vmem:[%s8625_s0 + $0x110] sm:$0xff] }
  0x31   :  { %5646 = vmatprep.mubr.msk.f32.mxu0 %vm108_vm1, %v59_v32  ;;  %5722 = vmatprep.mubr.msk.f32.mxu1 %vm108_vm1, %v5675_v33  ;;  %v5702_v32 = vld [vmem:[%s8625_s0 + $0x2a0] sm:$0xff]  ;;  %v89_v33 = vld [vmem:[%s8625_s0 + $0x128] sm:$0xff] }
  0x32   :  { %899 = vmatprep.subr.mxu0 %v8634_v0  ;;  %1240 = vmatprep.subr.mxu1 %v8634_v0 }
  0x33   :  { %900 = vmatpush1.msra.mxu0 %v6518_v3  ;;  %1241 = vmatpush1.msra.mxu1 %v6518_v3  ;;  %v74_v3 = vld [vmem:[%s8625_s0 + $0xb0] sm:$0xff] }
  0x34   :  { %268 = vmatmul.mubr.f32.gmra.mxu0 %v58_v34  ;;  %609 = vmatmul.mubr.f32.gmra.mxu1 %v5674_v35  ;;  %v88_v34 = vld [vmem:[%s8625_s0 + $0x120] sm:$0xff]  ;;  %v5704_v35 = vld [vmem:[%s8625_s0 + $0x2b0] sm:$0xff] }
  0x35   :  { %5647 = vmatprep.mubr.msk.f32.mxu0 %vm108_vm1, %v61_v36  ;;  %5723 = vmatprep.mubr.msk.f32.mxu1 %vm108_vm1, %v5677_v37  ;;  %v91_v36 = vld [vmem:[%s8625_s0 + $0x138] sm:$0xff]  ;;  %v90_v37 = vld [vmem:[%s8625_s0 + $0x130] sm:$0xff] }
  0x36   :  { %901 = vmatprep.subr.mxu0 %v8634_v0  ;;  %1242 = vmatprep.subr.mxu1 %v8634_v0 }
  0x37   :  { %902 = vmatpush1.msra.mxu0 %v6527_v4  ;;  %1243 = vmatpush1.msra.mxu1 %v6527_v4  ;;  %v5690_v4 = vld [vmem:[%s8625_s0 + $0x240] sm:$0xff] }
  0x38   :  { %273 = vmatmul.mubr.f32.gmra.mxu0 %v60_v38  ;;  %614 = vmatmul.mubr.f32.gmra.mxu1 %v5676_v39  ;;  %v5706_v38 = vld [vmem:[%s8625_s0 + $0x2c0] sm:$0xff]  ;;  %v93_v39 = vld [vmem:[%s8625_s0 + $0x148] sm:$0xff] }
  0x39   :  { %5648 = vmatprep.mubr.msk.f32.mxu0 %vm108_vm1, %v63_v40  ;;  %5724 = vmatprep.mubr.msk.f32.mxu1 %vm108_vm1, %v5679_v41  ;;  %v92_v40 = vld [vmem:[%s8625_s0 + $0x140] sm:$0xff]  ;;  %v5708_v41 = vld [vmem:[%s8625_s0 + $0x2d0] sm:$0xff] }
  0x3a   :  { %903 = vmatprep.subr.mxu0 %v8634_v0  ;;  %1244 = vmatprep.subr.mxu1 %v8634_v0 }
  0x3b   :  { %904 = vmatpush1.msra.mxu0 %v6536_v5  ;;  %1245 = vmatpush1.msra.mxu1 %v6536_v5  ;;  %v77_v5 = vld [vmem:[%s8625_s0 + $0xc8] sm:$0xff] }
  0x3c   :  { %278 = vmatmul.mubr.f32.gmra.mxu0 %v62_v42  ;;  %619 = vmatmul.mubr.f32.gmra.mxu1 %v5678_v43  ;;  %v95_v42 = vld [vmem:[%s8625_s0 + $0x158] sm:$0xff]  ;;  %v94_v43 = vld [vmem:[%s8625_s0 + $0x150] sm:$0xff] }
  0x3d   :  { %5649 = vmatprep.mubr.msk.f32.mxu0 %vm108_vm1, %v65_v44  ;;  %5725 = vmatprep.mubr.msk.f32.mxu1 %vm108_vm1, %v5681_v45  ;;  %v5710_v44 = vld [vmem:[%s8625_s0 + $0x2e0] sm:$0xff]  ;;  %v97_v45 = vld [vmem:[%s8625_s0 + $0x168] sm:$0xff] }
  0x3e   :  { %905 = vmatprep.subr.mxu0 %v8634_v0  ;;  %1246 = vmatprep.subr.mxu1 %v8634_v0 }
  0x3f   :  { %906 = vmatpush1.msra.mxu0 %v6545_v6  ;;  %1247 = vmatpush1.msra.mxu1 %v6545_v6  ;;  %v5693_v6 = vld [vmem:[%s8625_s0 + $0x258] sm:$0xff] }
  0x40   :  { %283 = vmatmul.mubr.f32.gmra.mxu0 %v64_v46  ;;  %624 = vmatmul.mubr.f32.gmra.mxu1 %v5680_v47  ;;  %v5713_v46 = vld [vmem:[%s8625_s0 + $0x2f8] sm:$0xff]  ;;  %v96_v47 = vld [vmem:[%s8625_s0 + $0x160] sm:$0xff] }
  0x41   :  { %5650 = vmatprep.mubr.msk.f32.mxu0 %vm108_vm1, %v67_v48  ;;  %5726 = vmatprep.mubr.msk.f32.mxu1 %vm108_vm1, %v5683_v49  ;;  %v5712_v48 = vld [vmem:[%s8625_s0 + $0x2f0] sm:$0xff]  ;;  %v99_v49 = vld [vmem:[%s8625_s0 + $0x178] sm:$0xff] }
  0x42   :  { %907 = vmatprep.subr.mxu0 %v8634_v0  ;;  %1248 = vmatprep.subr.mxu1 %v8634_v0 }
  0x43   :  { %908 = vmatpush1.msra.mxu0 %v6554_v7  ;;  %1249 = vmatpush1.msra.mxu1 %v6554_v7  ;;  %v76_v7 = vld [vmem:[%s8625_s0 + $0xc0] sm:$0xff] }
  0x44   :  { %288 = vmatmul.mubr.f32.gmra.mxu0 %v66_v50  ;;  %629 = vmatmul.mubr.f32.gmra.mxu1 %v5682_v51  ;;  %v5715_v50 = vld [vmem:[%s8625_s0 + $0x308] sm:$0xff]  ;;  %v98_v51 = vld [vmem:[%s8625_s0 + $0x170] sm:$0xff] }
  0x45   :  { %5651 = vmatprep.mubr.msk.f32.mxu0 %vm108_vm1, %v69_v52  ;;  %5727 = vmatprep.mubr.msk.f32.mxu1 %vm108_vm1, %v5685_v53  ;;  %v5714_v52 = vld [vmem:[%s8625_s0 + $0x300] sm:$0xff]  ;;  %v101_v53 = vld [vmem:[%s8625_s0 + $0x188] sm:$0xff] }
  0x46   :  { %909 = vmatprep.subr.mxu0 %v8634_v0  ;;  %1250 = vmatprep.subr.mxu1 %v8634_v0 }
  0x47   :  { %910 = vmatpush1.msra.mxu0 %v6563_v8  ;;  %1251 = vmatpush1.msra.mxu1 %v6563_v8  ;;  %v5692_v8 = vld [vmem:[%s8625_s0 + $0x250] sm:$0xff] }
  0x48   :  { %293 = vmatmul.mubr.f32.gmra.mxu0 %v68_v54  ;;  %634 = vmatmul.mubr.f32.gmra.mxu1 %v5684_v55  ;;  %v5717_v54 = vld [vmem:[%s8625_s0 + $0x318] sm:$0xff]  ;;  %v100_v55 = vld [vmem:[%s8625_s0 + $0x180] sm:$0xff] }
  0x49   :  { %5652 = vmatprep.mubr.msk.f32.mxu0 %vm108_vm1, %v71_v56  ;;  %5728 = vmatprep.mubr.msk.f32.mxu1 %vm108_vm1, %v5687_v57  ;;  %v5716_v56 = vld [vmem:[%s8625_s0 + $0x310] sm:$0xff]  ;;  %v5745_v57 = vld [vmem:[%s8625_s0 + $0x328] sm:$0xff] }
  0x4a   :  { %911 = vmatprep.subr.mxu0 %v8634_v0  ;;  %1252 = vmatprep.subr.mxu1 %v8634_v0 }
  0x4b   :  { %912 = vmatpush1.msra.mxu0 %v6572_v9  ;;  %1253 = vmatpush1.msra.mxu1 %v6572_v9  ;;  %v79_v9 = vld [vmem:[%s8625_s0 + $0xd8] sm:$0xff] }
  0x4c   :  { %298 = vmatmul.mubr.f32.gmra.mxu0 %v70_v58  ;;  %639 = vmatmul.mubr.f32.gmra.mxu1 %v5686_v59  ;;  %v5821_v58 = vld [vmem:[%s8625_s0 + $0x4b8] sm:$0xff]  ;;  %v5744_v59 = vld [vmem:[%s8625_s0 + $0x320] sm:$0xff] }
  0x4d   :  { %5653 = vmatprep.mubr.msk.f32.mxu0 %vm108_vm1, %v73_v60  ;;  %5729 = vmatprep.mubr.msk.f32.mxu1 %vm108_vm1, %v5689_v61  ;;  %v5820_v60 = vld [vmem:[%s8625_s0 + $0x4b0] sm:$0xff]  ;;  %v5747_v61 = vld [vmem:[%s8625_s0 + $0x338] sm:$0xff] }
  0x4e   :  { %913 = vmatprep.subr.mxu0 %v8634_v0  ;;  %1254 = vmatprep.subr.mxu1 %v8634_v0 }
  0x4f   :  { %914 = vmatpush1.msra.mxu0 %v6581_v10  ;;  %1255 = vmatpush1.msra.mxu1 %v6581_v10  ;;  %v5695_v10 = vld [vmem:[%s8625_s0 + $0x268] sm:$0xff] }
  0x50   :  { %303 = vmatmul.mubr.f32.gmra.mxu0 %v72_v62  ;;  %644 = vmatmul.mubr.f32.gmra.mxu1 %v5688_v63  ;;  %v5823_v62 = vld [vmem:[%s8625_s0 + $0x4c8] sm:$0xff]  ;;  %v5746_v63 = vld [vmem:[%s8625_s0 + $0x330] sm:$0xff] }
  0x51   :  { %5654 = vmatprep.mubr.msk.f32.mxu0 %vm108_vm1, %v75_v1  ;;  %5730 = vmatprep.mubr.msk.f32.mxu1 %vm108_vm1, %v5691_v2  ;;  %v5822_v1 = vld [vmem:[%s8625_s0 + $0x4c0] sm:$0xff]  ;;  %v5749_v2 = vld [vmem:[%s8625_s0 + $0x348] sm:$0xff] }
  0x52   :  { %915 = vmatprep.subr.mxu0 %v8634_v0  ;;  %1256 = vmatprep.subr.mxu1 %v8634_v0 }
  0x53   :  { %916 = vmatpush1.msra.mxu0 %v6590_v11  ;;  %1257 = vmatpush1.msra.mxu1 %v6590_v11  ;;  %v78_v11 = vld [vmem:[%s8625_s0 + $0xd0] sm:$0xff] }
  0x54   :  { %308 = vmatmul.mubr.f32.gmra.mxu0 %v74_v3  ;;  %649 = vmatmul.mubr.f32.gmra.mxu1 %v5690_v4  ;;  %v5825_v3 = vld [vmem:[%s8625_s0 + $0x4d8] sm:$0xff]  ;;  %v5748_v4 = vld [vmem:[%s8625_s0 + $0x340] sm:$0xff] }
  0x55   :  { %5655 = vmatprep.mubr.msk.f32.mxu0 %vm108_vm1, %v77_v5  ;;  %5731 = vmatprep.mubr.msk.f32.mxu1 %vm108_vm1, %v5693_v6  ;;  %v5824_v5 = vld [vmem:[%s8625_s0 + $0x4d0] sm:$0xff]  ;;  %v5751_v6 = vld [vmem:[%s8625_s0 + $0x358] sm:$0xff] }
  0x56   :  { %917 = vmatprep.subr.mxu0 %v8634_v0  ;;  %1258 = vmatprep.subr.mxu1 %v8634_v0 }
  0x57   :  { %918 = vmatpush1.msra.mxu0 %v6599_v12  ;;  %1259 = vmatpush1.msra.mxu1 %v6599_v12  ;;  %v5697_v12 = vld [vmem:[%s8625_s0 + $0x278] sm:$0xff] }
  0x58   :  { %313 = vmatmul.mubr.f32.gmra.mxu0 %v76_v7  ;;  %654 = vmatmul.mubr.f32.gmra.mxu1 %v5692_v8  ;;  %v5827_v7 = vld [vmem:[%s8625_s0 + $0x4e8] sm:$0xff]  ;;  %v5750_v8 = vld [vmem:[%s8625_s0 + $0x350] sm:$0xff] }
  0x59   :  { %5656 = vmatprep.mubr.msk.f32.mxu0 %vm108_vm1, %v79_v9  ;;  %5732 = vmatprep.mubr.msk.f32.mxu1 %vm108_vm1, %v5695_v10  ;;  %v5826_v9 = vld [vmem:[%s8625_s0 + $0x4e0] sm:$0xff]  ;;  %v5753_v10 = vld [vmem:[%s8625_s0 + $0x368] sm:$0xff] }
  0x5a   :  { %919 = vmatprep.subr.mxu0 %v8634_v0  ;;  %1260 = vmatprep.subr.mxu1 %v8634_v0 }
  0x5b   :  { %920 = vmatpush1.msra.mxu0 %v6608_v13  ;;  %1261 = vmatpush1.msra.mxu1 %v6608_v13  ;;  %v5699_v13 = vld [vmem:[%s8625_s0 + $0x288] sm:$0xff] }
  0x5c   :  { %318 = vmatmul.mubr.f32.gmra.mxu0 %v78_v11  ;;  %659 = vmatmul.mubr.f32.gmra.mxu1 %v5694_v20  ;;  %v5829_v11 = vld [vmem:[%s8625_s0 + $0x4f8] sm:$0xff]  ;;  %v5752_v20 = vld [vmem:[%s8625_s0 + $0x360] sm:$0xff] }
  0x5d   :  { %5657 = vmatprep.mubr.msk.f32.mxu0 %vm108_vm1, %v81_v21  ;;  %5733 = vmatprep.mubr.msk.f32.mxu1 %vm108_vm1, %v5697_v12  ;;  %v5828_v21 = vld [vmem:[%s8625_s0 + $0x4f0] sm:$0xff]  ;;  %v5755_v12 = vld [vmem:[%s8625_s0 + $0x378] sm:$0xff] }
  0x5e   :  { %921 = vmatprep.subr.mxu0 %v8634_v0  ;;  %1262 = vmatprep.subr.mxu1 %v8634_v0 }
  0x5f   :  { %922 = vmatpush1.msra.mxu0 %v6617_v14  ;;  %1263 = vmatpush1.msra.mxu1 %v6617_v14  ;;  %v5701_v14 = vld [vmem:[%s8625_s0 + $0x298] sm:$0xff] }
  0x60   :  { %323 = vmatmul.mubr.f32.gmra.mxu0 %v80_v22  ;;  %664 = vmatmul.mubr.f32.gmra.mxu1 %v5696_v23  ;;  %v5831_v22 = vld [vmem:[%s8625_s0 + $0x508] sm:$0xff]  ;;  %v5754_v23 = vld [vmem:[%s8625_s0 + $0x370] sm:$0xff] }
  0x61   :  { %5658 = vmatprep.mubr.msk.f32.mxu0 %vm108_vm1, %v83_v24  ;;  %5734 = vmatprep.mubr.msk.f32.mxu1 %vm108_vm1, %v5699_v13  ;;  %v5830_v24 = vld [vmem:[%s8625_s0 + $0x500] sm:$0xff]  ;;  %v5757_v13 = vld [vmem:[%s8625_s0 + $0x388] sm:$0xff] }
  0x62   :  { %923 = vmatprep.subr.mxu0 %v8634_v0  ;;  %1264 = vmatprep.subr.mxu1 %v8634_v0 }
  0x63   :  { %924 = vmatpush1.msra.mxu0 %v6626_v15  ;;  %1265 = vmatpush1.msra.mxu1 %v6626_v15  ;;  %v5703_v15 = vld [vmem:[%s8625_s0 + $0x2a8] sm:$0xff] }
  0x64   :  { %328 = vmatmul.mubr.f32.gmra.mxu0 %v82_v25  ;;  %669 = vmatmul.mubr.f32.gmra.mxu1 %v5698_v26  ;;  %v5833_v25 = vld [vmem:[%s8625_s0 + $0x518] sm:$0xff]  ;;  %v5756_v26 = vld [vmem:[%s8625_s0 + $0x380] sm:$0xff] }
  0x65   :  { %5659 = vmatprep.mubr.msk.f32.mxu0 %vm108_vm1, %v85_v27  ;;  %5735 = vmatprep.mubr.msk.f32.mxu1 %vm108_vm1, %v5701_v14  ;;  %v5832_v27 = vld [vmem:[%s8625_s0 + $0x510] sm:$0xff]  ;;  %v5759_v14 = vld [vmem:[%s8625_s0 + $0x398] sm:$0xff] }
  0x66   :  { %925 = vmatprep.subr.mxu0 %v8634_v0  ;;  %1266 = vmatprep.subr.mxu1 %v8634_v0 }
  0x67   :  { %926 = vmatpush1.msra.mxu0 %v6635_v16  ;;  %1267 = vmatpush1.msra.mxu1 %v6635_v16  ;;  %v5705_v16 = vld [vmem:[%s8625_s0 + $0x2b8] sm:$0xff] }
  0x68   :  { %333 = vmatmul.mubr.f32.gmra.mxu0 %v84_v28  ;;  %674 = vmatmul.mubr.f32.gmra.mxu1 %v5700_v29  ;;  %v5835_v28 = vld [vmem:[%s8625_s0 + $0x528] sm:$0xff]  ;;  %v5758_v29 = vld [vmem:[%s8625_s0 + $0x390] sm:$0xff] }
  0x69   :  { %5660 = vmatprep.mubr.msk.f32.mxu0 %vm108_vm1, %v87_v30  ;;  %5736 = vmatprep.mubr.msk.f32.mxu1 %vm108_vm1, %v5703_v15  ;;  %v5834_v30 = vld [vmem:[%s8625_s0 + $0x520] sm:$0xff]  ;;  %v5761_v15 = vld [vmem:[%s8625_s0 + $0x3a8] sm:$0xff] }
  0x6a   :  { %953 = vmatprep.subr.mxu0 %v8634_v0  ;;  %1294 = vmatprep.subr.mxu1 %v8634_v0 }
  0x6b   :  { %5794 = vmatpush2.msk.msra.mxu0 %vm184_vm0, %v6644_v17  ;;  %5870 = vmatpush2.msk.msra.mxu1 %vm184_vm0, %v6644_v17  ;;  %v5707_v17 = vld [vmem:[%s8625_s0 + $0x2c8] sm:$0xff] }
  0x6c   :  { %338 = vmatmul.mubr.f32.gmra.mxu0 %v86_v31  ;;  %679 = vmatmul.mubr.f32.gmra.mxu1 %v5702_v32  ;;  %v5837_v31 = vld [vmem:[%s8625_s0 + $0x538] sm:$0xff]  ;;  %v5900_v32 = vld [vmem:[%s8626_s3 + $0x50] sm:$0xff] }
  0x6d   :  { %5661 = vmatprep.mubr.msk.f32.mxu0 %vm108_vm1, %v89_v33  ;;  %5737 = vmatprep.mubr.msk.f32.mxu1 %vm108_vm1, %v5705_v16  ;;  %v5899_v33 = vld [vmem:[%s8626_s3 + $0x48] sm:$0xff]  ;;  %v5760_v16 = vld [vmem:[%s8625_s0 + $0x3a0] sm:$0xff] }
  0x6e   :  { %955 = vmatprep.subr.mxu0 %v8634_v0  ;;  %1296 = vmatprep.subr.mxu1 %v8634_v0 }
  0x6f   :  { %956 = vmatpush2.msra.mxu0 %v6653_v18  ;;  %1297 = vmatpush2.msra.mxu1 %v6653_v18  ;;  %v5709_v18 = vld [vmem:[%s8625_s0 + $0x2d8] sm:$0xff] }
  0x70   :  { %343 = vmatmul.mubr.f32.gmra.mxu0 %v88_v34  ;;  %684 = vmatmul.mubr.f32.gmra.mxu1 %v5704_v35  ;;  %v5836_v34 = vld [vmem:[%s8625_s0 + $0x530] sm:$0xff]  ;;  %v5763_v35 = vld [vmem:[%s8625_s0 + $0x3b8] sm:$0xff] }
  0x71   :  { %5662 = vmatprep.mubr.msk.f32.mxu0 %vm108_vm1, %v91_v36  ;;  %5738 = vmatprep.mubr.msk.f32.mxu1 %vm108_vm1, %v5707_v17  ;;  %v5839_v36 = vld [vmem:[%s8625_s0 + $0x548] sm:$0xff]  ;;  %v5762_v17 = vld [vmem:[%s8625_s0 + $0x3b0] sm:$0xff] }
  0x72   :  { %957 = vmatprep.subr.mxu0 %v8634_v0  ;;  %1298 = vmatprep.subr.mxu1 %v8634_v0 }
  0x73   :  { %958 = vmatpush2.msra.mxu0 %v6664_v19  ;;  %1299 = vmatpush2.msra.mxu1 %v6664_v19  ;;  %v5711_v19 = vld [vmem:[%s8625_s0 + $0x2e8] sm:$0xff] }
  0x74   :  { %348 = vmatmul.mubr.f32.gmra.mxu0 %v90_v37  ;;  %689 = vmatmul.mubr.f32.gmra.mxu1 %v5706_v38  ;;  %v5838_v37 = vld [vmem:[%s8625_s0 + $0x540] sm:$0xff]  ;;  %v5901_v38 = vld [vmem:[%s8626_s3 + $0x58] sm:$0xff] }
  0x75   :  { %5663 = vmatprep.mubr.msk.f32.mxu0 %vm108_vm1, %v93_v39  ;;  %5739 = vmatprep.mubr.msk.f32.mxu1 %vm108_vm1, %v5709_v18  ;;  %v5765_v39 = vld [vmem:[%s8625_s0 + $0x3c8] sm:$0xff]  ;;  %v5841_v18 = vld [vmem:[%s8625_s0 + $0x558] sm:$0xff] }
  0x76   :  { %6225 = vmatprep.subr.mxu1 %v8634_v0  ;;  %1546 = vmatprep.subr.mxu0 %v5900_v32  ;;  %v5788_v32 = vld [vmem:[%s8625_s0 + $0x480] sm:$0xff] }
  0x78   :  { %353 = vmatmul.mubr.f32.gmra.mxu0 %v92_v40  ;;  %694 = vmatmul.mubr.f32.gmra.mxu1 %v5708_v41  ;;  %v5764_v40 = vld [vmem:[%s8625_s0 + $0x3c0] sm:$0xff]  ;;  %v5840_v41 = vld [vmem:[%s8625_s0 + $0x550] sm:$0xff] }
  0x79   :  { %5664 = vmatprep.mubr.msk.f32.mxu0 %vm108_vm1, %v95_v42  ;;  %5740 = vmatprep.mubr.msk.f32.mxu1 %vm108_vm1, %v5711_v19  ;;  %v5767_v42 = vld [vmem:[%s8625_s0 + $0x3d8] sm:$0xff]  ;;  %v5843_v19 = vld [vmem:[%s8625_s0 + $0x568] sm:$0xff] }
  0x7c   :  { %358 = vmatmul.mubr.f32.gmra.mxu0 %v94_v43  ;;  %699 = vmatmul.mubr.f32.gmra.mxu1 %v5710_v44  ;;  %v5766_v43 = vld [vmem:[%s8625_s0 + $0x3d0] sm:$0xff]  ;;  %v5842_v44 = vld [vmem:[%s8625_s0 + $0x560] sm:$0xff] }
  0x7d   :  { %5665 = vmatprep.mubr.msk.f32.mxu0 %vm108_vm1, %v97_v45  ;;  %5741 = vmatprep.mubr.msk.f32.mxu1 %vm108_vm1, %v5713_v46  ;;  %v5769_v45 = vld [vmem:[%s8625_s0 + $0x3e8] sm:$0xff]  ;;  %v5845_v46 = vld [vmem:[%s8625_s0 + $0x578] sm:$0xff] }
  0x80   :  { %363 = vmatmul.mubr.f32.gmra.mxu0 %v96_v47  ;;  %704 = vmatmul.mubr.f32.gmra.mxu1 %v5712_v48  ;;  %v5768_v47 = vld [vmem:[%s8625_s0 + $0x3e0] sm:$0xff]  ;;  %v5844_v48 = vld [vmem:[%s8625_s0 + $0x570] sm:$0xff] }
  0x81   :  { %5666 = vmatprep.mubr.msk.f32.mxu0 %vm108_vm1, %v99_v49  ;;  %5742 = vmatprep.mubr.msk.f32.mxu1 %vm108_vm1, %v5715_v50  ;;  %v5771_v49 = vld [vmem:[%s8625_s0 + $0x3f8] sm:$0xff]  ;;  %v5847_v50 = vld [vmem:[%s8625_s0 + $0x588] sm:$0xff] }
  0x84   :  { %368 = vmatmul.mubr.f32.gmra.mxu0 %v98_v51  ;;  %709 = vmatmul.mubr.f32.gmra.mxu1 %v5714_v52  ;;  %v5770_v51 = vld [vmem:[%s8625_s0 + $0x3f0] sm:$0xff]  ;;  %v5846_v52 = vld [vmem:[%s8625_s0 + $0x580] sm:$0xff] }
  0x85   :  { %5667 = vmatprep.mubr.msk.f32.mxu0 %vm108_vm1, %v101_v53  ;;  %5743 = vmatprep.mubr.msk.f32.mxu1 %vm108_vm1, %v5717_v54  ;;  %v5773_v53 = vld [vmem:[%s8625_s0 + $0x408] sm:$0xff]  ;;  %v5849_v54 = vld [vmem:[%s8625_s0 + $0x598] sm:$0xff] }
  0x88   :  { %373 = vmatmul.mubr.f32.gmra.mxu0 %v100_v55  ;;  %714 = vmatmul.mubr.f32.gmra.mxu1 %v5716_v56  ;;  %v5772_v55 = vld [vmem:[%s8625_s0 + $0x400] sm:$0xff]  ;;  %v5848_v56 = vld [vmem:[%s8625_s0 + $0x590] sm:$0xff] }
  0x89   :  { %5795 = vmatprep.mubr.msk.f32.mxu0 %vm108_vm1, %v5745_v57  ;;  %5871 = vmatprep.mubr.msk.f32.mxu1 %vm108_vm1, %v5821_v58  ;;  %v5775_v57 = vld [vmem:[%s8625_s0 + $0x418] sm:$0xff]  ;;  %v5851_v58 = vld [vmem:[%s8625_s0 + $0x5a8] sm:$0xff] }
  0x8c   :  { %960 = vmatmul.mubr.f32.vlgmr.msra.gmra.mxu0 %v5744_v59  ;;  %1301 = vmatmul.mubr.f32.vlgmr.msra.gmra.mxu1 %v5820_v60  ;;  %v5774_v59 = vld [vmem:[%s8625_s0 + $0x410] sm:$0xff]  ;;  %v5850_v60 = vld [vmem:[%s8625_s0 + $0x5a0] sm:$0xff] }
  0x8d   :  { %5796 = vmatprep.mubr.msk.f32.mxu0 %vm108_vm1, %v5747_v61  ;;  %5872 = vmatprep.mubr.msk.f32.mxu1 %vm108_vm1, %v5823_v62  ;;  %v5777_v61 = vld [vmem:[%s8625_s0 + $0x428] sm:$0xff]  ;;  %v5853_v62 = vld [vmem:[%s8625_s0 + $0x5b8] sm:$0xff] }
  0x8e   :  { %1547 = vmatpush1.msra.mxu0 %v5899_v33  ;;  %6226 = vmatpush3.msra.mxu1 %v5901_v38  ;;  %v5864_v33 = vld [vmem:[%s8625_s0 + $0x610] sm:$0xff]  ;;  %v5869_v38 = vld [vmem:[%s8625_s0 + $0x638] sm:$0xff] }
  0x8f   :  { %6227 = vmatprep.subr.mxu1 %v8634_v0 }
  0x90   :  { %965 = vmatmul.mubr.f32.gmra.mxu0 %v5746_v63  ;;  %1306 = vmatmul.mubr.f32.gmra.mxu1 %v5822_v1  ;;  %v5776_v63 = vld [vmem:[%s8625_s0 + $0x420] sm:$0xff]  ;;  %v5852_v1 = vld [vmem:[%s8625_s0 + $0x5b0] sm:$0xff] }
  0x91   :  { %5797 = vmatprep.mubr.msk.f32.mxu0 %vm108_vm1, %v5749_v2  ;;  %5873 = vmatprep.mubr.msk.f32.mxu1 %vm108_vm1, %v5825_v3  ;;  %v5779_v2 = vld [vmem:[%s8625_s0 + $0x438] sm:$0xff]  ;;  %v5855_v3 = vld [vmem:[%s8625_s0 + $0x5c8] sm:$0xff] }
  0x94   :  { %970 = vmatmul.mubr.f32.gmra.mxu0 %v5748_v4  ;;  %1311 = vmatmul.mubr.f32.gmra.mxu1 %v5824_v5  ;;  %v5778_v4 = vld [vmem:[%s8625_s0 + $0x430] sm:$0xff]  ;;  %v5854_v5 = vld [vmem:[%s8625_s0 + $0x5c0] sm:$0xff] }
  0x95   :  { %5798 = vmatprep.mubr.msk.f32.mxu0 %vm108_vm1, %v5751_v6  ;;  %5874 = vmatprep.mubr.msk.f32.mxu1 %vm108_vm1, %v5827_v7  ;;  %v5781_v6 = vld [vmem:[%s8625_s0 + $0x448] sm:$0xff]  ;;  %v5857_v7 = vld [vmem:[%s8625_s0 + $0x5d8] sm:$0xff] }
  0x98   :  { %975 = vmatmul.mubr.f32.gmra.mxu0 %v5750_v8  ;;  %1316 = vmatmul.mubr.f32.gmra.mxu1 %v5826_v9  ;;  %v5780_v8 = vld [vmem:[%s8625_s0 + $0x440] sm:$0xff]  ;;  %v5856_v9 = vld [vmem:[%s8625_s0 + $0x5d0] sm:$0xff] }
  0x99   :  { %5799 = vmatprep.mubr.msk.f32.mxu0 %vm108_vm1, %v5753_v10  ;;  %5875 = vmatprep.mubr.msk.f32.mxu1 %vm108_vm1, %v5829_v11  ;;  %v5783_v10 = vld [vmem:[%s8625_s0 + $0x458] sm:$0xff]  ;;  %v5859_v11 = vld [vmem:[%s8625_s0 + $0x5e8] sm:$0xff] }
  0x9c   :  { %980 = vmatmul.mubr.f32.gmra.mxu0 %v5752_v20  ;;  %1321 = vmatmul.mubr.f32.gmra.mxu1 %v5828_v21  ;;  %v5782_v20 = vld [vmem:[%s8625_s0 + $0x450] sm:$0xff]  ;;  %v5858_v21 = vld [vmem:[%s8625_s0 + $0x5e0] sm:$0xff] }
  0x9d   :  { %5800 = vmatprep.mubr.msk.f32.mxu0 %vm108_vm1, %v5755_v12  ;;  %5876 = vmatprep.mubr.msk.f32.mxu1 %vm108_vm1, %v5831_v22  ;;  %v5785_v12 = vld [vmem:[%s8625_s0 + $0x468] sm:$0xff]  ;;  %v5861_v22 = vld [vmem:[%s8625_s0 + $0x5f8] sm:$0xff] }
  0xa0   :  { %985 = vmatmul.mubr.f32.gmra.mxu0 %v5754_v23  ;;  %1326 = vmatmul.mubr.f32.gmra.mxu1 %v5830_v24  ;;  %v5897_v23 = vld [vmem:[%s8626_s3 + $0x38] sm:$0xff]  ;;  %v5896_v24 = vld [vmem:[%s8626_s3 + $0x30] sm:$0xff] }
  0xa1   :  { %5801 = vmatprep.mubr.msk.f32.mxu0 %vm108_vm1, %v5757_v13  ;;  %5877 = vmatprep.mubr.msk.f32.mxu1 %vm108_vm1, %v5833_v25  ;;  %v5898_v13 = vld [vmem:[%s8626_s3 + $0x40] sm:$0xff] }
  0xa2   :  { %1548 = vmatprep.subr.mxu0 %v5897_v23  ;;  %v5784_v25 = vld [vmem:[%s8625_s0 + $0x460] sm:$0xff]  ;;  %6228 = vmatpush3.msra.mxu1 %v5898_v13 }
  0xa3   :  { %1549 = vmatpush1.msra.mxu0 %v5896_v24  ;;  %6232 = vmatprep.subr.mxu1 %v8634_v0 }
  0xa4   :  { %990 = vmatmul.mubr.f32.gmra.mxu0 %v5756_v26  ;;  %1331 = vmatmul.mubr.f32.gmra.mxu1 %v5832_v27  ;;  %v5860_v26 = vld [vmem:[%s8625_s0 + $0x5f0] sm:$0xff]  ;;  %v5787_v27 = vld [vmem:[%s8625_s0 + $0x478] sm:$0xff] }
  0xa5   :  { %5802 = vmatprep.mubr.msk.f32.mxu0 %vm108_vm1, %v5759_v14  ;;  %5878 = vmatprep.mubr.msk.f32.mxu1 %vm108_vm1, %v5835_v28  ;;  %v5863_v14 = vld [vmem:[%s8625_s0 + $0x608] sm:$0xff]  ;;  %v5914_v28 = vld [vmem:[%s8626_s3 + $0xb0] sm:$0xff] }
  0xa6   :  { %1704 = vmatprep.subr.mxu0 %v5914_v28 }
  0xa8   :  { %995 = vmatmul.mubr.f32.gmra.mxu0 %v5758_v29  ;;  %1336 = vmatmul.mubr.f32.gmra.mxu1 %v5834_v30  ;;  %v5786_v29 = vld [vmem:[%s8625_s0 + $0x470] sm:$0xff]  ;;  %v5862_v30 = vld [vmem:[%s8625_s0 + $0x600] sm:$0xff] }
  0xa9   :  { %5803 = vmatprep.mubr.msk.f32.mxu0 %vm108_vm1, %v5761_v15  ;;  %5879 = vmatprep.mubr.msk.f32.mxu1 %vm108_vm1, %v5837_v31  ;;  %v5789_v15 = vld [vmem:[%s8625_s0 + $0x488] sm:$0xff]  ;;  %v5865_v31 = vld [vmem:[%s8625_s0 + $0x618] sm:$0xff] }
  0xac   :  { %1000 = vmatmul.mubr.f32.gmra.mxu0 %v5760_v16  ;;  %1341 = vmatmul.mubr.f32.gmra.mxu1 %v5836_v34  ;;  %v5791_v16 = vld [vmem:[%s8625_s0 + $0x498] sm:$0xff]  ;;  %v5867_v34 = vld [vmem:[%s8625_s0 + $0x628] sm:$0xff] }
  0xad   :  { %5804 = vmatprep.mubr.msk.f32.mxu0 %vm108_vm1, %v5763_v35  ;;  %5880 = vmatprep.mubr.msk.f32.mxu1 %vm108_vm1, %v5839_v36  ;;  %v5790_v35 = vld [vmem:[%s8625_s0 + $0x490] sm:$0xff]  ;;  %v5866_v36 = vld [vmem:[%s8625_s0 + $0x620] sm:$0xff] }
  0xb0   :  { %1005 = vmatmul.mubr.f32.gmra.mxu0 %v5762_v17  ;;  %1346 = vmatmul.mubr.f32.gmra.mxu1 %v5838_v37  ;;  %v7463_v17 = vld [vmem:[%s8627_s2] ss:$0 sm:$0xff]  ;;  %v5793_v37 = vld [vmem:[%s8625_s0 + $0x4a8] sm:$0xff] }
  0xb1   :  { %5805 = vmatprep.mubr.msk.f32.mxu0 %vm108_vm1, %v5765_v39  ;;  %5881 = vmatprep.mubr.msk.f32.mxu1 %vm108_vm1, %v5841_v18 }
  0xb4   :  { %1010 = vmatmul.mubr.f32.gmra.mxu0 %v5764_v40  ;;  %1351 = vmatmul.mubr.f32.gmra.mxu1 %v5840_v41 }
  0xb5   :  { %5806 = vmatprep.mubr.msk.f32.mxu0 %vm108_vm1, %v5767_v42  ;;  %5882 = vmatprep.mubr.msk.f32.mxu1 %vm108_vm1, %v5843_v19  ;;  %v5792_v42 = vld [vmem:[%s8625_s0 + $0x4a0] sm:$0xff]  ;;  %v5868_v19 = vld [vmem:[%s8625_s0 + $0x630] sm:$0xff] }
  0xb8   :  { %1015 = vmatmul.mubr.f32.gmra.mxu0 %v5766_v43  ;;  %1356 = vmatmul.mubr.f32.gmra.mxu1 %v5842_v44 }
  0xb9   :  { %5807 = vmatprep.mubr.msk.f32.mxu0 %vm108_vm1, %v5769_v45  ;;  %5883 = vmatprep.mubr.msk.f32.mxu1 %vm108_vm1, %v5845_v46 }
  0xbc   :  { %1020 = vmatmul.mubr.f32.gmra.mxu0 %v5768_v47  ;;  %1361 = vmatmul.mubr.f32.gmra.mxu1 %v5844_v48 }
  0xbd   :  { %5808 = vmatprep.mubr.msk.f32.mxu0 %vm108_vm1, %v5771_v49  ;;  %5884 = vmatprep.mubr.msk.f32.mxu1 %vm108_vm1, %v5847_v50 }
  0xc0   :  { %1025 = vmatmul.mubr.f32.gmra.mxu0 %v5770_v51  ;;  %1366 = vmatmul.mubr.f32.gmra.mxu1 %v5846_v52 }
  0xc1   :  { %5809 = vmatprep.mubr.msk.f32.mxu0 %vm108_vm1, %v5773_v53  ;;  %5885 = vmatprep.mubr.msk.f32.mxu1 %vm108_vm1, %v5849_v54 }
  0xc4   :  { %1030 = vmatmul.mubr.f32.gmra.mxu0 %v5772_v55  ;;  %1371 = vmatmul.mubr.f32.gmra.mxu1 %v5848_v56 }
  0xc5   :  { %5810 = vmatprep.mubr.msk.f32.mxu0 %vm108_vm1, %v5775_v57  ;;  %5886 = vmatprep.mubr.msk.f32.mxu1 %vm108_vm1, %v5851_v58 }
  0xc8   :  { %1035 = vmatmul.mubr.f32.gmra.mxu0 %v5774_v59  ;;  %1376 = vmatmul.mubr.f32.gmra.mxu1 %v5850_v60 }
  0xc9   :  { %5811 = vmatprep.mubr.msk.f32.mxu0 %vm108_vm1, %v5777_v61  ;;  %5887 = vmatprep.mubr.msk.f32.mxu1 %vm108_vm1, %v5853_v62 }
  0xcc   :  { %1040 = vmatmul.mubr.f32.gmra.mxu0 %v5776_v63  ;;  %1381 = vmatmul.mubr.f32.gmra.mxu1 %v5852_v1 }
  0xcd   :  { %5812 = vmatprep.mubr.msk.f32.mxu0 %vm108_vm1, %v5779_v2  ;;  %5888 = vmatprep.mubr.msk.f32.mxu1 %vm108_vm1, %v5855_v3 }
  0xd0   :  { %1045 = vmatmul.mubr.f32.gmra.mxu0 %v5778_v4  ;;  %1386 = vmatmul.mubr.f32.gmra.mxu1 %v5854_v5 }
  0xd1   :  { %5813 = vmatprep.mubr.msk.f32.mxu0 %vm108_vm1, %v5781_v6  ;;  %5889 = vmatprep.mubr.msk.f32.mxu1 %vm108_vm1, %v5857_v7 }
  0xd4   :  { %1050 = vmatmul.mubr.f32.gmra.mxu0 %v5780_v8  ;;  %1391 = vmatmul.mubr.f32.gmra.mxu1 %v5856_v9 }
  0xd5   :  { %5814 = vmatprep.mubr.msk.f32.mxu0 %vm108_vm1, %v5783_v10  ;;  %5890 = vmatprep.mubr.msk.f32.mxu1 %vm108_vm1, %v5859_v11 }
  0xd8   :  { %1055 = vmatmul.mubr.f32.gmra.mxu0 %v5782_v20  ;;  %1396 = vmatmul.mubr.f32.gmra.mxu1 %v5858_v21 }
  0xd9   :  { %5815 = vmatprep.mubr.msk.f32.mxu0 %vm108_vm1, %v5785_v12  ;;  %5891 = vmatprep.mubr.msk.f32.mxu1 %vm108_vm1, %v5861_v22 }
  0xdc   :  { %1060 = vmatmul.mubr.f32.gmra.mxu0 %v5784_v25  ;;  %1401 = vmatmul.mubr.f32.gmra.mxu1 %v5860_v26 }
  0xdd   :  { %5816 = vmatprep.mubr.msk.f32.mxu0 %vm108_vm1, %v5787_v27  ;;  %5892 = vmatprep.mubr.msk.f32.mxu1 %vm108_vm1, %v5863_v14 }
  0xe0   :  { %1065 = vmatmul.mubr.f32.gmra.mxu0 %v5786_v29  ;;  %1406 = vmatmul.mubr.f32.gmra.mxu1 %v5862_v30 }
  0xe1   :  { %5817 = vmatprep.mubr.msk.f32.mxu0 %vm108_vm1, %v5789_v15  ;;  %5893 = vmatprep.mubr.msk.f32.mxu1 %vm108_vm1, %v5865_v31 }
  0xe4   :  { %1070 = vmatmul.mubr.f32.gmra.mxu0 %v5788_v32  ;;  %1411 = vmatmul.mubr.f32.gmra.mxu1 %v5864_v33 }
  0xe5   :  { %5818 = vmatprep.mubr.msk.f32.mxu0 %vm108_vm1, %v5791_v16  ;;  %5894 = vmatprep.mubr.msk.f32.mxu1 %vm108_vm1, %v5867_v34 }
  0xe8   :  { %v254_v39 = vpop.f32.mrf.mxu0  ;;  %v595_v18 = vpop.f32.mrf.mxu1  ;;  %1075 = vmatmul.mubr.f32.gmra.mxu0 %v5790_v35  ;;  %1416 = vmatmul.mubr.f32.gmra.mxu1 %v5866_v36 }
  0xe9   :  { %v255_v40 = vadd.f32 %v7463_v17, %v254_v39  ;;  %v596_v41 = vadd.f32 %v7463_v17, %v595_v18  ;;  %5819 = vmatprep.mubr.msk.f32.mxu0 %vm108_vm1, %v5793_v37  ;;  %5895 = vmatprep.mubr.msk.f32.mxu1 %vm108_vm1, %v5869_v38 }
  0xea   :  { %v256_v43 = vpop.f32.mrf.mxu0  ;;  %v597_v44 = vpop.f32.mrf.mxu1 }
  0xeb   :  { %v378_v45 = vmax.f32 %v255_v40, 0.0  ;;  %v719_v46 = vmax.f32 %v596_v41, 0.0 }
  0xec   :  { %v259_v47 = vpop.f32.mrf.mxu0  ;;  %v600_v48 = vpop.f32.mrf.mxu1  ;;  %1080 = vmatmul.mubr.f32.gmra.mxu0 %v5792_v42  ;;  %1421 = vmatmul.mubr.f32.gmra.mxu1 %v5868_v19 }
  0xed   :  { %v7481_v49 = vmax.f32 %v378_v45, %v719_v46  ;;  %v260_v50 = vadd.f32 %v7463_v17, %v259_v47  ;;  %v601_v51 = vadd.f32 %v7463_v17, %v600_v48  ;;  %1582 = vmatprep.mubr.f32.mxu0 %v8634_v0  ;;  %6229 = vmatprep.mubr.msk.f32.mxu1 %vm6448_vm2, %v8634_v0 }
  0xee   :  { %v261_v52 = vpop.f32.mrf.mxu0  ;;  %v602_v53 = vpop.f32.mrf.mxu1 }
  0xef   :  { %v379_v54 = vmax.f32 %v260_v50, 0.0  ;;  %v720_v55 = vmax.f32 %v601_v51, 0.0 }
  0xf0   :  { %v264_v56 = vpop.f32.mrf.mxu0  ;;  %v605_v57 = vpop.f32.mrf.mxu1 }
  0xf1   :  { %v7488_v58 = vmax.f32 %v379_v54, %v720_v55  ;;  %v265_v59 = vadd.f32 %v7463_v17, %v264_v56  ;;  %v606_v60 = vadd.f32 %v7463_v17, %v605_v57 }
  0xf2   :  { %v266_v61 = vpop.f32.mrf.mxu0  ;;  %v607_v62 = vpop.f32.mrf.mxu1 }
  0xf3   :  { %v380_v63 = vmax.f32 %v265_v59, 0.0  ;;  %v721_v1 = vmax.f32 %v606_v60, 0.0 }
  0xf4   :  { %v269_v2 = vpop.f32.mrf.mxu0  ;;  %v610_v3 = vpop.f32.mrf.mxu1 }
  0xf5   :  { %v7492_v4 = vmax.f32 %v380_v63, %v721_v1  ;;  %v270_v5 = vadd.f32 %v7463_v17, %v269_v2  ;;  %v611_v6 = vadd.f32 %v7463_v17, %v610_v3 }
  0xf6   :  { %v271_v7 = vpop.f32.mrf.mxu0  ;;  %v612_v8 = vpop.f32.mrf.mxu1 }
  0xf7   :  { %v381_v9 = vmax.f32 %v270_v5, 0.0  ;;  %v722_v10 = vmax.f32 %v611_v6, 0.0 }
  0xf8   :  { %v274_v11 = vpop.f32.mrf.mxu0  ;;  %v615_v20 = vpop.f32.mrf.mxu1 }
  0xf9   :  { %v7496_v21 = vmax.f32 %v381_v9, %v722_v10  ;;  %v275_v12 = vadd.f32 %v7463_v17, %v274_v11  ;;  %v616_v22 = vadd.f32 %v7463_v17, %v615_v20 }
  0xfa   :  { %v276_v23 = vpop.f32.mrf.mxu0  ;;  %v617_v24 = vpop.f32.mrf.mxu1 }
  0xfb   :  { %v382_v13 = vmax.f32 %v275_v12, 0.0  ;;  %v723_v25 = vmax.f32 %v616_v22, 0.0 }
  0xfc   :  { %v279_v26 = vpop.f32.mrf.mxu0  ;;  %v620_v27 = vpop.f32.mrf.mxu1 }
  0xfd   :  { %v7500_v14 = vmax.f32 %v382_v13, %v723_v25  ;;  %v280_v28 = vadd.f32 %v7463_v17, %v279_v26  ;;  %v621_v29 = vadd.f32 %v7463_v17, %v620_v27 }
  0xfe   :  { %v281_v30 = vpop.f32.mrf.mxu0  ;;  %v622_v15 = vpop.f32.mrf.mxu1 }
  0xff   :  { %v383_v31 = vmax.f32 %v280_v28, 0.0  ;;  %v724_v32 = vmax.f32 %v621_v29, 0.0 }
 0x100   :  { %v284_v33 = vpop.f32.mrf.mxu0  ;;  %v625_v16 = vpop.f32.mrf.mxu1 }
 0x101   :  { %v7504_v34 = vmax.f32 %v383_v31, %v724_v32  ;;  %v285_v35 = vadd.f32 %v7463_v17, %v284_v33  ;;  %v626_v36 = vadd.f32 %v7463_v17, %v625_v16 }
 0x102   :  { %v286_v37 = vpop.f32.mrf.mxu0  ;;  %v627_v38 = vpop.f32.mrf.mxu1 }
 0x103   :  { %v384_v39 = vmax.f32 %v285_v35, 0.0  ;;  %v725_v18 = vmax.f32 %v626_v36, 0.0 }
 0x104   :  { %v289_v40 = vpop.f32.mrf.mxu0  ;;  %v630_v41 = vpop.f32.mrf.mxu1 }
 0x105   :  { %v7508_v42 = vmax.f32 %v384_v39, %v725_v18  ;;  %v290_v19 = vadd.f32 %v7463_v17, %v289_v40  ;;  %v631_v43 = vadd.f32 %v7463_v17, %v630_v41 }
 0x106   :  { %v291_v44 = vpop.f32.mrf.mxu0  ;;  %v632_v45 = vpop.f32.mrf.mxu1 }
 0x107   :  { %v385_v46 = vmax.f32 %v290_v19, 0.0  ;;  %v726_v47 = vmax.f32 %v631_v43, 0.0 }
 0x108   :  { %v294_v48 = vpop.f32.mrf.mxu0  ;;  %v635_v50 = vpop.f32.mrf.mxu1 }
 0x109   :  { %v7512_v51 = vmax.f32 %v385_v46, %v726_v47  ;;  %v295_v52 = vadd.f32 %v7463_v17, %v294_v48  ;;  %v636_v53 = vadd.f32 %v7463_v17, %v635_v50 }
 0x10a   :  { %v296_v54 = vpop.f32.mrf.mxu0  ;;  %v637_v55 = vpop.f32.mrf.mxu1 }
 0x10b   :  { %v386_v56 = vmax.f32 %v295_v52, 0.0  ;;  %v727_v57 = vmax.f32 %v636_v53, 0.0 }
 0x10c   :  { %v299_v59 = vpop.f32.mrf.mxu0  ;;  %v640_v60 = vpop.f32.mrf.mxu1 }
 0x10d   :  { %v7516_v61 = vmax.f32 %v386_v56, %v727_v57  ;;  %v300_v62 = vadd.f32 %v7463_v17, %v299_v59  ;;  %v641_v63 = vadd.f32 %v7463_v17, %v640_v60 }
 0x10e   :  { %v301_v1 = vpop.f32.mrf.mxu0  ;;  %v642_v2 = vpop.f32.mrf.mxu1 }
 0x10f   :  { %v387_v3 = vmax.f32 %v300_v62, 0.0  ;;  %v728_v5 = vmax.f32 %v641_v63, 0.0 }
 0x110   :  { %v304_v6 = vpop.f32.mrf.mxu0  ;;  %v645_v7 = vpop.f32.mrf.mxu1 }
 0x111   :  { %v7520_v8 = vmax.f32 %v387_v3, %v728_v5  ;;  %v305_v9 = vadd.f32 %v7463_v17, %v304_v6  ;;  %v646_v10 = vadd.f32 %v7463_v17, %v645_v7 }
 0x112   :  { %v306_v11 = vpop.f32.mrf.mxu0  ;;  %v647_v20 = vpop.f32.mrf.mxu1 }
 0x113   :  { %v388_v12 = vmax.f32 %v305_v9, 0.0  ;;  %v729_v22 = vmax.f32 %v646_v10, 0.0 }
 0x114   :  { %v309_v23 = vpop.f32.mrf.mxu0  ;;  %v650_v24 = vpop.f32.mrf.mxu1 }
 0x115   :  { %v7524_v13 = vmax.f32 %v388_v12, %v729_v22  ;;  %v310_v25 = vadd.f32 %v7463_v17, %v309_v23  ;;  %v651_v26 = vadd.f32 %v7463_v17, %v650_v24 }
 0x116   :  { %v311_v27 = vpop.f32.mrf.mxu0  ;;  %v652_v28 = vpop.f32.mrf.mxu1 }
 0x117   :  { %v389_v29 = vmax.f32 %v310_v25, 0.0  ;;  %v730_v30 = vmax.f32 %v651_v26, 0.0 }
 0x118   :  { %v314_v15 = vpop.f32.mrf.mxu0  ;;  %v655_v31 = vpop.f32.mrf.mxu1 }
 0x119   :  { %v7528_v32 = vmax.f32 %v389_v29, %v730_v30  ;;  %v315_v33 = vadd.f32 %v7463_v17, %v314_v15  ;;  %v656_v16 = vadd.f32 %v7463_v17, %v655_v31 }
 0x11a   :  { %v316_v35 = vpop.f32.mrf.mxu0  ;;  %v657_v36 = vpop.f32.mrf.mxu1 }
 0x11b   :  { %v390_v37 = vmax.f32 %v315_v33, 0.0  ;;  %v731_v38 = vmax.f32 %v656_v16, 0.0 }
 0x11c   :  { %v319_v39 = vpop.f32.mrf.mxu0  ;;  %v660_v18 = vpop.f32.mrf.mxu1 }
 0x11d   :  { %v7532_v40 = vmax.f32 %v390_v37, %v731_v38  ;;  %v320_v41 = vadd.f32 %v7463_v17, %v319_v39  ;;  %v661_v19 = vadd.f32 %v7463_v17, %v660_v18 }
 0x11e   :  { %v321_v43 = vpop.f32.mrf.mxu0  ;;  %v662_v44 = vpop.f32.mrf.mxu1 }
 0x11f   :  { %v391_v45 = vmax.f32 %v320_v41, 0.0  ;;  %v732_v46 = vmax.f32 %v661_v19, 0.0 }
 0x120   :  { %v324_v47 = vpop.f32.mrf.mxu0  ;;  %v665_v48 = vpop.f32.mrf.mxu1 }
 0x121   :  { %v7536_v50 = vmax.f32 %v391_v45, %v732_v46  ;;  %v325_v52 = vadd.f32 %v7463_v17, %v324_v47  ;;  %v666_v53 = vadd.f32 %v7463_v17, %v665_v48 }
 0x122   :  { %v326_v54 = vpop.f32.mrf.mxu0  ;;  %v667_v55 = vpop.f32.mrf.mxu1 }
 0x123   :  { %v392_v56 = vmax.f32 %v325_v52, 0.0  ;;  %v733_v57 = vmax.f32 %v666_v53, 0.0 }
 0x124   :  { %v329_v59 = vpop.f32.mrf.mxu0  ;;  %v670_v60 = vpop.f32.mrf.mxu1 }
 0x125   :  { %v7540_v62 = vmax.f32 %v392_v56, %v733_v57  ;;  %v330_v63 = vadd.f32 %v7463_v17, %v329_v59  ;;  %v671_v1 = vadd.f32 %v7463_v17, %v670_v60 }
 0x126   :  { %v331_v2 = vpop.f32.mrf.mxu0  ;;  %v672_v3 = vpop.f32.mrf.mxu1 }
 0x127   :  { %v393_v5 = vmax.f32 %v330_v63, 0.0  ;;  %v734_v6 = vmax.f32 %v671_v1, 0.0 }
 0x128   :  { %v334_v7 = vpop.f32.mrf.mxu0  ;;  %v675_v9 = vpop.f32.mrf.mxu1 }
 0x129   :  { %v7544_v10 = vmax.f32 %v393_v5, %v734_v6  ;;  %v335_v11 = vadd.f32 %v7463_v17, %v334_v7  ;;  %v676_v20 = vadd.f32 %v7463_v17, %v675_v9 }
 0x12a   :  { %v336_v12 = vpop.f32.mrf.mxu0  ;;  %v677_v22 = vpop.f32.mrf.mxu1 }
 0x12b   :  { %v394_v23 = vmax.f32 %v335_v11, 0.0  ;;  %v735_v24 = vmax.f32 %v676_v20, 0.0 }
 0x12c   :  { %v339_v25 = vpop.f32.mrf.mxu0  ;;  %v680_v26 = vpop.f32.mrf.mxu1 }
 0x12d   :  { %v7548_v27 = vmax.f32 %v394_v23, %v735_v24  ;;  %v340_v28 = vadd.f32 %v7463_v17, %v339_v25  ;;  %v681_v29 = vadd.f32 %v7463_v17, %v680_v26 }
 0x12e   :  { %v341_v30 = vpop.f32.mrf.mxu0  ;;  %v682_v15 = vpop.f32.mrf.mxu1 }
 0x12f   :  { %v395_v31 = vmax.f32 %v340_v28, 0.0  ;;  %v736_v33 = vmax.f32 %v681_v29, 0.0 }
 0x130   :  { %v344_v16 = vpop.f32.mrf.mxu0  ;;  %v685_v35 = vpop.f32.mrf.mxu1 }
 0x131   :  { %v7552_v36 = vmax.f32 %v395_v31, %v736_v33  ;;  %v345_v37 = vadd.f32 %v7463_v17, %v344_v16  ;;  %v686_v38 = vadd.f32 %v7463_v17, %v685_v35 }
 0x132   :  { %v346_v39 = vpop.f32.mrf.mxu0  ;;  %v687_v18 = vpop.f32.mrf.mxu1 }
 0x133   :  { %v396_v41 = vmax.f32 %v345_v37, 0.0  ;;  %v737_v19 = vmax.f32 %v686_v38, 0.0 }
 0x134   :  { %v349_v43 = vpop.f32.mrf.mxu0  ;;  %v690_v44 = vpop.f32.mrf.mxu1 }
 0x135   :  { %v7556_v45 = vmax.f32 %v396_v41, %v737_v19  ;;  %v350_v46 = vadd.f32 %v7463_v17, %v349_v43  ;;  %v691_v47 = vadd.f32 %v7463_v17, %v690_v44 }
 0x136   :  { %v351_v48 = vpop.f32.mrf.mxu0  ;;  %v692_v52 = vpop.f32.mrf.mxu1 }
 0x137   :  { %v397_v53 = vmax.f32 %v350_v46, 0.0  ;;  %v738_v54 = vmax.f32 %v691_v47, 0.0 }
 0x138   :  { %v354_v55 = vpop.f32.mrf.mxu0  ;;  %v695_v56 = vpop.f32.mrf.mxu1 }
 0x139   :  { %v7560_v57 = vmax.f32 %v397_v53, %v738_v54  ;;  %v355_v59 = vadd.f32 %v7463_v17, %v354_v55  ;;  %v696_v60 = vadd.f32 %v7463_v17, %v695_v56 }
 0x13a   :  { %v356_v63 = vpop.f32.mrf.mxu0  ;;  %v697_v1 = vpop.f32.mrf.mxu1 }
 0x13b   :  { %v398_v2 = vmax.f32 %v355_v59, 0.0  ;;  %v739_v3 = vmax.f32 %v696_v60, 0.0 }
 0x13c   :  { %v359_v5 = vpop.f32.mrf.mxu0  ;;  %v700_v6 = vpop.f32.mrf.mxu1 }
 0x13d   :  { %v7564_v7 = vmax.f32 %v398_v2, %v739_v3  ;;  %v360_v9 = vadd.f32 %v7463_v17, %v359_v5  ;;  %v701_v11 = vadd.f32 %v7463_v17, %v700_v6 }
 0x13e   :  { %v361_v20 = vpop.f32.mrf.mxu0  ;;  %v702_v12 = vpop.f32.mrf.mxu1 }
 0x13f   :  { %v399_v22 = vmax.f32 %v360_v9, 0.0  ;;  %v740_v23 = vmax.f32 %v701_v11, 0.0 }
 0x140   :  { %v364_v24 = vpop.f32.mrf.mxu0  ;;  %v705_v25 = vpop.f32.mrf.mxu1 }
 0x141   :  { %v7568_v26 = vmax.f32 %v399_v22, %v740_v23  ;;  %v365_v28 = vadd.f32 %v7463_v17, %v364_v24  ;;  %v706_v29 = vadd.f32 %v7463_v17, %v705_v25 }
 0x142   :  { %v366_v30 = vpop.f32.mrf.mxu0  ;;  %v707_v15 = vpop.f32.mrf.mxu1 }
 0x143   :  { %v400_v31 = vmax.f32 %v365_v28, 0.0  ;;  %v741_v33 = vmax.f32 %v706_v29, 0.0 }
 0x144   :  { %v369_v16 = vpop.f32.mrf.mxu0  ;;  %v710_v35 = vpop.f32.mrf.mxu1 }
 0x145   :  { %v7572_v37 = vmax.f32 %v400_v31, %v741_v33  ;;  %v370_v38 = vadd.f32 %v7463_v17, %v369_v16  ;;  %v711_v39 = vadd.f32 %v7463_v17, %v710_v35 }
 0x146   :  { %v371_v18 = vpop.f32.mrf.mxu0  ;;  %v712_v41 = vpop.f32.mrf.mxu1 }
 0x147   :  { %v401_v19 = vmax.f32 %v370_v38, 0.0  ;;  %v742_v43 = vmax.f32 %v711_v39, 0.0 }
 0x148   :  { %v374_v44 = vpop.f32.mrf.mxu0  ;;  %v715_v46 = vpop.f32.mrf.mxu1 }
 0x149   :  { %v7576_v47 = vmax.f32 %v401_v19, %v742_v43  ;;  %v375_v48 = vadd.f32 %v7463_v17, %v374_v44  ;;  %v716_v52 = vadd.f32 %v7463_v17, %v715_v46  ;;  %v5915_v43 = vld [vmem:[%s8626_s3 + $0xb8] sm:$0xff] }
 0x14a   :  { %v376_v53 = vpop.f32.mrf.mxu0  ;;  %v717_v54 = vpop.f32.mrf.mxu1 }
 0x14b   :  { %v402_v55 = vmax.f32 %v375_v48, 0.0  ;;  %v743_v56 = vmax.f32 %v716_v52, 0.0  ;;  %v5911_v48 = vld [vmem:[%s8626_s3 + $0x98] sm:$0xff]  ;;  %v5910_v54 = vld [vmem:[%s8626_s3 + $0x90] sm:$0xff] }
 0x14c   :  { %v961_v59 = vpop.f32.mrf.mxu0  ;;  %v1302_v60 = vpop.f32.mrf.mxu1 }
 0x14d   :  { %v7580_v63 = vmax.f32 %v402_v55, %v743_v56  ;;  %v962_v1 = vadd.f32 %v7463_v17, %v961_v59  ;;  %v1303_v2 = vadd.f32 %v7463_v17, %v1302_v60  ;;  %v5912_v59 = vld [vmem:[%s8626_s3 + $0xa0] sm:$0xff] }
 0x14e   :  { %v963_v3 = vpop.f32.mrf.mxu0  ;;  %v1304_v5 = vpop.f32.mrf.mxu1 }
 0x14f   :  { %v1085_v6 = vmax.f32 %v962_v1, 0.0  ;;  %v1426_v9 = vmax.f32 %v1303_v2, 0.0  ;;  %v5928_v3 = vld [vmem:[%s8626_s3 + $0x110] sm:$0xff] }
 0x150   :  { %v966_v11 = vpop.f32.mrf.mxu0  ;;  %v1307_v20 = vpop.f32.mrf.mxu1 }
 0x151   :  { %v1451_v12 = vmax.f32 %v1085_v6, %v1426_v9  ;;  %v967_v22 = vadd.f32 %v7463_v17, %v966_v11  ;;  %v1308_v23 = vadd.f32 %v7463_v17, %v1307_v20 }
 0x152   :  { %v968_v24 = vpop.f32.mrf.mxu0  ;;  %v1309_v25 = vpop.f32.mrf.mxu1 }
 0x153   :  { %v7587_v28 = vmax.f32 %v7481_v49, %v1451_v12  ;;  %v1086_v29 = vmax.f32 %v967_v22, 0.0  ;;  %v1427_v30 = vmax.f32 %v1308_v23, 0.0  ;;  %v5913_v49 = vld [vmem:[%s8626_s3 + $0xa8] sm:$0xff] }
 0x154   :  { %v971_v15 = vpop.f32.mrf.mxu0  ;;  %v1312_v31 = vpop.f32.mrf.mxu1  ;;  %v5927_v25 = vld [vmem:[%s8626_s3 + $0x108] sm:$0xff] }
 0x155   :  { %v1452_v33 = vmax.f32 %v1086_v29, %v1427_v30  ;;  %v972_v16 = vadd.f32 %v7463_v17, %v971_v15  ;;  %v1313_v35 = vadd.f32 %v7463_v17, %v1312_v31  ;;  %v5929_v29 = vld [vmem:[%s8626_s3 + $0x118] sm:$0xff] }
 0x156   :  { %v973_v38 = vpop.f32.mrf.mxu0  ;;  %v1314_v39 = vpop.f32.mrf.mxu1  ;;  %v5925_v31 = vld [vmem:[%s8626_s3 + $0xf8] sm:$0xff] }
 0x157   :  { %v1477_v18 = vmax.f32 %v7488_v58, %v1452_v33  ;;  %v1087_v41 = vmax.f32 %v972_v16, 0.0  ;;  %v1428_v19 = vmax.f32 %v1313_v35, 0.0  ;;  %v5924_v35 = vld [vmem:[%s8626_s3 + $0xf0] sm:$0xff] }
 0x158   :  { %v976_v44 = vpop.f32.mrf.mxu0  ;;  %v1317_v46 = vpop.f32.mrf.mxu1 }
 0x159   :  { %v1453_v52 = vmax.f32 %v1087_v41, %v1428_v19  ;;  %v977_v53 = vadd.f32 %v7463_v17, %v976_v44  ;;  %v1318_v58 = vadd.f32 %v7463_v17, %v1317_v46  ;;  %5902 = vmatmul.mubr.msk.f32.vlgmr.msra.gmra.mxu0 %vm1514_vm3, %v1477_v18  ;;  %6230 = vmatmul.mubr.msk.f32.vlgmr.msra.gmra.mxu1 %vm1514_vm3, %v1477_v18  ;;  %v5926_v18 = vld [vmem:[%s8626_s3 + $0x100] sm:$0xff] }
 0x15a   :  { %v978_v55 = vpop.f32.mrf.mxu0  ;;  %v1319_v56 = vpop.f32.mrf.mxu1  ;;  %1705 = vmatpush1.msra.mxu0 %v5913_v49  ;;  %6233 = vmatpush3.msra.mxu1 %v5915_v43  ;;  %v5942_v43 = vld [vmem:[%s8626_s3 + $0x170] sm:$0xff] }
 0x15b   :  { %v7612_v60 = vmax.f32 %v7492_v4, %v1453_v52  ;;  %v1088_v1 = vmax.f32 %v977_v53, 0.0  ;;  %v1429_v2 = vmax.f32 %v1318_v58, 0.0  ;;  %1706 = vmatprep.subr.mxu0 %v5911_v48  ;;  %6234 = vmatprep.subr.mxu1 %v8634_v0 }
 0x15c   :  { %v981_v5 = vpop.f32.mrf.mxu0  ;;  %v1322_v6 = vpop.f32.mrf.mxu1  ;;  %1707 = vmatpush1.msra.mxu0 %v5910_v54  ;;  %1740 = vmatprep.mubr.f32.mxu0 %v8634_v0 }
 0x15d   :  { %v1454_v9 = vmax.f32 %v1088_v1, %v1429_v2  ;;  %v982_v11 = vadd.f32 %v7463_v17, %v981_v5  ;;  %v1323_v4 = vadd.f32 %v7463_v17, %v1322_v6  ;;  %6235 = vmatpush3.msra.mxu1 %v5912_v59  ;;  %6236 = vmatprep.mubr.msk.f32.mxu1 %vm6448_vm2, %v8634_v0  ;;  %v5941_v59 = vld [vmem:[%s8626_s3 + $0x168] sm:$0xff]  ;;  %v5943_v1 = vld [vmem:[%s8626_s3 + $0x178] sm:$0xff] }
 0x15e   :  { %v983_v20 = vpop.f32.mrf.mxu0  ;;  %v1324_v12 = vpop.f32.mrf.mxu1  ;;  %1862 = vmatprep.subr.mxu0 %v5928_v3  ;;  %6239 = vmatprep.subr.mxu1 %v8634_v0  ;;  %v5939_v5 = vld [vmem:[%s8626_s3 + $0x158] sm:$0xff] }
 0x15f   :  { %v1479_v22 = vmax.f32 %v7496_v21, %v1454_v9  ;;  %v1089_v23 = vmax.f32 %v982_v11, 0.0  ;;  %v1430_v24 = vmax.f32 %v1323_v4, 0.0  ;;  %v5938_v11 = vld [vmem:[%s8626_s3 + $0x150] sm:$0xff]  ;;  %v5940_v12 = vld [vmem:[%s8626_s3 + $0x160] sm:$0xff] }
 0x160   :  { %v986_v30 = vpop.f32.mrf.mxu0  ;;  %v1327_v15 = vpop.f32.mrf.mxu1 }
 0x161   :  { %v1455_v33 = vmax.f32 %v1089_v23, %v1430_v24  ;;  %v987_v16 = vadd.f32 %v7463_v17, %v986_v30  ;;  %v1328_v21 = vadd.f32 %v7463_v17, %v1327_v15  ;;  %5916 = vmatmul.mubr.msk.f32.vlgmr.msra.gmra.mxu0 %vm1514_vm3, %v1479_v22  ;;  %6237 = vmatmul.mubr.msk.f32.vlgmr.msra.gmra.mxu1 %vm1514_vm3, %v1479_v22 }
 0x162   :  { %v988_v38 = vpop.f32.mrf.mxu0  ;;  %v1329_v39 = vpop.f32.mrf.mxu1  ;;  %1863 = vmatpush1.msra.mxu0 %v5927_v25  ;;  %6240 = vmatpush3.msra.mxu1 %v5929_v29  ;;  %v5956_v25 = vld [vmem:[%s8626_s3 + $0x1d0] sm:$0xff] }
 0x163   :  { %v7645_v41 = vmax.f32 %v7500_v14, %v1455_v33  ;;  %v1090_v19 = vmax.f32 %v987_v16, 0.0  ;;  %v1431_v49 = vmax.f32 %v1328_v21, 0.0  ;;  %1864 = vmatprep.subr.mxu0 %v5925_v31  ;;  %6241 = vmatprep.subr.mxu1 %v8634_v0  ;;  %v5955_v39 = vld [vmem:[%s8626_s3 + $0x1c8] sm:$0xff] }
 0x164   :  { %v991_v44 = vpop.f32.mrf.mxu0  ;;  %v1332_v46 = vpop.f32.mrf.mxu1  ;;  %1865 = vmatpush1.msra.mxu0 %v5924_v35  ;;  %1898 = vmatprep.mubr.f32.mxu0 %v8634_v0 }
 0x165   :  { %v1456_v48 = vmax.f32 %v1090_v19, %v1431_v49  ;;  %v992_v52 = vadd.f32 %v7463_v17, %v991_v44  ;;  %v1333_v14 = vadd.f32 %v7463_v17, %v1332_v46  ;;  %6242 = vmatpush3.msra.mxu1 %v5926_v18  ;;  %6243 = vmatprep.mubr.msk.f32.mxu1 %vm6448_vm2, %v8634_v0  ;;  %v5957_v18 = vld [vmem:[%s8626_s3 + $0x1d8] sm:$0xff] }
 0x166   :  { %v993_v53 = vpop.f32.mrf.mxu0  ;;  %v1334_v58 = vpop.f32.mrf.mxu1  ;;  %2020 = vmatprep.subr.mxu0 %v5942_v43  ;;  %6246 = vmatprep.subr.mxu1 %v8634_v0  ;;  %v5953_v43 = vld [vmem:[%s8626_s3 + $0x1b8] sm:$0xff] }
 0x167   :  { %v1481_v54 = vmax.f32 %v7504_v34, %v1456_v48  ;;  %v1091_v55 = vmax.f32 %v992_v52, 0.0  ;;  %v1432_v56 = vmax.f32 %v1333_v14, 0.0  ;;  %v5952_v48 = vld [vmem:[%s8626_s3 + $0x1b0] sm:$0xff]  ;;  %v5954_v53 = vld [vmem:[%s8626_s3 + $0x1c0] sm:$0xff] }
 0x168   :  { %v996_v2 = vpop.f32.mrf.mxu0  ;;  %v1337_v3 = vpop.f32.mrf.mxu1 }
 0x169   :  { %v1457_v6 = vmax.f32 %v1091_v55, %v1432_v56  ;;  %v997_v9 = vadd.f32 %v7463_v17, %v996_v2  ;;  %v1338_v34 = vadd.f32 %v7463_v17, %v1337_v3  ;;  %5930 = vmatmul.mubr.msk.f32.vlgmr.msra.gmra.mxu0 %vm1514_vm3, %v1481_v54  ;;  %6244 = vmatmul.mubr.msk.f32.vlgmr.msra.gmra.mxu1 %vm1514_vm3, %v1481_v54  ;;  %v5970_v56 = vld [vmem:[%s8626_s3 + $0x230] sm:$0xff] }
 0x16a   :  { %v998_v4 = vpop.f32.mrf.mxu0  ;;  %v1339_v20 = vpop.f32.mrf.mxu1  ;;  %2021 = vmatpush1.msra.mxu0 %v5941_v59  ;;  %6247 = vmatpush3.msra.mxu1 %v5943_v1 }
 0x16b   :  { %v7678_v22 = vmax.f32 %v7508_v42, %v1457_v6  ;;  %v1092_v23 = vmax.f32 %v997_v9, 0.0  ;;  %v1433_v24 = vmax.f32 %v1338_v34, 0.0  ;;  %2022 = vmatprep.subr.mxu0 %v5939_v5  ;;  %6248 = vmatprep.subr.mxu1 %v8634_v0  ;;  %v5969_v4 = vld [vmem:[%s8626_s3 + $0x228] sm:$0xff]  ;;  %v5971_v20 = vld [vmem:[%s8626_s3 + $0x238] sm:$0xff] }
 0x16c   :  { %v1001_v29 = vpop.f32.mrf.mxu0  ;;  %v1342_v30 = vpop.f32.mrf.mxu1  ;;  %2023 = vmatpush1.msra.mxu0 %v5938_v11  ;;  %2056 = vmatprep.mubr.f32.mxu0 %v8634_v0 }
 0x16d   :  { %v1458_v15 = vmax.f32 %v1092_v23, %v1433_v24  ;;  %v1002_v31 = vadd.f32 %v7463_v17, %v1001_v29  ;;  %v1343_v42 = vadd.f32 %v7463_v17, %v1342_v30  ;;  %6249 = vmatpush3.msra.mxu1 %v5940_v12  ;;  %6250 = vmatprep.mubr.msk.f32.mxu1 %vm6448_vm2, %v8634_v0  ;;  %v5967_v24 = vld [vmem:[%s8626_s3 + $0x218] sm:$0xff]  ;;  %v5966_v30 = vld [vmem:[%s8626_s3 + $0x210] sm:$0xff] }
 0x16e   :  { %v1003_v33 = vpop.f32.mrf.mxu0  ;;  %v1344_v16 = vpop.f32.mrf.mxu1  ;;  %2178 = vmatprep.subr.mxu0 %v5956_v25  ;;  %6253 = vmatprep.subr.mxu1 %v8634_v0 }
 0x16f   :  { %v1483_v21 = vmax.f32 %v7512_v51, %v1458_v15  ;;  %v1093_v35 = vmax.f32 %v1002_v31, 0.0  ;;  %v1434_v38 = vmax.f32 %v1343_v42, 0.0  ;;  %v5968_v42 = vld [vmem:[%s8626_s3 + $0x220] sm:$0xff] }
 0x170   :  { %v1006_v19 = vpop.f32.mrf.mxu0  ;;  %v1347_v49 = vpop.f32.mrf.mxu1 }
 0x171   :  { %v1459_v44 = vmax.f32 %v1093_v35, %v1434_v38  ;;  %v1007_v46 = vadd.f32 %v7463_v17, %v1006_v19  ;;  %v1348_v51 = vadd.f32 %v7463_v17, %v1347_v49  ;;  %5944 = vmatmul.mubr.msk.f32.vlgmr.msra.gmra.mxu0 %vm1514_vm3, %v1483_v21  ;;  %6251 = vmatmul.mubr.msk.f32.vlgmr.msra.gmra.mxu1 %vm1514_vm3, %v1483_v21  ;;  %v5984_v35 = vld [vmem:[%s8626_s3 + $0x290] sm:$0xff] }
 0x172   :  { %v1008_v52 = vpop.f32.mrf.mxu0  ;;  %v1349_v14 = vpop.f32.mrf.mxu1  ;;  %2179 = vmatpush1.msra.mxu0 %v5955_v39  ;;  %6254 = vmatpush3.msra.mxu1 %v5957_v18 }
 0x173   :  { %v7711_v58 = vmax.f32 %v7516_v61, %v1459_v44  ;;  %v1094_v54 = vmax.f32 %v1007_v46, 0.0  ;;  %v1435_v55 = vmax.f32 %v1348_v51, 0.0  ;;  %2180 = vmatprep.subr.mxu0 %v5953_v43  ;;  %6255 = vmatprep.subr.mxu1 %v8634_v0  ;;  %v5985_v52 = vld [vmem:[%s8626_s3 + $0x298] sm:$0xff] }
 0x174   :  { %v1011_v59 = vpop.f32.mrf.mxu0  ;;  %v1352_v1 = vpop.f32.mrf.mxu1  ;;  %2181 = vmatpush1.msra.mxu0 %v5952_v48  ;;  %2214 = vmatprep.mubr.f32.mxu0 %v8634_v0  ;;  %v5983_v48 = vld [vmem:[%s8626_s3 + $0x288] sm:$0xff] }
 0x175   :  { %v1460_v2 = vmax.f32 %v1094_v54, %v1435_v55  ;;  %v1012_v3 = vadd.f32 %v7463_v17, %v1011_v59  ;;  %v1353_v61 = vadd.f32 %v7463_v17, %v1352_v1  ;;  %6256 = vmatpush3.msra.mxu1 %v5954_v53  ;;  %6257 = vmatprep.mubr.msk.f32.mxu1 %vm6448_vm2, %v8634_v0  ;;  %v5981_v54 = vld [vmem:[%s8626_s3 + $0x278] sm:$0xff]  ;;  %v5980_v59 = vld [vmem:[%s8626_s3 + $0x270] sm:$0xff] }
 0x176   :  { %v1013_v5 = vpop.f32.mrf.mxu0  ;;  %v1354_v6 = vpop.f32.mrf.mxu1  ;;  %2336 = vmatprep.subr.mxu0 %v5970_v56  ;;  %6260 = vmatprep.subr.mxu1 %v8634_v0 }
 0x177   :  { %v1485_v9 = vmax.f32 %v7520_v8, %v1460_v2  ;;  %v1095_v34 = vmax.f32 %v1012_v3, 0.0  ;;  %v1436_v11 = vmax.f32 %v1353_v61, 0.0  ;;  %v5982_v3 = vld [vmem:[%s8626_s3 + $0x280] sm:$0xff] }
 0x178   :  { %v1016_v12 = vpop.f32.mrf.mxu0  ;;  %v1357_v23 = vpop.f32.mrf.mxu1 }
 0x179   :  { %v1461_v25 = vmax.f32 %v1095_v34, %v1436_v11  ;;  %v1017_v29 = vadd.f32 %v7463_v17, %v1016_v12  ;;  %v1358_v8 = vadd.f32 %v7463_v17, %v1357_v23  ;;  %5958 = vmatmul.mubr.msk.f32.vlgmr.msra.gmra.mxu0 %vm1514_vm3, %v1485_v9  ;;  %6258 = vmatmul.mubr.msk.f32.vlgmr.msra.gmra.mxu1 %vm1514_vm3, %v1485_v9  ;;  %v5998_v9 = vld [vmem:[%s8626_s3 + $0x2f0] sm:$0xff] }
 0x17a   :  { %v1018_v15 = vpop.f32.mrf.mxu0  ;;  %v1359_v31 = vpop.f32.mrf.mxu1  ;;  %2337 = vmatpush1.msra.mxu0 %v5969_v4  ;;  %6261 = vmatpush3.msra.mxu1 %v5971_v20 }
 0x17b   :  { %v7744_v33 = vmax.f32 %v7524_v13, %v1461_v25  ;;  %v1096_v16 = vmax.f32 %v1017_v29, 0.0  ;;  %v1437_v21 = vmax.f32 %v1358_v8, 0.0  ;;  %2338 = vmatprep.subr.mxu0 %v5967_v24  ;;  %6262 = vmatprep.subr.mxu1 %v8634_v0  ;;  %v5997_v8 = vld [vmem:[%s8626_s3 + $0x2e8] sm:$0xff] }
 0x17c   :  { %v1021_v38 = vpop.f32.mrf.mxu0  ;;  %v1362_v39 = vpop.f32.mrf.mxu1  ;;  %2339 = vmatpush1.msra.mxu0 %v5966_v30  ;;  %2372 = vmatprep.mubr.f32.mxu0 %v8634_v0  ;;  %v5999_v30 = vld [vmem:[%s8626_s3 + $0x2f8] sm:$0xff] }
 0x17d   :  { %v1462_v18 = vmax.f32 %v1096_v16, %v1437_v21  ;;  %v1022_v19 = vadd.f32 %v7463_v17, %v1021_v38  ;;  %v1363_v13 = vadd.f32 %v7463_v17, %v1362_v39  ;;  %6263 = vmatpush3.msra.mxu1 %v5968_v42  ;;  %6264 = vmatprep.mubr.msk.f32.mxu1 %vm6448_vm2, %v8634_v0  ;;  %v5995_v42 = vld [vmem:[%s8626_s3 + $0x2d8] sm:$0xff] }
 0x17e   :  { %v1023_v49 = vpop.f32.mrf.mxu0  ;;  %v1364_v43 = vpop.f32.mrf.mxu1  ;;  %2494 = vmatprep.subr.mxu0 %v5984_v35  ;;  %6267 = vmatprep.subr.mxu1 %v8634_v0  ;;  %v5994_v35 = vld [vmem:[%s8626_s3 + $0x2d0] sm:$0xff] }
 0x17f   :  { %v1487_v44 = vmax.f32 %v7528_v32, %v1462_v18  ;;  %v1097_v46 = vmax.f32 %v1022_v19, 0.0  ;;  %v1438_v51 = vmax.f32 %v1363_v13, 0.0  ;;  %v5996_v18 = vld [vmem:[%s8626_s3 + $0x2e0] sm:$0xff]  ;;  %v6012_v49 = vld [vmem:[%s8626_s3 + $0x350] sm:$0xff] }
 0x180   :  { %v1026_v14 = vpop.f32.mrf.mxu0  ;;  %v1367_v53 = vpop.f32.mrf.mxu1 }
 0x181   :  { %v1463_v55 = vmax.f32 %v1097_v46, %v1438_v51  ;;  %v1027_v56 = vadd.f32 %v7463_v17, %v1026_v14  ;;  %v1368_v32 = vadd.f32 %v7463_v17, %v1367_v53  ;;  %5972 = vmatmul.mubr.msk.f32.vlgmr.msra.gmra.mxu0 %vm1514_vm3, %v1487_v44  ;;  %6265 = vmatmul.mubr.msk.f32.vlgmr.msra.gmra.mxu1 %vm1514_vm3, %v1487_v44 }
 0x182   :  { %v1028_v1 = vpop.f32.mrf.mxu0  ;;  %v1369_v2 = vpop.f32.mrf.mxu1  ;;  %2495 = vmatpush1.msra.mxu0 %v5983_v48  ;;  %6268 = vmatpush3.msra.mxu1 %v5985_v52 }
 0x183   :  { %v7777_v61 = vmax.f32 %v7532_v40, %v1463_v55  ;;  %v1098_v5 = vmax.f32 %v1027_v56, 0.0  ;;  %v1439_v6 = vmax.f32 %v1368_v32, 0.0  ;;  %2496 = vmatprep.subr.mxu0 %v5981_v54  ;;  %6269 = vmatprep.subr.mxu1 %v8634_v0  ;;  %v6011_v56 = vld [vmem:[%s8626_s3 + $0x348] sm:$0xff]  ;;  %v6013_v32 = vld [vmem:[%s8626_s3 + $0x358] sm:$0xff] }
 0x184   :  { %v1031_v34 = vpop.f32.mrf.mxu0  ;;  %v1372_v11 = vpop.f32.mrf.mxu1  ;;  %2497 = vmatpush1.msra.mxu0 %v5980_v59  ;;  %2530 = vmatprep.mubr.f32.mxu0 %v8634_v0  ;;  %v6009_v2 = vld [vmem:[%s8626_s3 + $0x338] sm:$0xff] }
 0x185   :  { %v1464_v4 = vmax.f32 %v1098_v5, %v1439_v6  ;;  %v1032_v20 = vadd.f32 %v7463_v17, %v1031_v34  ;;  %v1373_v40 = vadd.f32 %v7463_v17, %v1372_v11  ;;  %6270 = vmatpush3.msra.mxu1 %v5982_v3  ;;  %6271 = vmatprep.mubr.msk.f32.mxu1 %vm6448_vm2, %v8634_v0  ;;  %v6008_v6 = vld [vmem:[%s8626_s3 + $0x330] sm:$0xff]  ;;  %v6010_v11 = vld [vmem:[%s8626_s3 + $0x340] sm:$0xff] }
 0x186   :  { %v1033_v12 = vpop.f32.mrf.mxu0  ;;  %v1374_v23 = vpop.f32.mrf.mxu1  ;;  %2652 = vmatprep.subr.mxu0 %v5998_v9  ;;  %6274 = vmatprep.subr.mxu1 %v8634_v0 }
 0x187   :  { %v1489_v24 = vmax.f32 %v7536_v50, %v1464_v4  ;;  %v1099_v25 = vmax.f32 %v1032_v20, 0.0  ;;  %v1440_v29 = vmax.f32 %v1373_v40, 0.0  ;;  %v6026_v12 = vld [vmem:[%s8626_s3 + $0x3b0] sm:$0xff] }
 0x188   :  { %v1036_v15 = vpop.f32.mrf.mxu0  ;;  %v1377_v31 = vpop.f32.mrf.mxu1 }
 0x189   :  { %v1465_v16 = vmax.f32 %v1099_v25, %v1440_v29  ;;  %v1037_v21 = vadd.f32 %v7463_v17, %v1036_v15  ;;  %v1378_v50 = vadd.f32 %v7463_v17, %v1377_v31  ;;  %5986 = vmatmul.mubr.msk.f32.vlgmr.msra.gmra.mxu0 %vm1514_vm3, %v1489_v24  ;;  %6272 = vmatmul.mubr.msk.f32.vlgmr.msra.gmra.mxu1 %vm1514_vm3, %v1489_v24 }
 0x18a   :  { %v1038_v38 = vpop.f32.mrf.mxu0  ;;  %v1379_v39 = vpop.f32.mrf.mxu1  ;;  %2653 = vmatpush1.msra.mxu0 %v5997_v8  ;;  %6275 = vmatpush3.msra.mxu1 %v5999_v30 }
 0x18b   :  { %v7810_v19 = vmax.f32 %v7540_v62, %v1465_v16  ;;  %v1100_v17 = vmax.f32 %v1037_v21, 0.0  ;;  %v1441_v13 = vmax.f32 %v1378_v50, 0.0  ;;  %2654 = vmatprep.subr.mxu0 %v5995_v42  ;;  %6276 = vmatprep.subr.mxu1 %v8634_v0  ;;  %v7820_v62 = vld [vmem:[%s8627_s2] ss:$0 sm:$0xff]  ;;  %v6025_v16 = vld [vmem:[%s8626_s3 + $0x3a8] sm:$0xff]  ;;  %v6027_v21 = vld [vmem:[%s8626_s3 + $0x3b8] sm:$0xff] }
 0x18c   :  { %v1041_v43 = vpop.f32.mrf.mxu0  ;;  %v1382_v44 = vpop.f32.mrf.mxu1  ;;  %2655 = vmatpush1.msra.mxu0 %v5994_v35  ;;  %2688 = vmatprep.mubr.f32.mxu0 %v8634_v0  ;;  %v6023_v38 = vld [vmem:[%s8626_s3 + $0x398] sm:$0xff] }
 0x18d   :  { %v1466_v46 = vmax.f32 %v1100_v17, %v1441_v13  ;;  %v1042_v51 = vadd.f32 %v7820_v62, %v1041_v43  ;;  %v1383_v48 = vadd.f32 %v7820_v62, %v1382_v44  ;;  %6277 = vmatpush3.msra.mxu1 %v5996_v18  ;;  %6278 = vmatprep.mubr.msk.f32.mxu1 %vm6448_vm2, %v8634_v0  ;;  %v6022_v17 = vld [vmem:[%s8626_s3 + $0x390] sm:$0xff]  ;;  %v6024_v43 = vld [vmem:[%s8626_s3 + $0x3a0] sm:$0xff] }
 0x18e   :  { %v1043_v52 = vpop.f32.mrf.mxu0  ;;  %v1384_v14 = vpop.f32.mrf.mxu1  ;;  %2810 = vmatprep.subr.mxu0 %v6012_v49  ;;  %6281 = vmatprep.subr.mxu1 %v8634_v0 }
 0x18f   :  { %v1491_v53 = vmax.f32 %v7544_v10, %v1466_v46  ;;  %v1101_v54 = vmax.f32 %v1042_v51, 0.0  ;;  %v1442_v55 = vmax.f32 %v1383_v48, 0.0  ;;  %v6040_v48 = vld [vmem:[%s8626_s3 + $0x410] sm:$0xff] }
 0x190   :  { %v1046_v59 = vpop.f32.mrf.mxu0  ;;  %v1387_v1 = vpop.f32.mrf.mxu1 }
 0x191   :  { %v1467_v3 = vmax.f32 %v1101_v54, %v1442_v55  ;;  %v1047_v5 = vadd.f32 %v7820_v62, %v1046_v59  ;;  %v1388_v10 = vadd.f32 %v7820_v62, %v1387_v1  ;;  %6000 = vmatmul.mubr.msk.f32.vlgmr.msra.gmra.mxu0 %vm1514_vm3, %v1491_v53  ;;  %6279 = vmatmul.mubr.msk.f32.vlgmr.msra.gmra.mxu1 %vm1514_vm3, %v1491_v53 }
 0x192   :  { %v1048_v9 = vpop.f32.mrf.mxu0  ;;  %v1389_v34 = vpop.f32.mrf.mxu1  ;;  %2811 = vmatpush1.msra.mxu0 %v6011_v56  ;;  %6282 = vmatpush3.msra.mxu1 %v6013_v32 }
 0x193   :  { %v7848_v4 = vmax.f32 %v7548_v27, %v1467_v3  ;;  %v1102_v20 = vmax.f32 %v1047_v5, 0.0  ;;  %v1443_v40 = vmax.f32 %v1388_v10, 0.0  ;;  %2812 = vmatprep.subr.mxu0 %v6009_v2  ;;  %6283 = vmatprep.subr.mxu1 %v8634_v0  ;;  %v6039_v2 = vld [vmem:[%s8626_s3 + $0x408] sm:$0xff]  ;;  %v6041_v3 = vld [vmem:[%s8626_s3 + $0x418] sm:$0xff] }
 0x194   :  { %v1051_v23 = vpop.f32.mrf.mxu0  ;;  %v1392_v24 = vpop.f32.mrf.mxu1  ;;  %2813 = vmatpush1.msra.mxu0 %v6008_v6  ;;  %2846 = vmatprep.mubr.f32.mxu0 %v8634_v0  ;;  %v6037_v6 = vld [vmem:[%s8626_s3 + $0x3f8] sm:$0xff] }
 0x195   :  { %v1468_v25 = vmax.f32 %v1102_v20, %v1443_v40  ;;  %v1052_v29 = vadd.f32 %v7820_v62, %v1051_v23  ;;  %v1393_v27 = vadd.f32 %v7820_v62, %v1392_v24  ;;  %6284 = vmatpush3.msra.mxu1 %v6010_v11  ;;  %6285 = vmatprep.mubr.msk.f32.mxu1 %vm6448_vm2, %v8634_v0  ;;  %v6036_v11 = vld [vmem:[%s8626_s3 + $0x3f0] sm:$0xff] }
 0x196   :  { %v1053_v8 = vpop.f32.mrf.mxu0  ;;  %v1394_v30 = vpop.f32.mrf.mxu1  ;;  %2968 = vmatprep.subr.mxu0 %v6026_v12  ;;  %6288 = vmatprep.subr.mxu1 %v8634_v0  ;;  %v6038_v12 = vld [vmem:[%s8626_s3 + $0x400] sm:$0xff] }
 0x197   :  { %v1493_v15 = vmax.f32 %v7552_v36, %v1468_v25  ;;  %v1103_v31 = vmax.f32 %v1052_v29, 0.0  ;;  %v1444_v42 = vmax.f32 %v1393_v27, 0.0  ;;  %v6054_v29 = vld [vmem:[%s8626_s3 + $0x470] sm:$0xff] }
 0x198   :  { %v1056_v50 = vpop.f32.mrf.mxu0  ;;  %v1397_v35 = vpop.f32.mrf.mxu1 }
 0x199   :  { %v1469_v39 = vmax.f32 %v1103_v31, %v1444_v42  ;;  %v1057_v18 = vadd.f32 %v7820_v62, %v1056_v50  ;;  %v1398_v36 = vadd.f32 %v7820_v62, %v1397_v35  ;;  %6014 = vmatmul.mubr.msk.f32.vlgmr.msra.gmra.mxu0 %vm1514_vm3, %v1493_v15  ;;  %6286 = vmatmul.mubr.msk.f32.vlgmr.msra.gmra.mxu1 %vm1514_vm3, %v1493_v15  ;;  %v6053_v35 = vld [vmem:[%s8626_s3 + $0x468] sm:$0xff] }
 0x19a   :  { %v1058_v13 = vpop.f32.mrf.mxu0  ;;  %v1399_v49 = vpop.f32.mrf.mxu1  ;;  %2969 = vmatpush1.msra.mxu0 %v6025_v16  ;;  %6289 = vmatpush3.msra.mxu1 %v6027_v21 }
 0x19b   :  { %v7881_v44 = vmax.f32 %v7556_v45, %v1469_v39  ;;  %v1104_v46 = vmax.f32 %v1057_v18, 0.0  ;;  %v1445_v51 = vmax.f32 %v1398_v36, 0.0  ;;  %2970 = vmatprep.subr.mxu0 %v6023_v38  ;;  %6290 = vmatprep.subr.mxu1 %v8634_v0  ;;  %v6055_v38 = vld [vmem:[%s8626_s3 + $0x478] sm:$0xff]  ;;  %v6050_v49 = vld [vmem:[%s8626_s3 + $0x450] sm:$0xff] }
 0x19c   :  { %v1061_v52 = vpop.f32.mrf.mxu0  ;;  %v1402_v14 = vpop.f32.mrf.mxu1  ;;  %2971 = vmatpush1.msra.mxu0 %v6022_v17  ;;  %3004 = vmatprep.mubr.f32.mxu0 %v8634_v0  ;;  %v6051_v36 = vld [vmem:[%s8626_s3 + $0x458] sm:$0xff] }
 0x19d   :  { %v1470_v53 = vmax.f32 %v1104_v46, %v1445_v51  ;;  %v1062_v54 = vadd.f32 %v7820_v62, %v1061_v52  ;;  %v1403_v45 = vadd.f32 %v7820_v62, %v1402_v14  ;;  %6291 = vmatpush3.msra.mxu1 %v6024_v43  ;;  %6292 = vmatprep.mubr.msk.f32.mxu1 %vm6448_vm2, %v8634_v0  ;;  %v6052_v51 = vld [vmem:[%s8626_s3 + $0x460] sm:$0xff] }
 0x19e   :  { %v1063_v55 = vpop.f32.mrf.mxu0  ;;  %v1404_v56 = vpop.f32.mrf.mxu1  ;;  %3126 = vmatprep.subr.mxu0 %v6040_v48  ;;  %6295 = vmatprep.subr.mxu1 %v8634_v0 }
 0x19f   :  { %v1495_v32 = vmax.f32 %v7560_v57, %v1470_v53  ;;  %v1105_v59 = vmax.f32 %v1062_v54, 0.0  ;;  %v1446_v1 = vmax.f32 %v1403_v45, 0.0  ;;  %v6062_v53 = vld [vmem:[%s8626_s3 + $0x4a0] sm:$0xff] }
 0x1a0   :  { %v1066_v5 = vpop.f32.mrf.mxu0  ;;  %v1407_v10 = vpop.f32.mrf.mxu1 }
 0x1a1   :  { %v1471_v9 = vmax.f32 %v1105_v59, %v1446_v1  ;;  %v1067_v34 = vadd.f32 %v7820_v62, %v1066_v5  ;;  %v1408_v57 = vadd.f32 %v7820_v62, %v1407_v10  ;;  %6028 = vmatmul.mubr.msk.f32.vlgmr.msra.gmra.mxu0 %vm1514_vm3, %v1495_v32  ;;  %6293 = vmatmul.mubr.msk.f32.vlgmr.msra.gmra.mxu1 %vm1514_vm3, %v1495_v32  ;;  %v6061_v5 = vld [vmem:[%s8626_s3 + $0x498] sm:$0xff]  ;;  %v6059_v10 = vld [vmem:[%s8626_s3 + $0x488] sm:$0xff] }
 0x1a2   :  { %v1068_v20 = vpop.f32.mrf.mxu0  ;;  %v1409_v40 = vpop.f32.mrf.mxu1  ;;  %3127 = vmatpush1.msra.mxu0 %v6039_v2  ;;  %6296 = vmatpush3.msra.mxu1 %v6041_v3 }
 0x1a3   :  { %v7914_v23 = vmax.f32 %v7564_v7, %v1471_v9  ;;  %v1106_v24 = vmax.f32 %v1067_v34, 0.0  ;;  %v1447_v25 = vmax.f32 %v1408_v57, 0.0  ;;  %3128 = vmatprep.subr.mxu0 %v6037_v6  ;;  %6297 = vmatprep.subr.mxu1 %v8634_v0  ;;  %v6060_v9 = vld [vmem:[%s8626_s3 + $0x490] sm:$0xff]  ;;  %v1505_v57 = vld [vmem:[%s8626_s3 + $0x20] sm:$0xff]  ;;  %v1502_v20 = vld [vmem:[%s8626_s3 + $0x8] sm:$0xff] }
 0x1a4   :  { %v1071_v27 = vpop.f32.mrf.mxu0  ;;  %v1412_v8 = vpop.f32.mrf.mxu1  ;;  %3129 = vmatpush1.msra.mxu0 %v6036_v11  ;;  %3162 = vmatprep.mubr.f32.mxu0 %v8634_v0  ;;  %v1504_v11 = vld [vmem:[%s8626_s3 + $0x18] sm:$0xff]  ;;  %v1501_v40 = vld [vmem:[%s8626_s3] sm:$0xff] }
 0x1a5   :  { %v1472_v30 = vmax.f32 %v1106_v24, %v1447_v25  ;;  %v1072_v15 = vadd.f32 %v7820_v62, %v1071_v27  ;;  %v1413_v7 = vadd.f32 %v7820_v62, %v1412_v8  ;;  %6298 = vmatpush3.msra.mxu1 %v6038_v12  ;;  %6299 = vmatprep.mubr.msk.f32.mxu1 %vm6448_vm2, %v8634_v0  ;;  %v1503_v12 = vld [vmem:[%s8626_s3 + $0x10] sm:$0xff]  ;;  %v5908_v24 = vld [vmem:[%s8626_s3 + $0x80] sm:$0xff]  ;;  %v5907_v25 = vld [vmem:[%s8626_s3 + $0x78] sm:$0xff] }
 0x1a6   :  { %v1073_v31 = vpop.f32.mrf.mxu0  ;;  %v1414_v42 = vpop.f32.mrf.mxu1  ;;  %3284 = vmatprep.subr.mxu0 %v6054_v29  ;;  %6302 = vmatprep.subr.mxu1 %v8634_v0  ;;  %v5909_v29 = vld [vmem:[%s8626_s3 + $0x88] sm:$0xff]  ;;  %v5904_v8 = vld [vmem:[%s8626_s3 + $0x60] sm:$0xff] }
 0x1a7   :  { %v1497_v16 = vmax.f32 %v7568_v26, %v1472_v30  ;;  %v1107_v21 = vmax.f32 %v1072_v15, 0.0  ;;  %v1448_v50 = vmax.f32 %v1413_v7, 0.0  ;;  %v5905_v27 = vld [vmem:[%s8626_s3 + $0x68] sm:$0xff]  ;;  %v5906_v30 = vld [vmem:[%s8626_s3 + $0x70] sm:$0xff]  ;;  %v5921_v15 = vld [vmem:[%s8626_s3 + $0xd8] sm:$0xff] }
 0x1a8   :  { %v1076_v39 = vpop.f32.mrf.mxu0  ;;  %v1417_v18 = vpop.f32.mrf.mxu1  ;;  %v5923_v7 = vld [vmem:[%s8626_s3 + $0xe8] sm:$0xff]  ;;  %v5918_v42 = vld [vmem:[%s8626_s3 + $0xc0] sm:$0xff] }
 0x1a9   :  { %v1473_v17 = vmax.f32 %v1107_v21, %v1448_v50  ;;  %v1077_v13 = vadd.f32 %v7820_v62, %v1076_v39  ;;  %v1418_v26 = vadd.f32 %v7820_v62, %v1417_v18  ;;  %6042 = vmatmul.mubr.msk.f32.vlgmr.msra.gmra.mxu0 %vm1514_vm3, %v1497_v16  ;;  %6300 = vmatmul.mubr.msk.f32.vlgmr.msra.gmra.mxu1 %vm1514_vm3, %v1497_v16  ;;  %v5919_v31 = vld [vmem:[%s8626_s3 + $0xc8] sm:$0xff]  ;;  %v5920_v16 = vld [vmem:[%s8626_s3 + $0xd0] sm:$0xff]  ;;  %v5935_v21 = vld [vmem:[%s8626_s3 + $0x138] sm:$0xff] }
 0x1aa   :  { %v1078_v43 = vpop.f32.mrf.mxu0  ;;  %v1419_v46 = vpop.f32.mrf.mxu1  ;;  %3285 = vmatpush1.msra.mxu0 %v6053_v35  ;;  %6303 = vmatpush3.msra.mxu1 %v6055_v38  ;;  %v5937_v50 = vld [vmem:[%s8626_s3 + $0x148] sm:$0xff]  ;;  %v5932_v38 = vld [vmem:[%s8626_s3 + $0x120] sm:$0xff]  ;;  %v5934_v39 = vld [vmem:[%s8626_s3 + $0x130] sm:$0xff] }
 0x1ab   :  { %v7947_v48 = vmax.f32 %v7572_v37, %v1473_v17  ;;  %v1108_v52 = vmax.f32 %v1077_v13, 0.0  ;;  %v1449_v14 = vmax.f32 %v1418_v26, 0.0  ;;  %3286 = vmatprep.subr.mxu0 %v6051_v36  ;;  %6304 = vmatprep.subr.mxu1 %v8634_v0  ;;  %v5933_v35 = vld [vmem:[%s8626_s3 + $0x128] sm:$0xff]  ;;  %v5949_v18 = vld [vmem:[%s8626_s3 + $0x198] sm:$0xff]  ;;  %v5946_v13 = vld [vmem:[%s8626_s3 + $0x180] sm:$0xff] }
 0x1ac   :  { %v1081_v54 = vpop.f32.mrf.mxu0  ;;  %v1422_v45 = vpop.f32.mrf.mxu1  ;;  %3287 = vmatpush1.msra.mxu0 %v6050_v49  ;;  %3320 = vmatprep.mubr.f32.mxu0 %v8634_v0  ;;  %v5951_v36 = vld [vmem:[%s8626_s3 + $0x1a8] sm:$0xff]  ;;  %v5948_v26 = vld [vmem:[%s8626_s3 + $0x190] sm:$0xff]  ;;  %v5963_v49 = vld [vmem:[%s8626_s3 + $0x1f8] sm:$0xff] }
 0x1ad   :  { %v1474_v55 = vmax.f32 %v1108_v52, %v1449_v14  ;;  %v1082_v56 = vadd.f32 %v7820_v62, %v1081_v54  ;;  %v1423_v37 = vadd.f32 %v7820_v62, %v1422_v45  ;;  %6305 = vmatpush3.msra.mxu1 %v6052_v51  ;;  %6306 = vmatprep.mubr.msk.f32.mxu1 %vm6448_vm2, %v8634_v0  ;;  %v6063_v62 = vld [vmem:[%s8626_s3 + $0x4a8] sm:$0xff]  ;;  %v5960_v51 = vld [vmem:[%s8626_s3 + $0x1e0] sm:$0xff]  ;;  %v5962_v52 = vld [vmem:[%s8626_s3 + $0x1f0] sm:$0xff] }
 0x1ae   :  { %v1083_v32 = vpop.f32.mrf.mxu0  ;;  %v1424_v59 = vpop.f32.mrf.mxu1  ;;  %3435 = vmatprep.subr.mxu0 %v6062_v53  ;;  %6309 = vmatprep.subr.mxu1 %v8634_v0  ;;  %v5947_v17 = vld [vmem:[%s8626_s3 + $0x188] sm:$0xff]  ;;  %v5977_v14 = vld [vmem:[%s8626_s3 + $0x258] sm:$0xff]  ;;  %v5974_v45 = vld [vmem:[%s8626_s3 + $0x240] sm:$0xff] }
 0x1af   :  { %v1499_v1 = vmax.f32 %v7576_v47, %v1474_v55  ;;  %v1109_v2 = vmax.f32 %v1082_v56, 0.0  ;;  %v1450_v3 = vmax.f32 %v1423_v37, 0.0  ;;  %v6058_v47 = vld [vmem:[%s8626_s3 + $0x480] sm:$0xff]  ;;  %v5965_v43 = vld [vmem:[%s8626_s3 + $0x208] sm:$0xff]  ;;  %v5976_v55 = vld [vmem:[%s8626_s3 + $0x250] sm:$0xff] }
 0x1b0   :  { %v5961_v46 = vld [vmem:[%s8626_s3 + $0x1e8] sm:$0xff]  ;;  %v5991_v56 = vld [vmem:[%s8626_s3 + $0x2b8] sm:$0xff]  ;;  %v5988_v59 = vld [vmem:[%s8626_s3 + $0x2a0] sm:$0xff] }
 0x1b1   :  { %v1475_v6 = vmax.f32 %v1109_v2, %v1450_v3  ;;  %6056 = vmatmul.mubr.msk.f32.vlgmr.msra.gmra.mxu0 %vm1514_vm3, %v1499_v1  ;;  %6307 = vmatmul.mubr.msk.f32.vlgmr.msra.gmra.mxu1 %vm1514_vm3, %v1499_v1  ;;  %v5979_v53 = vld [vmem:[%s8626_s3 + $0x268] sm:$0xff]  ;;  %v5990_v1 = vld [vmem:[%s8626_s3 + $0x2b0] sm:$0xff]  ;;  %v6005_v2 = vld [vmem:[%s8626_s3 + $0x318] sm:$0xff] }
 0x1b2   :  { %3436 = vmatpush1.msra.mxu0 %v6061_v5  ;;  %6310 = vmatpush3.msra.mxu1 %v6063_v62  ;;  %v5975_v54 = vld [vmem:[%s8626_s3 + $0x248] sm:$0xff]  ;;  %v6002_v62 = vld [vmem:[%s8626_s3 + $0x300] sm:$0xff] }
 0x1b3   :  { %v1500_v34 = vmax.f32 %v7580_v63, %v1475_v6  ;;  %3437 = vmatprep.subr.mxu0 %v6059_v10  ;;  %6311 = vmatprep.subr.mxu1 %v8634_v0  ;;  %v1506_v63 = vld [vmem:[%s8626_s3 + $0x28] sm:$0xff]  ;;  %v6004_v10 = vld [vmem:[%s8626_s3 + $0x310] sm:$0xff]  ;;  %v6019_v6 = vld [vmem:[%s8626_s3 + $0x378] sm:$0xff] }
 0x1b4   :  { %3438 = vmatpush1.msra.mxu0 %v6058_v47  ;;  %3471 = vmatprep.mubr.f32.mxu0 %v8634_v0  ;;  %v5993_v37 = vld [vmem:[%s8626_s3 + $0x2c8] sm:$0xff] }
 0x1b5   :  { %6312 = vmatpush3.msra.mxu1 %v6060_v9  ;;  %6313 = vmatprep.mubr.msk.f32.mxu1 %vm6448_vm2, %v8634_v0  ;;  %v5989_v32 = vld [vmem:[%s8626_s3 + $0x2a8] sm:$0xff] }
 0x1b6   :  { %6064 = vmatmul.mubr.msk.f32.vlgmr.msra.gmra.mxu0 %vm1514_vm3, %v1500_v34  ;;  %6314 = vmatmul.mubr.msk.f32.vlgmr.msra.gmra.mxu1 %vm1514_vm3, %v1500_v34  ;;  %v6007_v3 = vld [vmem:[%s8626_s3 + $0x328] sm:$0xff]  ;;  %v6016_v34 = vld [vmem:[%s8626_s3 + $0x360] sm:$0xff] }
 0x1b7   :  { %3579 = vmatprep.subr.mxu0 %v1505_v57  ;;  %6316 = vmatprep.subr.mxu1 %v8634_v0  ;;  %v6003_v5 = vld [vmem:[%s8626_s3 + $0x308] sm:$0xff]  ;;  %v6018_v57 = vld [vmem:[%s8626_s3 + $0x370] sm:$0xff] }
 0x1b8   :  { %3580 = vmatpush1.msra.mxu0 %v1504_v11  ;;  %6317 = vmatpush3.msra.mxu1 %v1506_v63  ;;  %v6021_v47 = vld [vmem:[%s8626_s3 + $0x388] sm:$0xff]  ;;  %v6033_v11 = vld [vmem:[%s8626_s3 + $0x3d8] sm:$0xff] }
 0x1b9   :  { %3581 = vmatprep.subr.mxu0 %v1502_v20  ;;  %6318 = vmatprep.subr.mxu1 %v8634_v0  ;;  %v6017_v9 = vld [vmem:[%s8626_s3 + $0x368] sm:$0xff] }
 0x1ba   :  { %3582 = vmatpush1.msra.mxu0 %v1501_v40  ;;  %3615 = vmatprep.mubr.f32.mxu0 %v8634_v0  ;;  %v6035_v63 = vld [vmem:[%s8626_s3 + $0x3e8] sm:$0xff]  ;;  %v6030_v40 = vld [vmem:[%s8626_s3 + $0x3c0] sm:$0xff] }
 0x1bb   :  { %6319 = vmatpush3.msra.mxu1 %v1503_v12  ;;  %6320 = vmatprep.mubr.msk.f32.mxu1 %vm6448_vm2, %v8634_v0  ;;  %v6031_v20 = vld [vmem:[%s8626_s3 + $0x3c8] sm:$0xff]  ;;  %v6032_v12 = vld [vmem:[%s8626_s3 + $0x3d0] sm:$0xff] }
 0x1bc   :  { %6066 = vmatmul.mubr.msk.f32.vlgmr.msra.gmra.mxu0 %vm1514_vm3, %v7587_v28  ;;  %6321 = vmatmul.mubr.msk.f32.vlgmr.msra.gmra.mxu1 %vm1514_vm3, %v7587_v28  ;;  %v5922_v28 = vld [vmem:[%s8626_s3 + $0xe0] sm:$0xff] }
 0x1bd   :  { %3723 = vmatprep.subr.mxu0 %v5908_v24  ;;  %6323 = vmatprep.subr.mxu1 %v8634_v0  ;;  %v6047_v24 = vld [vmem:[%s8626_s3 + $0x438] sm:$0xff] }
 0x1be   :  { %3724 = vmatpush1.msra.mxu0 %v5907_v25  ;;  %6324 = vmatpush3.msra.mxu1 %v5909_v29  ;;  %v6049_v25 = vld [vmem:[%s8626_s3 + $0x448] sm:$0xff] }
 0x1bf   :  { %3725 = vmatprep.subr.mxu0 %v5905_v27  ;;  %6325 = vmatprep.subr.mxu1 %v8634_v0  ;;  %v6045_v29 = vld [vmem:[%s8626_s3 + $0x428] sm:$0xff]  ;;  %v6044_v27 = vld [vmem:[%s8626_s3 + $0x420] sm:$0xff] }
 0x1c0   :  { %3726 = vmatpush1.msra.mxu0 %v5904_v8  ;;  %3759 = vmatprep.mubr.f32.mxu0 %v8634_v0  ;;  %v6046_v8 = vld [vmem:[%s8626_s3 + $0x430] sm:$0xff] }
 0x1c1   :  { %6326 = vmatpush3.msra.mxu1 %v5906_v30  ;;  %6327 = vmatprep.mubr.msk.f32.mxu1 %vm6448_vm2, %v8634_v0 }
 0x1c2   :  { %6068 = vmatmul.mubr.msk.f32.vlgmr.msra.gmra.mxu0 %vm1514_vm3, %v7612_v60  ;;  %6328 = vmatmul.mubr.msk.f32.vlgmr.msra.gmra.mxu1 %vm1514_vm3, %v7612_v60  ;;  %v5936_v60 = vld [vmem:[%s8626_s3 + $0x140] sm:$0xff] }
 0x1c3   :  { %3867 = vmatprep.subr.mxu0 %v5922_v28  ;;  %6330 = vmatprep.subr.mxu1 %v8634_v0 }
 0x1c4   :  { %3868 = vmatpush1.msra.mxu0 %v5921_v15  ;;  %6331 = vmatpush3.msra.mxu1 %v5923_v7 }
 0x1c5   :  { %3869 = vmatprep.subr.mxu0 %v5919_v31  ;;  %6332 = vmatprep.subr.mxu1 %v8634_v0 }
 0x1c6   :  { %3870 = vmatpush1.msra.mxu0 %v5918_v42  ;;  %3903 = vmatprep.mubr.f32.mxu0 %v8634_v0 }
 0x1c7   :  { %6333 = vmatpush3.msra.mxu1 %v5920_v16  ;;  %6334 = vmatprep.mubr.msk.f32.mxu1 %vm6448_vm2, %v8634_v0  ;;  %v5350_v16 = vld [vmem:[%s8628_s5 + $0x78] sm:$0xff] }
 0x1c8   :  { %6070 = vmatmul.mubr.msk.f32.vlgmr.msra.gmra.mxu0 %vm1514_vm3, %v7645_v41  ;;  %6335 = vmatmul.mubr.msk.f32.vlgmr.msra.gmra.mxu1 %vm1514_vm3, %v7645_v41  ;;  %v5950_v41 = vld [vmem:[%s8626_s3 + $0x1a0] sm:$0xff] }
 0x1c9   :  { %4011 = vmatprep.subr.mxu0 %v5936_v60  ;;  %6337 = vmatprep.subr.mxu1 %v8634_v0  ;;  %v5365_v60 = vld [vmem:[%s8628_s5 + $0xf0] sm:$0xff] }
 0x1ca   :  { %4012 = vmatpush1.msra.mxu0 %v5935_v21  ;;  %6338 = vmatpush3.msra.mxu1 %v5937_v50  ;;  %v5349_v21 = vld [vmem:[%s8628_s5 + $0x70] sm:$0xff] }
 0x1cb   :  { %4013 = vmatprep.subr.mxu0 %v5933_v35  ;;  %6339 = vmatprep.subr.mxu1 %v8634_v0  ;;  %v5364_v35 = vld [vmem:[%s8628_s5 + $0xe8] sm:$0xff] }
 0x1cc   :  { %4014 = vmatpush1.msra.mxu0 %v5932_v38  ;;  %4047 = vmatprep.mubr.f32.mxu0 %v8634_v0  ;;  %v5348_v38 = vld [vmem:[%s8628_s5 + $0x68] sm:$0xff] }
 0x1cd   :  { %6340 = vmatpush3.msra.mxu1 %v5934_v39  ;;  %6341 = vmatprep.mubr.msk.f32.mxu1 %vm6448_vm2, %v8634_v0 }
 0x1ce   :  { %6072 = vmatmul.mubr.msk.f32.vlgmr.msra.gmra.mxu0 %vm1514_vm3, %v7678_v22  ;;  %6342 = vmatmul.mubr.msk.f32.vlgmr.msra.gmra.mxu1 %vm1514_vm3, %v7678_v22  ;;  %v5964_v22 = vld [vmem:[%s8626_s3 + $0x200] sm:$0xff] }
 0x1cf   :  { %4155 = vmatprep.subr.mxu0 %v5950_v41  ;;  %6344 = vmatprep.subr.mxu1 %v8634_v0 }
 0x1d0   :  { %4156 = vmatpush1.msra.mxu0 %v5949_v18  ;;  %6345 = vmatpush3.msra.mxu1 %v5951_v36  ;;  %v5363_v36 = vld [vmem:[%s8628_s5 + $0xe0] sm:$0xff] }
 0x1d1   :  { %4157 = vmatprep.subr.mxu0 %v5947_v17  ;;  %6346 = vmatprep.subr.mxu1 %v8634_v0  ;;  %v5347_v17 = vld [vmem:[%s8628_s5 + $0x60] sm:$0xff] }
 0x1d2   :  { %4158 = vmatpush1.msra.mxu0 %v5946_v13  ;;  %4191 = vmatprep.mubr.f32.mxu0 %v8634_v0  ;;  %v5362_v13 = vld [vmem:[%s8628_s5 + $0xd8] sm:$0xff] }
 0x1d3   :  { %6347 = vmatpush3.msra.mxu1 %v5948_v26  ;;  %6348 = vmatprep.mubr.msk.f32.mxu1 %vm6448_vm2, %v8634_v0  ;;  %v5346_v26 = vld [vmem:[%s8628_s5 + $0x58] sm:$0xff] }
 0x1d4   :  { %6074 = vmatmul.mubr.msk.f32.vlgmr.msra.gmra.mxu0 %vm1514_vm3, %v7711_v58  ;;  %6349 = vmatmul.mubr.msk.f32.vlgmr.msra.gmra.mxu1 %vm1514_vm3, %v7711_v58  ;;  %v5978_v58 = vld [vmem:[%s8626_s3 + $0x260] sm:$0xff] }
 0x1d5   :  { %4299 = vmatprep.subr.mxu0 %v5964_v22  ;;  %6351 = vmatprep.subr.mxu1 %v8634_v0 }
 0x1d6   :  { %4300 = vmatpush1.msra.mxu0 %v5963_v49  ;;  %6352 = vmatpush3.msra.mxu1 %v5965_v43  ;;  %v5361_v43 = vld [vmem:[%s8628_s5 + $0xd0] sm:$0xff] }
 0x1d7   :  { %4301 = vmatprep.subr.mxu0 %v5961_v46  ;;  %6353 = vmatprep.subr.mxu1 %v8634_v0  ;;  %v5345_v46 = vld [vmem:[%s8628_s5 + $0x50] sm:$0xff] }
 0x1d8   :  { %4302 = vmatpush1.msra.mxu0 %v5960_v51  ;;  %4335 = vmatprep.mubr.f32.mxu0 %v8634_v0 }
 0x1d9   :  { %6354 = vmatpush3.msra.mxu1 %v5962_v52  ;;  %6355 = vmatprep.mubr.msk.f32.mxu1 %vm6448_vm2, %v8634_v0 }
 0x1da   :  { %6076 = vmatmul.mubr.msk.f32.vlgmr.msra.gmra.mxu0 %vm1514_vm3, %v7744_v33  ;;  %6356 = vmatmul.mubr.msk.f32.vlgmr.msra.gmra.mxu1 %vm1514_vm3, %v7744_v33  ;;  %v5992_v33 = vld [vmem:[%s8626_s3 + $0x2c0] sm:$0xff] }
 0x1db   :  { %4443 = vmatprep.subr.mxu0 %v5978_v58  ;;  %6358 = vmatprep.subr.mxu1 %v8634_v0  ;;  %v5360_v58 = vld [vmem:[%s8628_s5 + $0xc8] sm:$0xff] }
 0x1dc   :  { %4444 = vmatpush1.msra.mxu0 %v5977_v14  ;;  %6359 = vmatpush3.msra.mxu1 %v5979_v53  ;;  %v5344_v14 = vld [vmem:[%s8628_s5 + $0x48] sm:$0xff]  ;;  %v5359_v53 = vld [vmem:[%s8628_s5 + $0xc0] sm:$0xff] }
 0x1dd   :  { %4445 = vmatprep.subr.mxu0 %v5975_v54  ;;  %6360 = vmatprep.subr.mxu1 %v8634_v0  ;;  %v5343_v54 = vld [vmem:[%s8628_s5 + $0x40] sm:$0xff] }
 0x1de   :  { %4446 = vmatpush1.msra.mxu0 %v5974_v45  ;;  %4479 = vmatprep.mubr.f32.mxu0 %v8634_v0 }
 0x1df   :  { %6361 = vmatpush3.msra.mxu1 %v5976_v55  ;;  %6362 = vmatprep.mubr.msk.f32.mxu1 %vm6448_vm2, %v8634_v0  ;;  %v5358_v55 = vld [vmem:[%s8628_s5 + $0xb8] sm:$0xff] }
 0x1e0   :  { %6078 = vmatmul.mubr.msk.f32.vlgmr.msra.gmra.mxu0 %vm1514_vm3, %v7777_v61  ;;  %6363 = vmatmul.mubr.msk.f32.vlgmr.msra.gmra.mxu1 %vm1514_vm3, %v7777_v61  ;;  %v6006_v61 = vld [vmem:[%s8626_s3 + $0x320] sm:$0xff] }
 0x1e1   :  { %4587 = vmatprep.subr.mxu0 %v5992_v33  ;;  %6365 = vmatprep.subr.mxu1 %v8634_v0  ;;  %v5342_v33 = vld [vmem:[%s8628_s5 + $0x38] sm:$0xff] }
 0x1e2   :  { %4588 = vmatpush1.msra.mxu0 %v5991_v56  ;;  %6366 = vmatpush3.msra.mxu1 %v5993_v37 }
 0x1e3   :  { %4589 = vmatprep.subr.mxu0 %v5989_v32  ;;  %6367 = vmatprep.subr.mxu1 %v8634_v0  ;;  %v5357_v32 = vld [vmem:[%s8628_s5 + $0xb0] sm:$0xff] }
 0x1e4   :  { %4590 = vmatpush1.msra.mxu0 %v5988_v59  ;;  %4623 = vmatprep.mubr.f32.mxu0 %v8634_v0  ;;  %v5372_v59 = vld [vmem:[%s8628_s5 + $0x128] sm:$0xf] }
 0x1e5   :  { %6368 = vmatpush3.msra.mxu1 %v5990_v1  ;;  %6369 = vmatprep.mubr.msk.f32.mxu1 %vm6448_vm2, %v8634_v0  ;;  %v5341_v1 = vld [vmem:[%s8628_s5 + $0x30] sm:$0xff] }
 0x1e6   :  { %6080 = vmatmul.mubr.msk.f32.vlgmr.msra.gmra.mxu0 %vm1514_vm3, %v7810_v19  ;;  %6370 = vmatmul.mubr.msk.f32.vlgmr.msra.gmra.mxu1 %vm1514_vm3, %v7810_v19  ;;  %v6020_v19 = vld [vmem:[%s8626_s3 + $0x380] sm:$0xff] }
 0x1e7   :  { %4731 = vmatprep.subr.mxu0 %v6006_v61  ;;  %6372 = vmatprep.subr.mxu1 %v8634_v0 }
 0x1e8   :  { %4732 = vmatpush1.msra.mxu0 %v6005_v2  ;;  %6373 = vmatpush3.msra.mxu1 %v6007_v3  ;;  %v5356_v2 = vld [vmem:[%s8628_s5 + $0xa8] sm:$0xff]  ;;  %v5371_v3 = vld [vmem:[%s8628_s5 + $0x120] sm:$0xff] }
 0x1e9   :  { %4733 = vmatprep.subr.mxu0 %v6003_v5  ;;  %6374 = vmatprep.subr.mxu1 %v8634_v0  ;;  %v5340_v5 = vld [vmem:[%s8628_s5 + $0x28] sm:$0xff] }
 0x1ea   :  { %4734 = vmatpush1.msra.mxu0 %v6002_v62  ;;  %4767 = vmatprep.mubr.f32.mxu0 %v8634_v0 }
 0x1eb   :  { %6375 = vmatpush3.msra.mxu1 %v6004_v10  ;;  %6376 = vmatprep.mubr.msk.f32.mxu1 %vm6448_vm2, %v8634_v0  ;;  %v5355_v10 = vld [vmem:[%s8628_s5 + $0xa0] sm:$0xff] }
 0x1ec   :  { %6082 = vmatmul.mubr.msk.f32.vlgmr.msra.gmra.mxu0 %vm1514_vm3, %v7848_v4  ;;  %6377 = vmatmul.mubr.msk.f32.vlgmr.msra.gmra.mxu1 %vm1514_vm3, %v7848_v4  ;;  %v6034_v4 = vld [vmem:[%s8626_s3 + $0x3e0] sm:$0xff] }
 0x1ed   :  { %4875 = vmatprep.subr.mxu0 %v6020_v19  ;;  %6379 = vmatprep.subr.mxu1 %v8634_v0  ;;  %v5370_v19 = vld [vmem:[%s8628_s5 + $0x118] sm:$0xff] }
 0x1ee   :  { %4876 = vmatpush1.msra.mxu0 %v6019_v6  ;;  %6380 = vmatpush3.msra.mxu1 %v6021_v47  ;;  %v5339_v6 = vld [vmem:[%s8628_s5 + $0x20] sm:$0xff] }
 0x1ef   :  { %4877 = vmatprep.subr.mxu0 %v6017_v9  ;;  %6381 = vmatprep.subr.mxu1 %v8634_v0  ;;  %v5354_v9 = vld [vmem:[%s8628_s5 + $0x98] sm:$0xff] }
 0x1f0   :  { %4878 = vmatpush1.msra.mxu0 %v6016_v34  ;;  %4911 = vmatprep.mubr.f32.mxu0 %v8634_v0  ;;  %v5369_v34 = vld [vmem:[%s8628_s5 + $0x110] sm:$0xff] }
 0x1f1   :  { %6382 = vmatpush3.msra.mxu1 %v6018_v57  ;;  %6383 = vmatprep.mubr.msk.f32.mxu1 %vm6448_vm2, %v8634_v0  ;;  %v5338_v57 = vld [vmem:[%s8628_s5 + $0x18] sm:$0xff] }
 0x1f2   :  { %6084 = vmatmul.mubr.msk.f32.vlgmr.msra.gmra.mxu0 %vm1514_vm3, %v7881_v44  ;;  %6384 = vmatmul.mubr.msk.f32.vlgmr.msra.gmra.mxu1 %vm1514_vm3, %v7881_v44  ;;  %v6048_v44 = vld [vmem:[%s8626_s3 + $0x440] sm:$0xff] }
 0x1f3   :  { %5019 = vmatprep.subr.mxu0 %v6034_v4  ;;  %6386 = vmatprep.subr.mxu1 %v8634_v0 }
 0x1f4   :  { %5020 = vmatpush1.msra.mxu0 %v6033_v11  ;;  %6387 = vmatpush3.msra.mxu1 %v6035_v63  ;;  %v5353_v11 = vld [vmem:[%s8628_s5 + $0x90] sm:$0xff]  ;;  %v5368_v63 = vld [vmem:[%s8628_s5 + $0x108] sm:$0xff] }
 0x1f5   :  { %5021 = vmatprep.subr.mxu0 %v6031_v20  ;;  %6388 = vmatprep.subr.mxu1 %v8634_v0  ;;  %v5337_v20 = vld [vmem:[%s8628_s5 + $0x10] sm:$0xff] }
 0x1f6   :  { %5022 = vmatpush1.msra.mxu0 %v6030_v40  ;;  %5055 = vmatprep.mubr.f32.mxu0 %v8634_v0 }
 0x1f7   :  { %6389 = vmatpush3.msra.mxu1 %v6032_v12  ;;  %6390 = vmatprep.mubr.msk.f32.mxu1 %vm6448_vm2, %v8634_v0 }
 0x1f8   :  { %6086 = vmatmul.mubr.msk.f32.vlgmr.msra.gmra.mxu0 %vm1514_vm3, %v7914_v23  ;;  %6391 = vmatmul.mubr.msk.f32.vlgmr.msra.gmra.mxu1 %vm1514_vm3, %v7914_v23 }
 0x1f9   :  { %5163 = vmatprep.subr.mxu0 %v6048_v44  ;;  %6393 = vmatprep.subr.mxu1 %v8634_v0  ;;  %v5352_v44 = vld [vmem:[%s8628_s5 + $0x88] sm:$0xff] }
 0x1fa   :  { %5164 = vmatpush1.msra.mxu0 %v6047_v24  ;;  %6394 = vmatpush3.msra.mxu1 %v6049_v25  ;;  %v5367_v24 = vld [vmem:[%s8628_s5 + $0x100] sm:$0xff]  ;;  %v5336_v25 = vld [vmem:[%s8628_s5 + $0x8] sm:$0xff] }
 0x1fb   :  { %5165 = vmatprep.subr.mxu0 %v6045_v29  ;;  %6395 = vmatprep.subr.mxu1 %v8634_v0 }
 0x1fc   :  { %5166 = vmatpush1.msra.mxu0 %v6044_v27  ;;  %5199 = vmatprep.mubr.f32.mxu0 %v8634_v0  ;;  %v5351_v27 = vld [vmem:[%s8628_s5 + $0x80] sm:$0xff] }
 0x1fd   :  { %6396 = vmatpush3.msra.mxu1 %v6046_v8  ;;  %6397 = vmatprep.mubr.msk.f32.mxu1 %vm6448_vm2, %v8634_v0  ;;  %v5335_v8 = vld [vmem:[%s8628_s5] sm:$0xff] }
 0x1fe   :  { %6088 = vmatmul.mubr.msk.f32.vlgmr.msra.gmra.mxu0 %vm1514_vm3, %v7947_v48  ;;  %6398 = vmatmul.mubr.msk.f32.vlgmr.msra.gmra.mxu1 %vm1514_vm3, %v7947_v48  ;;  %v5366_v48 = vld [vmem:[%s8628_s5 + $0xf8] sm:$0xff] }
 0x1ff   :  { %6400 = vmatprep.subr.mxu1 %v8634_v0  ;;  %6412 = vmatprep.mubr.msk.f32.mxu1 %vm6448_vm2, %v8634_v0 }
 0x200   :  { %6171 = vmatprep.subr.mxu0 %v5366_v48  ;;  %6401 = vmatpush3.msk.msra.mxu1 %vm5384_vm4, %v5372_v59 }
 0x201   :  { %6172 = vmatpush3.msra.mxu0 %v5350_v16  ;;  %6402 = vmatprep.subr.mxu1 %v8634_v0 }
 0x202   :  { %6173 = vmatprep.subr.mxu0 %v5365_v60  ;;  %6403 = vmatpush3.msra.mxu1 %v5371_v3 }
 0x203   :  { %6174 = vmatpush3.msra.mxu0 %v5349_v21  ;;  %6404 = vmatprep.subr.mxu1 %v8634_v0 }
 0x204   :  { %6175 = vmatprep.subr.mxu0 %v5364_v35  ;;  %6405 = vmatpush3.msra.mxu1 %v5370_v19 }
 0x205   :  { %6176 = vmatpush3.msra.mxu0 %v5348_v38  ;;  %6406 = vmatprep.subr.mxu1 %v8634_v0 }
 0x206   :  { %6177 = vmatprep.subr.mxu0 %v5363_v36  ;;  %6407 = vmatpush3.msra.mxu1 %v5369_v34 }
 0x207   :  { %6178 = vmatpush3.msra.mxu0 %v5347_v17  ;;  %6408 = vmatprep.subr.mxu1 %v8634_v0 }
 0x208   :  { %6179 = vmatprep.subr.mxu0 %v5362_v13  ;;  %6409 = vmatpush3.msra.mxu1 %v5368_v63 }
 0x209   :  { %6180 = vmatpush3.msra.mxu0 %v5346_v26  ;;  %6410 = vmatprep.subr.mxu1 %v8634_v0 }
 0x20a   :  { %6181 = vmatprep.subr.mxu0 %v5361_v43  ;;  %6411 = vmatpush3.msra.mxu1 %v5367_v24 }
 0x20b   :  { %6182 = vmatpush3.msra.mxu0 %v5345_v46  ;;  %6415 = vmatprep.subr.mxu1 %v8634_v0 }
 0x20c   :  { %6183 = vmatprep.subr.mxu0 %v5360_v58 }
 0x20d   :  { %6184 = vmatpush3.msra.mxu0 %v5344_v14 }
 0x20e   :  { %6185 = vmatprep.subr.mxu0 %v5359_v53 }
 0x20f   :  { %6186 = vmatpush3.msra.mxu0 %v5343_v54 }
 0x210   :  { %6187 = vmatprep.subr.mxu0 %v5358_v55 }
 0x211   :  { %6188 = vmatpush3.msra.mxu0 %v5342_v33 }
 0x212   :  { %6189 = vmatprep.subr.mxu0 %v5357_v32 }
 0x213   :  { %6190 = vmatpush3.msra.mxu0 %v5341_v1 }
 0x214   :  { %6191 = vmatprep.subr.mxu0 %v5356_v2 }
 0x215   :  { %6192 = vmatpush3.msra.mxu0 %v5340_v5 }
 0x216   :  { %6193 = vmatprep.subr.mxu0 %v5355_v10 }
 0x217   :  { %6194 = vmatpush3.msra.mxu0 %v5339_v6 }
 0x218   :  { %6195 = vmatprep.subr.mxu0 %v5354_v9 }
 0x219   :  { %v8311_v23 = vpop.f32.mrf.mxu1  ;;  %v8317_v42 = vpop.f32.mrf.mxu0  ;;  %6196 = vmatpush3.msra.mxu0 %v5338_v57 }
 0x21a   :  { %6197 = vmatprep.subr.mxu0 %v5353_v11 }
 0x21b   :  { %v6231_v30 = vpop.f32.mrf.mxu1  ;;  %v8339_v39 = vpop.f32.mrf.mxu0  ;;  %6198 = vmatpush3.msra.mxu0 %v5337_v20 }
 0x21c   :  { %6199 = vmatprep.subr.mxu0 %v5352_v44 }
 0x21d   :  { %6200 = vmatpush3.msra.mxu0 %v5336_v25 }
 0x21e   :  { %6201 = vmatprep.subr.mxu0 %v5351_v27 }
 0x21f   :  { %6202 = vmatpush3.msra.mxu0 %v5335_v8 }
 0x221   :  { %v8313_v28 = vpop.f32.mrf.mxu1  ;;  %v8341_v18 = vpop.f32.mrf.mxu0 }
 0x223   :  { %v6238_v15 = vpop.f32.mrf.mxu1  ;;  %v8355_v22 = vpop.f32.mrf.mxu0 }
 0x229   :  { %v8315_v7 = vpop.f32.mrf.mxu1  ;;  %v8365_v51 = vpop.f32.mrf.mxu0 }
 0x22b   :  { %v6245_v31 = vpop.f32.mrf.mxu1  ;;  %v8379_v45 = vpop.f32.mrf.mxu0 }
 0x231   :  { %v8331_v50 = vpop.f32.mrf.mxu1  ;;  %v8387_v56 = vpop.f32.mrf.mxu0 }
 0x233   :  { %v6252_v41 = vpop.f32.mrf.mxu1  ;;  %v8411_v62 = vpop.f32.mrf.mxu0 }
 0x239   :  { %v8357_v49 = vpop.f32.mrf.mxu1  ;;  %v8423_v47 = vpop.f32.mrf.mxu0 }
 0x23b   :  { %v6259_v52 = vpop.f32.mrf.mxu1  ;;  %v8447_v40 = vpop.f32.mrf.mxu0 }
 0x241   :  { %v8389_v37 = vpop.f32.mrf.mxu1  ;;  %v8459_v29 = vpop.f32.mrf.mxu0 }
 0x243   :  { %v6266_v61 = vpop.f32.mrf.mxu1  ;;  %v8468_v30 = vpop.f32.mrf.mxu0 }
 0x249   :  { %v8435_v4 = vpop.f32.mrf.mxu1  ;;  %v8472_v31 = vpop.f32.mrf.mxu0 }
 0x24b   :  { %v6273_v12 = vpop.f32.mrf.mxu1  ;;  %v8474_v16 = vpop.f32.mrf.mxu0 }
 0x251   :  { %v8470_v15 = vpop.f32.mrf.mxu1  ;;  %v8476_v60 = vpop.f32.mrf.mxu0 }
 0x253   :  { %v6280_v48 = vpop.f32.mrf.mxu1  ;;  %v8480_v38 = vpop.f32.mrf.mxu0 }
 0x259   :  { %v8478_v21 = vpop.f32.mrf.mxu1  ;;  %v8482_v41 = vpop.f32.mrf.mxu0 }
 0x25a   :  { %8636 = vst [vmem:[#allocation2_spill] sm:$0xff] %v8478_v21  ;;  %8637 = vst [vmem:[#allocation3_spill] sm:$0xff] %v8482_v41 }
 0x25b   :  { %v6287_v35 = vpop.f32.mrf.mxu1  ;;  %v8486_v17 = vpop.f32.mrf.mxu0 }
 0x25c   :  { %8639 = vst [vmem:[#allocation5_spill] sm:$0xff] %v8486_v17 }
 0x261   :  { %v8484_v36 = vpop.f32.mrf.mxu1  ;;  %v8488_v26 = vpop.f32.mrf.mxu0 }
 0x262   :  { %8638 = vst [vmem:[#allocation4_spill] sm:$0xff] %v8484_v36  ;;  %8640 = vst [vmem:[#allocation6_spill] sm:$0xff] %v8488_v26 }
 0x263   :  { %v6294_v13 = vpop.f32.mrf.mxu1  ;;  %v8490_v43 = vpop.f32.mrf.mxu0 }
 0x264   :  { %8641 = vst [vmem:[#allocation7_spill] sm:$0xff] %v8490_v43 }
 0x269   :  { %v8492_v46 = vpop.f32.mrf.mxu1  ;;  %v8494_v52 = vpop.f32.mrf.mxu0 }
 0x26a   :  { %8642 = vst [vmem:[#allocation8_spill] sm:$0xff] %v8492_v46  ;;  %8643 = vst [vmem:[#allocation9_spill] sm:$0xff] %v8494_v52 }
 0x26b   :  { %v6301_v58 = vpop.f32.mrf.mxu1  ;;  %v8496_v14 = vpop.f32.mrf.mxu0 }
 0x26c   :  { %8644 = vst [vmem:[#allocation10_spill] sm:$0xff] %v8496_v14 }
 0x271   :  { %v8498_v53 = vpop.f32.mrf.mxu0  ;;  %v8500_v54 = vpop.f32.mrf.mxu1 }
 0x272   :  { %8645 = vst [vmem:[#allocation11_spill] sm:$0xff] %v8498_v53  ;;  %8646 = vst [vmem:[#allocation12_spill] sm:$0xff] %v8500_v54  ;;  %v5314_v54 = vlaneseq }
 0x273   :  { %v8502_v55 = vpop.f32.mrf.mxu0  ;;  %v6308_v33 = vpop.f32.mrf.mxu1 }
 0x274   :  { %8647 = vst [vmem:[#allocation13_spill] sm:$0xff] %v8502_v55  ;;  %v8512_v46 = vshrl.u32 %v5314_v54, 7 }
 0x276   :  { %v8504_v32 = vpop.f32.mrf.mxu0  ;;  %v8506_v59 = vpop.f32.mrf.mxu1  ;;  %v5316_v26 = vsub.s32 0, %v8512_v46  ;;  %v5320_v54 = vsub.s32 1, %v8512_v46 }
 0x277   :  { %8648 = vst [vmem:[#allocation14_spill] sm:$0xff] %v8504_v32  ;;  %8649 = vst [vmem:[#allocation15_spill] sm:$0xff] %v8506_v59 }
 0x278   :  { %v8508_v1 = vpop.f32.mrf.mxu0  ;;  %v6315_v61 = vpop.f32.mrf.mxu1 }
 0x279   :  { %8650 = vst [vmem:[#allocation16_spill] sm:$0xff] %v8508_v1 }
 0x27c   :  { %v3617_v2 = vpop.f32.mrf.mxu0  ;;  %v3688_v3 = vpop.f32.mrf.mxu1 }
 0x27d   :  { %v3689_v21 = vadd.f32 %v3688_v3, %v8311_v23 }
 0x27e   :  { %v3619_v5 = vpop.f32.mrf.mxu0  ;;  %v6322_v10 = vpop.f32.mrf.mxu1 }
 0x282   :  { %v3761_v19 = vpop.f32.mrf.mxu0  ;;  %v3832_v6 = vpop.f32.mrf.mxu1 }
 0x284   :  { %v3763_v9 = vpop.f32.mrf.mxu0  ;;  %v6329_v34 = vpop.f32.mrf.mxu1 }
 0x288   :  { %v3905_v57 = vpop.f32.mrf.mxu0  ;;  %v3976_v11 = vpop.f32.mrf.mxu1 }
 0x289   :  { %v3977_v3 = vadd.f32 %v3976_v11, %v8315_v7 }
 0x28a   :  { %v3907_v63 = vpop.f32.mrf.mxu0  ;;  %v6336_v20 = vpop.f32.mrf.mxu1 }
 0x28e   :  { %v4049_v12 = vpop.f32.mrf.mxu0  ;;  %v4120_v44 = vpop.f32.mrf.mxu1 }
 0x28f   :  { %v4121_v23 = vadd.f32 %v4120_v44, %v8331_v50  ;;  %v8652_v44 = vld [vmem:[#allocation4_spill] sm:$0xff] }
 0x290   :  { %v4051_v24 = vpop.f32.mrf.mxu0  ;;  %v6343_v25 = vpop.f32.mrf.mxu1 }
 0x291   :  { %v5281_v11 = vadd.f32 %v4121_v23, %v3977_v3 }
 0x294   :  { %v4193_v27 = vpop.f32.mrf.mxu0  ;;  %v4264_v8 = vpop.f32.mrf.mxu1 }
 0x296   :  { %v4195_v48 = vpop.f32.mrf.mxu0  ;;  %v6350_v35 = vpop.f32.mrf.mxu1 }
 0x297   :  { %v3762_v35 = vadd.f32 %v3761_v19, %v8341_v18  ;;  %v3620_v18 = vadd.f32 %v3619_v5, %v8339_v39 }
 0x29a   :  { %v4337_v13 = vpop.f32.mrf.mxu0  ;;  %v4408_v58 = vpop.f32.mrf.mxu1 }
 0x29c   :  { %v4339_v33 = vpop.f32.mrf.mxu0  ;;  %v6357_v61 = vpop.f32.mrf.mxu1 }
 0x29d   :  { %v3833_v61 = vadd.f32 %v3832_v6, %v8313_v28  ;;  %v4050_v6 = vadd.f32 %v4049_v12, %v8387_v56  ;;  %v4194_v56 = vadd.f32 %v4193_v27, %v8423_v47  ;;  %v4340_v50 = vadd.f32 %v4339_v33, %v8468_v30  ;;  %v8651_v30 = vld [vmem:[#allocation6_spill] sm:$0xff]  ;;  %v8656_v33 = vld [vmem:[#allocation9_spill] sm:$0xff] }
 0x29f   :  { %v5278_v28 = vadd.f32 %v3833_v61, %v3689_v21 }
 0x2a0   :  { %v4481_v10 = vpop.f32.mrf.mxu0  ;;  %v4552_v0 = vpop.f32.mrf.mxu1 }
 0x2a2   :  { %v4483_v1 = vpop.f32.mrf.mxu0  ;;  %v6364_v34 = vpop.f32.mrf.mxu1 }
 0x2a3   :  { %v3618_v34 = vadd.f32 %v3617_v2, %v8317_v42  ;;  %v3764_v42 = vadd.f32 %v3763_v9, %v8355_v22  ;;  %v4338_v2 = vadd.f32 %v4337_v13, %v8459_v29  ;;  %v4409_v22 = vadd.f32 %v4408_v58, %v8389_v37  ;;  %v8654_v13 = vld [vmem:[#allocation2_spill] sm:$0xff] }
 0x2a4   :  { %v3908_v29 = vadd.f32 %v3907_v63, %v8379_v45  ;;  %v4484_v37 = vadd.f32 %v4483_v1, %v8474_v16  ;;  %v8657_v1 = vld [vmem:[#allocation8_spill] sm:$0xff] }
 0x2a5   :  { %v5276_v19 = vadd.f32 %v3762_v35, %v3618_v34  ;;  %v5282_v47 = vadd.f32 %v4338_v2, %v4194_v56  ;;  %v5277_v56 = vadd.f32 %v3764_v42, %v3620_v18 }
 0x2a6   :  { %v4625_v59 = vpop.f32.mrf.mxu0  ;;  %v4696_v32 = vpop.f32.mrf.mxu1 }
 0x2a7   :  { %v4626_v36 = vadd.f32 %v4625_v59, %v8476_v60  ;;  %v4482_v60 = vadd.f32 %v4481_v10, %v8472_v31  ;;  %v3906_v59 = vadd.f32 %v3905_v57, %v8365_v51  ;;  %v4697_v39 = vadd.f32 %v4696_v32, %v8470_v15 }
 0x2a8   :  { %v4627_v55 = vpop.f32.mrf.mxu0  ;;  %v6371_v20 = vpop.f32.mrf.mxu1  ;;  %v4553_v51 = vadd.f32 %v4552_v0, %v8435_v4  ;;  %v4265_v15 = vadd.f32 %v4264_v8, %v8357_v49  ;;  %v4196_v32 = vadd.f32 %v4195_v48, %v8447_v40  ;;  %v8655_v49 = vld [vmem:[#allocation7_spill] sm:$0xff] }
 0x2a9   :  { %v5285_v9 = vadd.f32 %v4626_v36, %v4482_v60  ;;  %v5279_v31 = vadd.f32 %v4050_v6, %v3906_v59  ;;  %v4628_v7 = vadd.f32 %v4627_v55, %v8480_v38  ;;  %v8653_v55 = vld [vmem:[#allocation3_spill] sm:$0xff]  ;;  %v8660_v6 = vld [vmem:[#allocation5_spill] sm:$0xff]  ;;  %v8661_v59 = vld [vmem:[#allocation10_spill] sm:$0xff] }
 0x2aa   :  { %v5287_v12 = vadd.f32 %v4697_v39, %v4553_v51  ;;  %v5283_v0 = vadd.f32 %v4340_v50, %v4196_v32  ;;  %v5296_v50 = vadd.f32 %v5281_v11, %v5278_v28  ;;  %v8665_v11 = vld [vmem:[#allocation16_spill] sm:$0xff] }
 0x2ab   :  { %v5297_v4 = vadd.f32 %v5285_v9, %v5282_v47  ;;  %v5286_v38 = vadd.f32 %v4628_v7, %v4484_v37  ;;  %v8663_v47 = vld [vmem:[#allocation14_spill] sm:$0xff] }
 0x2ac   :  { %v4769_v14 = vpop.f32.mrf.mxu0  ;;  %v4840_v17 = vpop.f32.mrf.mxu1 }
 0x2ad   :  { %v4770_v27 = vadd.f32 %v4769_v14, %v8653_v55  ;;  %v4841_v58 = vadd.f32 %v4840_v17, %v8654_v13  ;;  %v5298_v9 = vadd.f32 %v5286_v38, %v5283_v0  ;;  %v8666_v38 = vmov 0.0   ;;  %v5537_v55 = vld [vmem:[%s8630_s7 + $0x40] sm:$0xff]  ;;  %v5535_v13 = vld [vmem:[%s8630_s7 + $0x30] sm:$0xff] }
 0x2ae   :  { %v8510_v25 = vpop.f32.mrf.mxu0  ;;  %v6378_v53 = vpop.f32.mrf.mxu1 }
 0x2af   :  { %v5324_v53 = vsub.s32 2, %v8512_v46  ;;  %v4772_v23 = vadd.f32 %v8510_v25, %v8660_v6  ;;  %v5538_v46 = vld [vmem:[%s8630_s7 + $0x48] sm:$0xff] }
 0x2b2   :  { %v4913_v52 = vpop.f32.mrf.mxu0  ;;  %v4984_v43 = vpop.f32.mrf.mxu1 }
 0x2b3   :  { %v4914_v36 = vadd.f32 %v4913_v52, %v8651_v30  ;;  %v4985_v45 = vadd.f32 %v4984_v43, %v8652_v44  ;;  %v8658_v52 = vld [vmem:[#allocation11_spill] sm:$0xff]  ;;  %v8659_v43 = vld [vmem:[#allocation12_spill] sm:$0xff] }
 0x2b4   :  { %v4915_v41 = vpop.f32.mrf.mxu0  ;;  %v6385_v20 = vpop.f32.mrf.mxu1 }
 0x2b5   :  { %v4052_v20 = vadd.f32 %v4051_v24, %v8411_v62  ;;  %v5284_v24 = vadd.f32 %v4409_v22, %v4265_v15  ;;  %v4916_v8 = vadd.f32 %v4915_v41, %v8655_v49  ;;  %v5288_v2 = vadd.f32 %v4914_v36, %v4770_v27  ;;  %v5536_v27 = vld [vmem:[%s8630_s7 + $0x38] sm:$0xff]  ;;  %v5533_v49 = vld [vmem:[%s8630_s7 + $0x20] sm:$0xff] }
 0x2b6   :  { %v5290_v14 = vadd.f32 %v4985_v45, %v4841_v58  ;;  %v5294_v22 = vadd.f32 %v5279_v31, %v5276_v19  ;;  %v5534_v58 = vld [vmem:[%s8630_s7 + $0x28] sm:$0xff] }
 0x2b7   :  { %v5280_v63 = vadd.f32 %v4052_v20, %v3908_v29  ;;  %v5299_v34 = vadd.f32 %v5287_v12, %v5284_v24  ;;  %v5312_v20 = vld [vmem:[%s8629_s4] sm:$0x7]  ;;  %v5289_v29 = vadd.f32 %v4916_v8, %v4772_v23  ;;  %v8664_v12 = vld [vmem:[#allocation15_spill] sm:$0xff]  ;;  %v5532_v8 = vld [vmem:[%s8630_s7 + $0x18] sm:$0xff] }
 0x2b8   :  { %v5057_v5 = vpop.f32.mrf.mxu0  ;;  %v5128_v21 = vpop.f32.mrf.mxu1  ;;  %v5303_v15 = vadd.f32 %v5297_v4, %v5294_v22  ;;  %v5317_v18 = vrot.slane %v5312_v20, %v5316_v26  ;;  %v5321_v19 = vrot.slane %v5312_v20, %v5320_v54  ;;  %v5539_v4 = vld [vmem:[%s8630_s7 + $0x50] sm:$0xf]  ;;  %v6093_v23 = vld [vmem:[%s8632_s8] ss:$0 sm:$0xff] }
 0x2b9   :  { %v5058_v16 = vadd.f32 %v5057_v5, %v8656_v33  ;;  %v5129_v10 = vadd.f32 %v5128_v21, %v8657_v1  ;;  %v8662_v5 = vld [vmem:[#allocation13_spill] sm:$0xff]  ;;  %v5305_v32 = vadd.f32 %v5299_v34, %v5296_v50  ;;  %v5529_v33 = vld [vmem:[%s8630_s7] sm:$0xff] }
 0x2ba   :  { %v5059_v57 = vpop.f32.mrf.mxu0  ;;  %v6392_v62 = vpop.f32.mrf.mxu1 }
 0x2bb   :  { %v5060_v41 = vadd.f32 %v5059_v57, %v8661_v59  ;;  %v5295_v62 = vadd.f32 %v5280_v63, %v5277_v56  ;;  %v5325_v57 = vrot.slane %v5312_v20, %v5324_v53 }
 0x2bd   :  { %v5304_v28 = vadd.f32 %v5298_v9, %v5295_v62 }
 0x2be   :  { %v5201_v40 = vpop.f32.mrf.mxu0  ;;  %v5272_v48 = vpop.f32.mrf.mxu1 }
 0x2bf   :  { %v5202_v35 = vadd.f32 %v5201_v40, %v8658_v52  ;;  %v5273_v61 = vadd.f32 %v5272_v48, %v8659_v43  ;;  %v5531_v40 = vld [vmem:[%s8630_s7 + $0x10] sm:$0xff]  ;;  %v5530_v48 = vld [vmem:[%s8630_s7 + $0x8] sm:$0xff]  ;;  %v6090_v52 = vld [vmem:[%s8631_s6] ss:$0 sm:$0xff] }
 0x2c0   :  { %v5203_v60 = vpop.f32.mrf.mxu0  ;;  %v6399_v17 = vpop.f32.mrf.mxu1 }
 0x2c1   :  { %v5291_v3 = vadd.f32 %v5202_v35, %v5058_v16  ;;  %v5293_v39 = vadd.f32 %v5273_v61, %v5129_v10  ;;  %v5204_v21 = vadd.f32 %v5203_v60, %v8662_v5 }
 0x2c3   :  { %v5300_v25 = vadd.f32 %v5291_v3, %v5288_v2  ;;  %v5302_v51 = vadd.f32 %v5293_v39, %v5290_v14  ;;  %v5292_v7 = vadd.f32 %v5204_v21, %v5060_v41 }
 0x2c5   :  { %v5306_v37 = vadd.f32 %v5300_v25, %v8663_v47  ;;  %v5308_v30 = vadd.f32 %v5302_v51, %v8664_v12  ;;  %v5301_v36 = vadd.f32 %v5292_v7, %v5289_v29 }
 0x2c7   :  { %v5309_v42 = vadd.f32 %v5306_v37, %v5303_v15  ;;  %v5311_v31 = vadd.f32 %v5308_v30, %v5305_v32  ;;  %v5307_v44 = vadd.f32 %v5301_v36, %v8665_v11 }
 0x2c9   :  { %v5331_v45 = vadd.f32 %v5325_v57, %v5311_v31  ;;  %v5310_v63 = vadd.f32 %v5307_v44, %v5304_v28  ;;  %v5329_v53 = vadd.f32 %v5317_v18, %v5309_v42 }
 0x2cb   :  { %v5334_v24 = vmax.f32 %v5331_v45, 0.0  ;;  %v5330_v0 = vadd.f32 %v5321_v19, %v5310_v63  ;;  %v5332_v54 = vmax.f32 %v5329_v53, 0.0 }
 0x2cd   :  { %6413 = vmatmul.mubr.msk.f32.vlgmr.msra.gmra.mxu1 %vm5380_vm5, %v5334_v24  ;;  %v5333_v26 = vmax.f32 %v5330_v0, 0.0 }
 0x2ce   :  { %6416 = vmatpush3.msk.msra.mxu1 %vm5384_vm4, %v5539_v4  ;;  %6437 = vmatprep.mubr.msk.f32.mxu1 %vm6448_vm2, %v8666_v38 }
 0x2cf   :  { %5452 = vmatprep.mubr.f32.mxu0 %v5333_v26  ;;  %6417 = vmatprep.subr.mxu1 %v8666_v38 }
 0x2d0   :  { %5453 = vmatmul.mubr.f32.vlgmr.msra.gmra.mxu0 %v5332_v54  ;;  %6418 = vmatpush3.msra.mxu1 %v5538_v46 }
 0x2d1   :  { %6419 = vmatprep.subr.mxu1 %v8666_v38 }
 0x2d2   :  { %6420 = vmatpush3.msra.mxu1 %v5537_v55 }
 0x2d3   :  { %6421 = vmatprep.subr.mxu1 %v8666_v38 }
 0x2d4   :  { %6422 = vmatpush3.msra.mxu1 %v5536_v27 }
 0x2d5   :  { %6423 = vmatprep.subr.mxu1 %v8666_v38 }
 0x2d6   :  { %6424 = vmatpush3.msra.mxu1 %v5535_v13 }
 0x2d7   :  { %6425 = vmatprep.subr.mxu1 %v8666_v38 }
 0x2d8   :  { %6426 = vmatpush3.msra.mxu1 %v5534_v58 }
 0x2d9   :  { %6427 = vmatprep.subr.mxu1 %v8666_v38 }
 0x2da   :  { %6428 = vmatpush3.msra.mxu1 %v5533_v49 }
 0x2db   :  { %6429 = vmatprep.subr.mxu1 %v8666_v38 }
 0x2dc   :  { %6430 = vmatpush3.msra.mxu1 %v5532_v8 }
 0x2dd   :  { %6431 = vmatprep.subr.mxu1 %v8666_v38 }
 0x2de   :  { %6432 = vmatpush3.msra.mxu1 %v5531_v40 }
 0x2df   :  { %6433 = vmatprep.subr.mxu1 %v8666_v38 }
 0x2e0   :  { %6434 = vmatpush3.msra.mxu1 %v5530_v48 }
 0x2e1   :  { %6435 = vmatprep.subr.mxu1 %v8666_v38 }
 0x2e2   :  { %6436 = vmatpush3.msra.mxu1 %v5529_v33 }
 0x38d   :  { %v5524_v16 = vpop.f32.mrf.mxu1 }
 0x38f   :  { %v6414_v1 = vpop.f32.mrf.mxu1 }
 0x390   :  { %v6203_v10 = vpop.f32.mrf.mxu0 }
 0x392   :  { %v6204_v35 = vpop.f32.mrf.mxu0 }
 0x393   :  { %v6205_v43 = vadd.f32 %v6204_v35, %v6203_v10 }
 0x395   :  { %v5455_v61 = vadd.f32 %v6205_v43, %v6090_v52 }
 0x397   :  { %v5525_v34 = vadd.f32 %v5524_v16, %v5455_v61 }
 0x399   :  { %v5528_v6 = vmax.f32 %v5525_v34, 0.0 }
 0x39b   :  { %6438 = vmatmul.mubr.msk.f32.vlgmr.msra.gmra.mxu1 %vm5547_vm6, %v5528_v6 }
 0x45b   :  { %v5620_v2 = vpop.f32.mrf.mxu1 }
 0x45c   :  { %v5621_v14 = vadd.f32 %v6093_v23, %v5620_v2 }
 0x45d   :  { %v6439_v60 = vpop.f32.mrf.mxu1 }
 0x45e   :  { %v5625_v17 = vsel %vm5624_vm7, %v5621_v14, -inf }
 0x45f   :  { %5626 = vmax.xlane.f32.xlu0 %v5625_v17 }
 0x4e8   :  { %v5627_v59 = vpop.xlane.xlu0 %5626 }
 0x4e9   :  { %v5628_v41 = vsub.f32 %v5621_v14, %v5627_v59 }
 0x4eb   :  { %v5629_v3 = vmul.f32 1.442695, %v5628_v41 }
 0x4ed   :  { %6442 = vpow2.f32 %v5629_v3 }
 0x4fa   :  { %v6443_v20 = vpop.eup %6442 }
 0x4fb   :  { %v5631_v39 = vsel %vm5624_vm7, %v6443_v20, 0.0 }
 0x4fc   :  { %5632 = vadd.xlane.f32.xlu0 %v5631_v39 }
 0x585   :  { %v5633_v5 = vpop.xlane.xlu0 %5632 }
 0x586   :  { %6444 = vrcp.f32 %v5633_v5 }
 0x593   :  { %v6445_v21 = vpop.eup %6444 }
 0x594   :  { %v5635_v56 = vmul.f32 %v6445_v21, %v6443_v20 }
 0x596   :  { %5636 = vst.msk [vmem:[%s8633_s9] sm:$0xff] %vm5624_vm7, %v5635_v56 }

</bundles_post_ra>
